<compile_context>
chip_gen: v5e
topology: v5e:2x2
jax: 0.10.0
libtpu: 0.0.40
codegen_flags: <defaults>
</compile_context>

<pallas_src>
import jax
import jax.numpy as jnp
from jax.experimental import pallas as pl
from jax.experimental.pallas import tpu as pltpu

# Output widths of fc1..fc10.
LAYER_DIMS = [1024, 512, 256, 128, 64, 128, 256, 512, 1024, 1]
OUT_DIM = 1          # real width of the final layer
_LANE = 128


def _round_up(n, m):
    return ((n + m - 1) // m) * m


def _mlp_kernel(x_ref, *refs):
    """refs = (w1, b1, w2, b2, ..., w10, b10, o_ref).  Weights bf16, biases f32."""
    o_ref = refs[-1]
    param_refs = refs[:-1]
    n_layers = len(param_refs) // 2

    h = x_ref[...]                          # bf16 (block_m, in_features)
    for l in range(n_layers):
        w = param_refs[2 * l][...]          # (in_l, out_l)  bf16
        b = param_refs[2 * l + 1][...]      # (1, out_l)     f32
        # bf16 x bf16 -> f32 accumulation on the MXU; bias add / ReLU in f32.
        h = jnp.dot(h.astype(w.dtype), w, preferred_element_type=jnp.float32) + b
        if l < n_layers - 1:
            h = jnp.maximum(h, 0.0)         # ReLU
    # Final layer's weight may be column-padded for MXU lane width; only the
    # first o_ref.shape[-1] columns are real.  Sigmoid + store just those.
    o_ref[...] = jax.nn.sigmoid(h[:, :o_ref.shape[-1]]).astype(o_ref.dtype)


def prepare_params(params):
    """One-time (call OUTSIDE jit) parameter preparation.

    params: list of (W (in,out) f32, b (1,out) f32) pairs.
    Returns a flat list [w1, b1, ..., w10, b10] with weights cast to bf16,
    biases in f32, and the final layer zero-padded to 128 output columns
    (the padded columns are never written to the kernel output).
    """
    flat = []
    n = len(params)
    for l, (w, b) in enumerate(params):
        if l == n - 1 and w.shape[1] < _LANE:
            pad = _LANE - w.shape[1]
            w = jnp.pad(w, ((0, 0), (0, pad)))
            b = jnp.pad(b, ((0, 0), (0, pad)))
        flat.append(jnp.asarray(w, jnp.bfloat16))
        flat.append(jnp.asarray(b, jnp.float32))
    return flat


def model4_1_forward(x, flat_params, *, block_m=None):
    """x: (B, in_features); flat_params: output of prepare_params."""
    B, in_features = x.shape
    # One tiny cast at the boundary (callers may pre-cast x to bf16 to skip it).
    if x.dtype != jnp.bfloat16:
        x = x.astype(jnp.bfloat16)

    # Batch tile: single grid step for small batches (pure latency path);
    # otherwise an even-ish grid >= 2 with large tiles (megacore sharding on
    # v7x, per-step overhead amortization on v5e/v6e).
    if block_m is None:
        if B <= 256:
            block_m = B
        else:
            block_m = min(1024, _round_up(pl.cdiv(B, 2), 256))
    grid = (pl.cdiv(B, block_m),)

    # x streams per grid step; weights/biases have constant index maps and are
    # fetched once, staying resident in VMEM across the whole grid.
    in_specs = [pl.BlockSpec((block_m, in_features), lambda i: (i, 0))]
    flat_args = [x]
    for idx in range(0, len(flat_params), 2):
        w = flat_params[idx]
        b = flat_params[idx + 1]
        in_specs.append(pl.BlockSpec(w.shape, lambda i: (0, 0)))
        in_specs.append(pl.BlockSpec(b.shape, lambda i: (0, 0)))
        flat_args.extend([w, b])

    out_spec = pl.BlockSpec((block_m, OUT_DIM), lambda i: (i, 0))

    return pl.pallas_call(
        _mlp_kernel,
        out_shape=jax.ShapeDtypeStruct((B, OUT_DIM), jnp.float32),
        grid_spec=pltpu.PrefetchScalarGridSpec(
            num_scalar_prefetch=0,
            grid=grid,
            in_specs=in_specs,
            out_specs=out_spec,
        ),
        compiler_params=pltpu.CompilerParams(
            dimension_semantics=("parallel",),
            vmem_limit_bytes=40 * 1024 * 1024,   # well within v7x's 64 MiB VMEM
        ),
    )(*flat_args)


def init_params(key, in_features):
    """Deterministic Linear params, PyTorch-style uniform(-1/sqrt(fan_in), ...)."""
    params = []
    fan_in = in_features
    for out_dim in LAYER_DIMS:
        key, kw, kb = jax.random.split(key, 3)
        bound = 1.0 / jnp.sqrt(jnp.float32(fan_in))
        # Stored as (in, out) (transposed w.r.t. torch.nn.Linear's (out, in)).
        w = jax.random.uniform(kw, (fan_in, out_dim), jnp.float32, -bound, bound)
        b = jax.random.uniform(kb, (1, out_dim), jnp.float32, -bound, bound)
        params.append((w, b))
        fan_in = out_dim
    return params


def reference_forward_f32(x, params):
    """Pure-f32 reference (original module semantics)."""
    h = x.astype(jnp.float32)
    for i, (w, b) in enumerate(params):
        h = h @ w + b
        h = jnp.maximum(h, 0.0) if i < len(params) - 1 else jax.nn.sigmoid(h)
    return h


def reference_forward_bf16(x, params):
    """Same bf16-weight / f32-accumulate arithmetic as the kernel."""
    h = x.astype(jnp.bfloat16)
    for i, (w, b) in enumerate(params):
        h = jnp.dot(h.astype(jnp.bfloat16), w.astype(jnp.bfloat16),
                    preferred_element_type=jnp.float32) + b.astype(jnp.float32)
        h = jnp.maximum(h, 0.0) if i < len(params) - 1 else jax.nn.sigmoid(h)
    return h


if __name__ == "__main__":
    key = jax.random.PRNGKey(0)
    key, kx, kx2 = jax.random.split(key, 3)

    in_features = 32
    params = init_params(key, in_features)
    flat_params = prepare_params(params)          # one-time pad + bf16 cast
    fwd = jax.jit(model4_1_forward, static_argnames=("block_m",))

    # Small batch: single-grid-step latency path.
    x_small = jax.random.normal(kx, (8, in_features), jnp.float32)
    out_small = fwd(x_small, flat_params)
    jax.block_until_ready(out_small)
    assert out_small.shape == (8, 1), out_small.shape
    ref_bf16 = reference_forward_bf16(x_small, params)
    ref_f32 = reference_forward_f32(x_small, params)
    assert jnp.allclose(out_small, ref_bf16, atol=1e-4, rtol=1e-4), (
        float(jnp.max(jnp.abs(out_small - ref_bf16))))
    assert jnp.allclose(out_small, ref_f32, atol=2e-2, rtol=2e-2), (
        float(jnp.max(jnp.abs(out_small - ref_f32))))

    # Larger batch with a partial last block (B=320, block_m=256, grid=2):
    # exercises the tiled "parallel" path and the clipped output writeback.
    x_big = jax.random.normal(kx2, (320, in_features), jnp.float32)
    out_big = fwd(x_big, flat_params)
    jax.block_until_ready(out_big)
    assert out_big.shape == (320, 1), out_big.shape
    ref_big = reference_forward_bf16(x_big, params)
    assert jnp.allclose(out_big, ref_big, atol=1e-4, rtol=1e-4), (
        float(jnp.max(jnp.abs(out_big - ref_big))))

    print("KERNEL_OK")
</pallas_src>

<mosaic_0001>
module attributes {stable_mosaic.version = 11 : i64} {
  func.func @_mlp_kernel(%arg0: i32, %arg1: memref<8x32xbf16, #tpu.memory_space<vmem>>, %arg2: memref<32x1024xbf16, #tpu.memory_space<vmem>>, %arg3: memref<1x1024xf32, #tpu.memory_space<vmem>>, %arg4: memref<1024x512xbf16, #tpu.memory_space<vmem>>, %arg5: memref<1x512xf32, #tpu.memory_space<vmem>>, %arg6: memref<512x256xbf16, #tpu.memory_space<vmem>>, %arg7: memref<1x256xf32, #tpu.memory_space<vmem>>, %arg8: memref<256x128xbf16, #tpu.memory_space<vmem>>, %arg9: memref<1x128xf32, #tpu.memory_space<vmem>>, %arg10: memref<128x64xbf16, #tpu.memory_space<vmem>>, %arg11: memref<1x64xf32, #tpu.memory_space<vmem>>, %arg12: memref<64x128xbf16, #tpu.memory_space<vmem>>, %arg13: memref<1x128xf32, #tpu.memory_space<vmem>>, %arg14: memref<128x256xbf16, #tpu.memory_space<vmem>>, %arg15: memref<1x256xf32, #tpu.memory_space<vmem>>, %arg16: memref<256x512xbf16, #tpu.memory_space<vmem>>, %arg17: memref<1x512xf32, #tpu.memory_space<vmem>>, %arg18: memref<512x1024xbf16, #tpu.memory_space<vmem>>, %arg19: memref<1x1024xf32, #tpu.memory_space<vmem>>, %arg20: memref<1024x128xbf16, #tpu.memory_space<vmem>>, %arg21: memref<1x128xf32, #tpu.memory_space<vmem>>, %arg22: memref<8x1xf32, #tpu.memory_space<vmem>>) attributes {dimension_semantics = [#tpu.dimension_semantics<parallel>], iteration_bounds = array<i64: 1>, scalar_prefetch = 0 : i64, scratch_operands = 0 : i64, tpu.core_type = #tpu.core_type<tc>, window_params = [{transform_indices = @transform_0, window_bounds = array<i64: 8, 32>}, {pipeline_mode = #tpu.pipeline_mode<synchronous>, transform_indices = @transform_1, window_bounds = array<i64: 32, 1024>}, {pipeline_mode = #tpu.pipeline_mode<synchronous>, transform_indices = @transform_2, window_bounds = array<i64: 1, 1024>}, {pipeline_mode = #tpu.pipeline_mode<synchronous>, transform_indices = @transform_3, window_bounds = array<i64: 1024, 512>}, {pipeline_mode = #tpu.pipeline_mode<synchronous>, transform_indices = @transform_4, window_bounds = array<i64: 1, 512>}, {pipeline_mode = #tpu.pipeline_mode<synchronous>, transform_indices = @transform_5, window_bounds = array<i64: 512, 256>}, {pipeline_mode = #tpu.pipeline_mode<synchronous>, transform_indices = @transform_6, window_bounds = array<i64: 1, 256>}, {pipeline_mode = #tpu.pipeline_mode<synchronous>, transform_indices = @transform_7, window_bounds = array<i64: 256, 128>}, {pipeline_mode = #tpu.pipeline_mode<synchronous>, transform_indices = @transform_8, window_bounds = array<i64: 1, 128>}, {pipeline_mode = #tpu.pipeline_mode<synchronous>, transform_indices = @transform_9, window_bounds = array<i64: 128, 64>}, {pipeline_mode = #tpu.pipeline_mode<synchronous>, transform_indices = @transform_10, window_bounds = array<i64: 1, 64>}, {pipeline_mode = #tpu.pipeline_mode<synchronous>, transform_indices = @transform_11, window_bounds = array<i64: 64, 128>}, {pipeline_mode = #tpu.pipeline_mode<synchronous>, transform_indices = @transform_12, window_bounds = array<i64: 1, 128>}, {pipeline_mode = #tpu.pipeline_mode<synchronous>, transform_indices = @transform_13, window_bounds = array<i64: 128, 256>}, {pipeline_mode = #tpu.pipeline_mode<synchronous>, transform_indices = @transform_14, window_bounds = array<i64: 1, 256>}, {pipeline_mode = #tpu.pipeline_mode<synchronous>, transform_indices = @transform_15, window_bounds = array<i64: 256, 512>}, {pipeline_mode = #tpu.pipeline_mode<synchronous>, transform_indices = @transform_16, window_bounds = array<i64: 1, 512>}, {pipeline_mode = #tpu.pipeline_mode<synchronous>, transform_indices = @transform_17, window_bounds = array<i64: 512, 1024>}, {pipeline_mode = #tpu.pipeline_mode<synchronous>, transform_indices = @transform_18, window_bounds = array<i64: 1, 1024>}, {pipeline_mode = #tpu.pipeline_mode<synchronous>, transform_indices = @transform_19, window_bounds = array<i64: 1024, 128>}, {pipeline_mode = #tpu.pipeline_mode<synchronous>, transform_indices = @transform_20, window_bounds = array<i64: 1, 128>}, {transform_indices = @transform_21, window_bounds = array<i64: 8, 1>}]} {
    %c0 = arith.constant 0 : index
    %c0_0 = arith.constant 0 : index
    %0 = vector.load %arg1[%c0, %c0_0] : memref<8x32xbf16, #tpu.memory_space<vmem>>, vector<8x32xbf16>
    %c0_1 = arith.constant 0 : index
    %c0_2 = arith.constant 0 : index
    %1 = vector.load %arg2[%c0_1, %c0_2] : memref<32x1024xbf16, #tpu.memory_space<vmem>>, vector<32x1024xbf16>
    %c0_3 = arith.constant 0 : index
    %c0_4 = arith.constant 0 : index
    %2 = vector.load %arg3[%c0_3, %c0_4] : memref<1x1024xf32, #tpu.memory_space<vmem>>, vector<1x1024xf32>
    %cst = arith.constant dense<0.000000e+00> : vector<8x1024xf32>
    %3 = tpu.matmul %0, %1, %cst {dimension_numbers = #tpu.dot_dimension_numbers<[1], [0], [0], [1], [0, 0, 1, 1], [], []>} : vector<8x32xbf16>, vector<32x1024xbf16>, vector<8x1024xf32> -> vector<8x1024xf32>
    %4 = vector.broadcast %2 : vector<1x1024xf32> to vector<8x1024xf32>
    %5 = arith.addf %3, %4 : vector<8x1024xf32>
    %cst_5 = arith.constant 0.000000e+00 : f32
    %6 = vector.broadcast %cst_5 : f32 to vector<8x1024xf32>
    %7 = arith.maximumf %5, %6 : vector<8x1024xf32>
    %c0_6 = arith.constant 0 : index
    %c0_7 = arith.constant 0 : index
    %8 = vector.load %arg4[%c0_6, %c0_7] : memref<1024x512xbf16, #tpu.memory_space<vmem>>, vector<1024x512xbf16>
    %c0_8 = arith.constant 0 : index
    %c0_9 = arith.constant 0 : index
    %9 = vector.load %arg5[%c0_8, %c0_9] : memref<1x512xf32, #tpu.memory_space<vmem>>, vector<1x512xf32>
    %10 = arith.truncf %7 : vector<8x1024xf32> to vector<8x1024xbf16>
    %cst_10 = arith.constant dense<0.000000e+00> : vector<8x512xf32>
    %11 = tpu.matmul %10, %8, %cst_10 {dimension_numbers = #tpu.dot_dimension_numbers<[1], [0], [0], [1], [0, 0, 1, 1], [], []>} : vector<8x1024xbf16>, vector<1024x512xbf16>, vector<8x512xf32> -> vector<8x512xf32>
    %12 = vector.broadcast %9 : vector<1x512xf32> to vector<8x512xf32>
    %13 = arith.addf %11, %12 : vector<8x512xf32>
    %cst_11 = arith.constant 0.000000e+00 : f32
    %14 = vector.broadcast %cst_11 : f32 to vector<8x512xf32>
    %15 = arith.maximumf %13, %14 : vector<8x512xf32>
    %c0_12 = arith.constant 0 : index
    %c0_13 = arith.constant 0 : index
    %16 = vector.load %arg6[%c0_12, %c0_13] : memref<512x256xbf16, #tpu.memory_space<vmem>>, vector<512x256xbf16>
    %c0_14 = arith.constant 0 : index
    %c0_15 = arith.constant 0 : index
    %17 = vector.load %arg7[%c0_14, %c0_15] : memref<1x256xf32, #tpu.memory_space<vmem>>, vector<1x256xf32>
    %18 = arith.truncf %15 : vector<8x512xf32> to vector<8x512xbf16>
    %cst_16 = arith.constant dense<0.000000e+00> : vector<8x256xf32>
    %19 = tpu.matmul %18, %16, %cst_16 {dimension_numbers = #tpu.dot_dimension_numbers<[1], [0], [0], [1], [0, 0, 1, 1], [], []>} : vector<8x512xbf16>, vector<512x256xbf16>, vector<8x256xf32> -> vector<8x256xf32>
    %20 = vector.broadcast %17 : vector<1x256xf32> to vector<8x256xf32>
    %21 = arith.addf %19, %20 : vector<8x256xf32>
    %cst_17 = arith.constant 0.000000e+00 : f32
    %22 = vector.broadcast %cst_17 : f32 to vector<8x256xf32>
    %23 = arith.maximumf %21, %22 : vector<8x256xf32>
    %c0_18 = arith.constant 0 : index
    %c0_19 = arith.constant 0 : index
    %24 = vector.load %arg8[%c0_18, %c0_19] : memref<256x128xbf16, #tpu.memory_space<vmem>>, vector<256x128xbf16>
    %c0_20 = arith.constant 0 : index
    %c0_21 = arith.constant 0 : index
    %25 = vector.load %arg9[%c0_20, %c0_21] : memref<1x128xf32, #tpu.memory_space<vmem>>, vector<1x128xf32>
    %26 = arith.truncf %23 : vector<8x256xf32> to vector<8x256xbf16>
    %cst_22 = arith.constant dense<0.000000e+00> : vector<8x128xf32>
    %27 = tpu.matmul %26, %24, %cst_22 {dimension_numbers = #tpu.dot_dimension_numbers<[1], [0], [0], [1], [0, 0, 1, 1], [], []>} : vector<8x256xbf16>, vector<256x128xbf16>, vector<8x128xf32> -> vector<8x128xf32>
    %28 = vector.broadcast %25 : vector<1x128xf32> to vector<8x128xf32>
    %29 = arith.addf %27, %28 : vector<8x128xf32>
    %cst_23 = arith.constant 0.000000e+00 : f32
    %30 = vector.broadcast %cst_23 : f32 to vector<8x128xf32>
    %31 = arith.maximumf %29, %30 : vector<8x128xf32>
    %c0_24 = arith.constant 0 : index
    %c0_25 = arith.constant 0 : index
    %32 = vector.load %arg10[%c0_24, %c0_25] : memref<128x64xbf16, #tpu.memory_space<vmem>>, vector<128x64xbf16>
    %c0_26 = arith.constant 0 : index
    %c0_27 = arith.constant 0 : index
    %33 = vector.load %arg11[%c0_26, %c0_27] : memref<1x64xf32, #tpu.memory_space<vmem>>, vector<1x64xf32>
    %34 = arith.truncf %31 : vector<8x128xf32> to vector<8x128xbf16>
    %cst_28 = arith.constant dense<0.000000e+00> : vector<8x64xf32>
    %35 = tpu.matmul %34, %32, %cst_28 {dimension_numbers = #tpu.dot_dimension_numbers<[1], [0], [0], [1], [0, 0, 1, 1], [], []>} : vector<8x128xbf16>, vector<128x64xbf16>, vector<8x64xf32> -> vector<8x64xf32>
    %36 = vector.broadcast %33 : vector<1x64xf32> to vector<8x64xf32>
    %37 = arith.addf %35, %36 : vector<8x64xf32>
    %cst_29 = arith.constant 0.000000e+00 : f32
    %38 = vector.broadcast %cst_29 : f32 to vector<8x64xf32>
    %39 = arith.maximumf %37, %38 : vector<8x64xf32>
    %c0_30 = arith.constant 0 : index
    %c0_31 = arith.constant 0 : index
    %40 = vector.load %arg12[%c0_30, %c0_31] : memref<64x128xbf16, #tpu.memory_space<vmem>>, vector<64x128xbf16>
    %c0_32 = arith.constant 0 : index
    %c0_33 = arith.constant 0 : index
    %41 = vector.load %arg13[%c0_32, %c0_33] : memref<1x128xf32, #tpu.memory_space<vmem>>, vector<1x128xf32>
    %42 = arith.truncf %39 : vector<8x64xf32> to vector<8x64xbf16>
    %cst_34 = arith.constant dense<0.000000e+00> : vector<8x128xf32>
    %43 = tpu.matmul %42, %40, %cst_34 {dimension_numbers = #tpu.dot_dimension_numbers<[1], [0], [0], [1], [0, 0, 1, 1], [], []>} : vector<8x64xbf16>, vector<64x128xbf16>, vector<8x128xf32> -> vector<8x128xf32>
    %44 = vector.broadcast %41 : vector<1x128xf32> to vector<8x128xf32>
    %45 = arith.addf %43, %44 : vector<8x128xf32>
    %cst_35 = arith.constant 0.000000e+00 : f32
    %46 = vector.broadcast %cst_35 : f32 to vector<8x128xf32>
    %47 = arith.maximumf %45, %46 : vector<8x128xf32>
    %c0_36 = arith.constant 0 : index
    %c0_37 = arith.constant 0 : index
    %48 = vector.load %arg14[%c0_36, %c0_37] : memref<128x256xbf16, #tpu.memory_space<vmem>>, vector<128x256xbf16>
    %c0_38 = arith.constant 0 : index
    %c0_39 = arith.constant 0 : index
    %49 = vector.load %arg15[%c0_38, %c0_39] : memref<1x256xf32, #tpu.memory_space<vmem>>, vector<1x256xf32>
    %50 = arith.truncf %47 : vector<8x128xf32> to vector<8x128xbf16>
    %cst_40 = arith.constant dense<0.000000e+00> : vector<8x256xf32>
    %51 = tpu.matmul %50, %48, %cst_40 {dimension_numbers = #tpu.dot_dimension_numbers<[1], [0], [0], [1], [0, 0, 1, 1], [], []>} : vector<8x128xbf16>, vector<128x256xbf16>, vector<8x256xf32> -> vector<8x256xf32>
    %52 = vector.broadcast %49 : vector<1x256xf32> to vector<8x256xf32>
    %53 = arith.addf %51, %52 : vector<8x256xf32>
    %cst_41 = arith.constant 0.000000e+00 : f32
    %54 = vector.broadcast %cst_41 : f32 to vector<8x256xf32>
    %55 = arith.maximumf %53, %54 : vector<8x256xf32>
    %c0_42 = arith.constant 0 : index
    %c0_43 = arith.constant 0 : index
    %56 = vector.load %arg16[%c0_42, %c0_43] : memref<256x512xbf16, #tpu.memory_space<vmem>>, vector<256x512xbf16>
    %c0_44 = arith.constant 0 : index
    %c0_45 = arith.constant 0 : index
    %57 = vector.load %arg17[%c0_44, %c0_45] : memref<1x512xf32, #tpu.memory_space<vmem>>, vector<1x512xf32>
    %58 = arith.truncf %55 : vector<8x256xf32> to vector<8x256xbf16>
    %cst_46 = arith.constant dense<0.000000e+00> : vector<8x512xf32>
    %59 = tpu.matmul %58, %56, %cst_46 {dimension_numbers = #tpu.dot_dimension_numbers<[1], [0], [0], [1], [0, 0, 1, 1], [], []>} : vector<8x256xbf16>, vector<256x512xbf16>, vector<8x512xf32> -> vector<8x512xf32>
    %60 = vector.broadcast %57 : vector<1x512xf32> to vector<8x512xf32>
    %61 = arith.addf %59, %60 : vector<8x512xf32>
    %cst_47 = arith.constant 0.000000e+00 : f32
    %62 = vector.broadcast %cst_47 : f32 to vector<8x512xf32>
    %63 = arith.maximumf %61, %62 : vector<8x512xf32>
    %c0_48 = arith.constant 0 : index
    %c0_49 = arith.constant 0 : index
    %64 = vector.load %arg18[%c0_48, %c0_49] : memref<512x1024xbf16, #tpu.memory_space<vmem>>, vector<512x1024xbf16>
    %c0_50 = arith.constant 0 : index
    %c0_51 = arith.constant 0 : index
    %65 = vector.load %arg19[%c0_50, %c0_51] : memref<1x1024xf32, #tpu.memory_space<vmem>>, vector<1x1024xf32>
    %66 = arith.truncf %63 : vector<8x512xf32> to vector<8x512xbf16>
    %cst_52 = arith.constant dense<0.000000e+00> : vector<8x1024xf32>
    %67 = tpu.matmul %66, %64, %cst_52 {dimension_numbers = #tpu.dot_dimension_numbers<[1], [0], [0], [1], [0, 0, 1, 1], [], []>} : vector<8x512xbf16>, vector<512x1024xbf16>, vector<8x1024xf32> -> vector<8x1024xf32>
    %68 = vector.broadcast %65 : vector<1x1024xf32> to vector<8x1024xf32>
    %69 = arith.addf %67, %68 : vector<8x1024xf32>
    %cst_53 = arith.constant 0.000000e+00 : f32
    %70 = vector.broadcast %cst_53 : f32 to vector<8x1024xf32>
    %71 = arith.maximumf %69, %70 : vector<8x1024xf32>
    %c0_54 = arith.constant 0 : index
    %c0_55 = arith.constant 0 : index
    %72 = vector.load %arg20[%c0_54, %c0_55] : memref<1024x128xbf16, #tpu.memory_space<vmem>>, vector<1024x128xbf16>
    %c0_56 = arith.constant 0 : index
    %c0_57 = arith.constant 0 : index
    %73 = vector.load %arg21[%c0_56, %c0_57] : memref<1x128xf32, #tpu.memory_space<vmem>>, vector<1x128xf32>
    %74 = arith.truncf %71 : vector<8x1024xf32> to vector<8x1024xbf16>
    %cst_58 = arith.constant dense<0.000000e+00> : vector<8x128xf32>
    %75 = tpu.matmul %74, %72, %cst_58 {dimension_numbers = #tpu.dot_dimension_numbers<[1], [0], [0], [1], [0, 0, 1, 1], [], []>} : vector<8x1024xbf16>, vector<1024x128xbf16>, vector<8x128xf32> -> vector<8x128xf32>
    %76 = vector.broadcast %73 : vector<1x128xf32> to vector<8x128xf32>
    %77 = arith.addf %75, %76 : vector<8x128xf32>
    %78 = vector.extract_strided_slice %77 {offsets = [0, 0], sizes = [8, 1], strides = [1, 1]} : vector<8x128xf32> to vector<8x1xf32>
    %79 = arith.negf %78 : vector<8x1xf32>
    %80 = math.exp %79 : vector<8x1xf32>
    %cst_59 = arith.constant 1.000000e+00 : f32
    %81 = vector.broadcast %cst_59 : f32 to vector<8x1xf32>
    %82 = arith.addf %81, %80 : vector<8x1xf32>
    %83 = arith.divf %81, %82 : vector<8x1xf32>
    %c0_60 = arith.constant 0 : index
    %c0_61 = arith.constant 0 : index
    %84 = vector.load %arg22[%c0_60, %c0_61] : memref<8x1xf32, #tpu.memory_space<vmem>>, vector<8x1xf32>
    tpu.vector_store %arg22[%c0_60, %c0_61], %83 {strides = array<i32>} : memref<8x1xf32, #tpu.memory_space<vmem>>, vector<8x1xf32>,
    return
  }
  func.func @transform_0(%arg0: i32) -> (i32, i32) {
    %c0_i32 = arith.constant 0 : i32
    %c0_i32_0 = arith.constant 0 : i32
    return %arg0, %c0_i32 : i32, i32
  }
  func.func @transform_1(%arg0: i32) -> (i32, i32) {
    %c0_i32 = arith.constant 0 : i32
    %c0_i32_0 = arith.constant 0 : i32
    %c0_i32_1 = arith.constant 0 : i32
    return %c0_i32, %c0_i32_0 : i32, i32
  }
  func.func @transform_2(%arg0: i32) -> (i32, i32) {
    %c0_i32 = arith.constant 0 : i32
    %c0_i32_0 = arith.constant 0 : i32
    %c0_i32_1 = arith.constant 0 : i32
    return %c0_i32, %c0_i32_0 : i32, i32
  }
  func.func @transform_3(%arg0: i32) -> (i32, i32) {
    %c0_i32 = arith.constant 0 : i32
    %c0_i32_0 = arith.constant 0 : i32
    %c0_i32_1 = arith.constant 0 : i32
    return %c0_i32, %c0_i32_0 : i32, i32
  }
  func.func @transform_4(%arg0: i32) -> (i32, i32) {
    %c0_i32 = arith.constant 0 : i32
    %c0_i32_0 = arith.constant 0 : i32
    %c0_i32_1 = arith.constant 0 : i32
    return %c0_i32, %c0_i32_0 : i32, i32
  }
  func.func @transform_5(%arg0: i32) -> (i32, i32) {
    %c0_i32 = arith.constant 0 : i32
    %c0_i32_0 = arith.constant 0 : i32
    %c0_i32_1 = arith.constant 0 : i32
    return %c0_i32, %c0_i32_0 : i32, i32
  }
  func.func @transform_6(%arg0: i32) -> (i32, i32) {
    %c0_i32 = arith.constant 0 : i32
    %c0_i32_0 = arith.constant 0 : i32
    %c0_i32_1 = arith.constant 0 : i32
    return %c0_i32, %c0_i32_0 : i32, i32
  }
  func.func @transform_7(%arg0: i32) -> (i32, i32) {
    %c0_i32 = arith.constant 0 : i32
    %c0_i32_0 = arith.constant 0 : i32
    %c0_i32_1 = arith.constant 0 : i32
    return %c0_i32, %c0_i32_0 : i32, i32
  }
  func.func @transform_8(%arg0: i32) -> (i32, i32) {
    %c0_i32 = arith.constant 0 : i32
    %c0_i32_0 = arith.constant 0 : i32
    %c0_i32_1 = arith.constant 0 : i32
    return %c0_i32, %c0_i32_0 : i32, i32
  }
  func.func @transform_9(%arg0: i32) -> (i32, i32) {
    %c0_i32 = arith.constant 0 : i32
    %c0_i32_0 = arith.constant 0 : i32
    %c0_i32_1 = arith.constant 0 : i32
    return %c0_i32, %c0_i32_0 : i32, i32
  }
  func.func @transform_10(%arg0: i32) -> (i32, i32) {
    %c0_i32 = arith.constant 0 : i32
    %c0_i32_0 = arith.constant 0 : i32
    %c0_i32_1 = arith.constant 0 : i32
    return %c0_i32, %c0_i32_0 : i32, i32
  }
  func.func @transform_11(%arg0: i32) -> (i32, i32) {
    %c0_i32 = arith.constant 0 : i32
    %c0_i32_0 = arith.constant 0 : i32
    %c0_i32_1 = arith.constant 0 : i32
    return %c0_i32, %c0_i32_0 : i32, i32
  }
  func.func @transform_12(%arg0: i32) -> (i32, i32) {
    %c0_i32 = arith.constant 0 : i32
    %c0_i32_0 = arith.constant 0 : i32
    %c0_i32_1 = arith.constant 0 : i32
    return %c0_i32, %c0_i32_0 : i32, i32
  }
  func.func @transform_13(%arg0: i32) -> (i32, i32) {
    %c0_i32 = arith.constant 0 : i32
    %c0_i32_0 = arith.constant 0 : i32
    %c0_i32_1 = arith.constant 0 : i32
    return %c0_i32, %c0_i32_0 : i32, i32
  }
  func.func @transform_14(%arg0: i32) -> (i32, i32) {
    %c0_i32 = arith.constant 0 : i32
    %c0_i32_0 = arith.constant 0 : i32
    %c0_i32_1 = arith.constant 0 : i32
    return %c0_i32, %c0_i32_0 : i32, i32
  }
  func.func @transform_15(%arg0: i32) -> (i32, i32) {
    %c0_i32 = arith.constant 0 : i32
    %c0_i32_0 = arith.constant 0 : i32
    %c0_i32_1 = arith.constant 0 : i32
    return %c0_i32, %c0_i32_0 : i32, i32
  }
  func.func @transform_16(%arg0: i32) -> (i32, i32) {
    %c0_i32 = arith.constant 0 : i32
    %c0_i32_0 = arith.constant 0 : i32
    %c0_i32_1 = arith.constant 0 : i32
    return %c0_i32, %c0_i32_0 : i32, i32
  }
  func.func @transform_17(%arg0: i32) -> (i32, i32) {
    %c0_i32 = arith.constant 0 : i32
    %c0_i32_0 = arith.constant 0 : i32
    %c0_i32_1 = arith.constant 0 : i32
    return %c0_i32, %c0_i32_0 : i32, i32
  }
  func.func @transform_18(%arg0: i32) -> (i32, i32) {
    %c0_i32 = arith.constant 0 : i32
    %c0_i32_0 = arith.constant 0 : i32
    %c0_i32_1 = arith.constant 0 : i32
    return %c0_i32, %c0_i32_0 : i32, i32
  }
  func.func @transform_19(%arg0: i32) -> (i32, i32) {
    %c0_i32 = arith.constant 0 : i32
    %c0_i32_0 = arith.constant 0 : i32
    %c0_i32_1 = arith.constant 0 : i32
    return %c0_i32, %c0_i32_0 : i32, i32
  }
  func.func @transform_20(%arg0: i32) -> (i32, i32) {
    %c0_i32 = arith.constant 0 : i32
    %c0_i32_0 = arith.constant 0 : i32
    %c0_i32_1 = arith.constant 0 : i32
    return %c0_i32, %c0_i32_0 : i32, i32
  }
  func.func @transform_21(%arg0: i32) -> (i32, i32) {
    %c0_i32 = arith.constant 0 : i32
    %c0_i32_0 = arith.constant 0 : i32
    return %arg0, %c0_i32 : i32, i32
  }
}

</mosaic_0001>

<bundles_post_ra>
// kernel: model4_1_forward.1
= control target key start
LH: loop header
LB: loop body
LE: loop exit
PB: predicated region body
PF: predicated region fallthrough
CT: control target
= control target key end

     0   :  { %s10993_s0 = inlined_call_operand.vmem [shape: bf16[8,32], index: 0, kind: input, shape index: {}]   ;;  %s10994_s1 = inlined_call_operand.hbm [shape: bf16[32,1024], index: 1, kind: input, shape index: {}]   ;;  %s10995_s2 = inlined_call_operand.vmem [shape: f32[1,1024], index: 2, kind: input, shape index: {}]   ;;  %s10996_s3 = inlined_call_operand.hbm [shape: bf16[1024,512], index: 3, kind: input, shape index: {}]   ;;  %s10997_s4 = inlined_call_operand.vmem [shape: f32[1,512], index: 4, kind: input, shape index: {}]   ;;  %s10998_s5 = inlined_call_operand.hbm [shape: bf16[512,256], index: 5, kind: input, shape index: {}]   ;;  %s10999_s6 = inlined_call_operand.vmem [shape: f32[1,256], index: 6, kind: input, shape index: {}]   ;;  %s11000_s7 = inlined_call_operand.hbm [shape: bf16[256,128], index: 7, kind: input, shape index: {}]   ;;  %s11001_s8 = inlined_call_operand.vmem [shape: f32[1,128], index: 8, kind: input, shape index: {}]   ;;  %s11002_s9 = inlined_call_operand.vmem [shape: bf16[128,64], index: 9, kind: input, shape index: {}]   ;;  %s11003_s10 = inlined_call_operand.vmem [shape: f32[1,64], index: 10, kind: input, shape index: {}]   ;;  %s11004_s11 = inlined_call_operand.vmem [shape: bf16[64,128], index: 11, kind: input, shape index: {}]   ;;  %s11005_s12 = inlined_call_operand.vmem [shape: f32[1,128], index: 12, kind: input, shape index: {}]   ;;  %s11006_s13 = inlined_call_operand.hbm [shape: bf16[128,256], index: 13, kind: input, shape index: {}]   ;;  %s11007_s14 = inlined_call_operand.vmem [shape: f32[1,256], index: 14, kind: input, shape index: {}]   ;;  %s11008_s15 = inlined_call_operand.hbm [shape: bf16[256,512], index: 15, kind: input, shape index: {}]   ;;  %s11009_s16 = inlined_call_operand.vmem [shape: f32[1,512], index: 16, kind: input, shape index: {}]   ;;  %s11010_s17 = inlined_call_operand.hbm [shape: bf16[512,1024], index: 17, kind: input, shape index: {}]   ;;  %s11011_s18 = inlined_call_operand.vmem [shape: f32[1,1024], index: 18, kind: input, shape index: {}]   ;;  %s11012_s19 = inlined_call_operand.hbm [shape: bf16[1024,128], index: 19, kind: input, shape index: {}]   ;;  %s11013_s20 = inlined_call_operand.vmem [shape: f32[1,128], index: 20, kind: input, shape index: {}]   ;;  %s11014_s21 = inlined_call_operand.vmem [shape: f32[8,1], index: 21, kind: output, shape index: {}]  }
   0x1   :  { %11017 = sst [smem:[#allocation20_spill]] %s10993_s0 }
   0x2   :  { %11018 = sst [smem:[#allocation21_spill]] %s10994_s1 }
   0x3   :  { %11019 = sst [smem:[#allocation22_spill]] %s10995_s2 }
   0x4   :  { %11020 = sst [smem:[#allocation23_spill]] %s10996_s3 }
   0x5   :  { %11021 = sst [smem:[#allocation24_spill]] %s10997_s4 }
   0x6   :  { %11022 = sst [smem:[#allocation25_spill]] %s10998_s5 }
   0x7   :  { %11023 = sst [smem:[#allocation26_spill]] %s11011_s18 }
   0x8   :  { %11024 = sst [smem:[#allocation27_spill]] %s11013_s20 }
   0x9   :  { %11025 = sst [smem:[#allocation28_spill]] %s11014_s21 }
   0xa   :  { %26 = vsyncpa [#allocation3], 0 }
   0xb   :  { %27 = vsyncpa [#allocation5], 0 }
   0xc   :  { %28 = vsyncpa [#allocation8], 0 }
   0xd   :  { %29 = vsyncpa [#allocation11], 0  ;;  %s11026_s26 = sld [smem:[#allocation23_spill]] }
  0x13   :  { %s52_s27 = sshll.u32 %s11026_s26, 4  ;;  %s53_s27 = int_to_ptr.hbm [resolvable:$true] %s52_s27 }
  0x14   :  { %30 = vsyncpa [#allocation14], 0  ;;  %s10529_s3 = smov [#allocation4]   ;;  %s82_s4 = sshll.u32 %s11000_s7, 4  ;;  %s83_s4 = int_to_ptr.hbm [resolvable:$true] %s82_s4 }
  0x15   :  { %s54_s28 = sshll.u32 %s10529_s3, 4  ;;  %s10530_s30 = smov 256   ;;  %s55_s28 = int_to_ptr.vmem [resolvable:$true] %s54_s28 }
  0x16   :  { %s10531_s5 = smov 16   ;;  %s10532_s22 = smov [#allocation7]  }
  0x17   :  { %60 = dma.hbm_to_vmem [thread:$0]  %s53_s27, 32768, %s55_s28, [#allocation5], %s10530_s30, %s10530_s30, %s10531_s5  }
  0x18   :  { %s84_s23 = sshll.u32 %s10532_s22, 4  ;;  %s11015_s1 = smov 64   ;;  %s85_s23 = int_to_ptr.vmem [resolvable:$true] %s84_s23 }
  0x19   :  { %s11016_s24 = smov 4   ;;  %s120_s26 = sshll.u32 %s11008_s15, 4  ;;  %s121_s26 = int_to_ptr.hbm [resolvable:$true] %s120_s26 }
  0x1a   :  { %90 = dma.hbm_to_vmem [thread:$0]  %s83_s4, 2048, %s85_s23, [#allocation8], %s11015_s1, %s11015_s1, %s11016_s24  }
  0x1b   :  { %s10535_s3 = smov [#allocation10]   ;;  %s11027_s28 = sld [smem:[#allocation21_spill]] }
  0x1c   :  { %s122_s7 = sshll.u32 %s10535_s3, 4  ;;  %s10536_s22 = smov [#allocation2]   ;;  %s123_s7 = int_to_ptr.vmem [resolvable:$true] %s122_s7 }
  0x1d   :  { %128 = dma.hbm_to_vmem [thread:$0]  %s121_s26, 8192, %s123_s7, [#allocation11], %s10530_s30, %s10530_s30, %s10531_s5  }
  0x1e   :  { %s39_s21 = sshll.u32 %s10536_s22, 4  ;;  %s10537_s20 = smov 512   ;;  %s40_s21 = int_to_ptr.vmem [resolvable:$true] %s39_s21 }
  0x1f   :  { %s10538_s18 = smov 32   ;;  %s11028_s2 = sld [smem:[#allocation25_spill]] }
  0x20   :  { %s10539_s25 = smov [#allocation6]   ;;  %s105_s29 = sshll.u32 %s11006_s13, 4  ;;  %s106_s29 = int_to_ptr.hbm [resolvable:$true] %s105_s29 }
  0x21   :  { %s37_s0 = sshll.u32 %s11027_s28, 4  ;;  %s69_s3 = sshll.u32 %s10539_s25, 4  ;;  %s38_s0 = int_to_ptr.hbm [resolvable:$true] %s37_s0  ;;  %s70_s3 = int_to_ptr.vmem [resolvable:$true] %s69_s3 }
  0x22   :  { %45 = dma.hbm_to_vmem [thread:$0]  %s38_s0, 2048, %s40_s21, [#allocation3], %s10537_s20, %s10537_s20, %s10538_s18  }
  0x23   :  { %s10540_s30 = smov 128   ;;  %s10541_s5 = smov 8  }
  0x24   :  { %s10542_s26 = smov [#allocation9]   ;;  %s135_s28 = sshll.u32 %s11010_s17, 4  ;;  %s136_s28 = int_to_ptr.hbm [resolvable:$true] %s135_s28 }
  0x25   :  { %s67_s15 = sshll.u32 %s11028_s2, 4  ;;  %s107_s7 = sshll.u32 %s10542_s26, 4  ;;  %s68_s15 = int_to_ptr.hbm [resolvable:$true] %s67_s15  ;;  %s108_s7 = int_to_ptr.vmem [resolvable:$true] %s107_s7 }
  0x26   :  { %75 = dma.hbm_to_vmem [thread:$0]  %s68_s15, 8192, %s70_s3, [#allocation5], %s10540_s30, %s10540_s30, %s10541_s5  }
  0x27   :  { %113 = dma.hbm_to_vmem [thread:$0]  %s106_s29, 2048, %s108_s7, [#allocation8], %s10540_s30, %s10540_s30, %s10541_s5  }
  0x28   :  { %s150_s4 = sshll.u32 %s11012_s19, 4  ;;  %s10543_s23 = smov [#allocation12]   ;;  %s151_s4 = int_to_ptr.hbm [resolvable:$true] %s150_s4 }
  0x29   :  { %s137_s1 = sshll.u32 %s10543_s23, 4  ;;  %s10544_s13 = smov [#allocation13]   ;;  %s138_s1 = int_to_ptr.vmem [resolvable:$true] %s137_s1 }
  0x2a   :  { %143 = dma.hbm_to_vmem [thread:$0]  %s136_s28, 32768, %s138_s1, [#allocation11], %s10537_s20, %s10537_s20, %s10538_s18  }
  0x2b   :  { %s152_s24 = sshll.u32 %s10544_s13, 4  ;;  %s11029_s2 = smov 4   ;;  %s153_s24 = int_to_ptr.vmem [resolvable:$true] %s152_s24 }
  0x2c   :  { %s11030_s15 = smov 64  }
  0x2d   :  { %158 = dma.hbm_to_vmem [thread:$0]  %s151_s4, 8192, %s153_s24, [#allocation14], %s11030_s15, %s11030_s15, %s11029_s2  }
  0x2e   :  { %10519 = dma.done.wait [#allocation3], 2048  }
  0x2f   :  { %10520 = vsyncadd [#allocation3], 4294965248 }
  0x30   :  { %10521 = dma.done.wait [#allocation5], 40960  }
  0x31   :  { %10522 = vsyncadd [#allocation5], 4294926336 }
  0x32   :  { %10523 = dma.done.wait [#allocation8], 4096  }
  0x33   :  { %10524 = vsyncadd [#allocation8], 4294963200 }
  0x34   :  { %10525 = dma.done.wait [#allocation11], 40960  }
  0x35   :  { %10526 = vsyncadd [#allocation11], 4294926336 }
  0x36   :  { %10527 = dma.done.wait [#allocation14], 8192  }
  0x37   :  { %10528 = vsyncadd [#allocation14], 4294959104  ;;  %v6507_v0 = vld [vmem:[#allocation2 + $0x40] sm:$0xf]  ;;  %v6515_v2 = vld [vmem:[#allocation2 + $0x48] sm:$0xf] }
  0x38   :  { %v9551_v1 = vld [vmem:[#allocation2 + $0x5c] sm:$0xf0]  ;;  %v9552_v4 = vld [vmem:[#allocation2 + $0x64] sm:$0xf0]  ;;  %v9548_v5 = vld [vmem:[#allocation2 + $0x4c] sm:$0xf] }
  0x39   :  { %v6508_v3 = vor.u32 %v9551_v1, %v6507_v0  ;;  %v6517_v6 = vld [vmem:[#allocation2 + $0x68] sm:$0xf0]  ;;  %v6516_v7 = vor.u32 %v9552_v4, %v6515_v2  ;;  %v6475_v9 = vld [vmem:[#allocation2] sm:$0xf]  ;;  %v6483_v11 = vld [vmem:[#allocation2 + $0x8] sm:$0xf] }
  0x3a   :  { %v6520_v8 = vor.u32 %v9548_v5, %v6517_v6  ;;  %v9543_v10 = vld [vmem:[#allocation2 + $0x1c] sm:$0xf0]  ;;  %v9544_v13 = vld [vmem:[#allocation2 + $0x24] sm:$0xf0]  ;;  %v9540_v14 = vld [vmem:[#allocation2 + $0xc] sm:$0xf] }
  0x3b   :  { %319 = vmatpush.bf16.msra.mxu1 %v6508_v3  ;;  %v6476_v12 = vor.u32 %v9543_v10, %v6475_v9  ;;  %v6485_v15 = vld [vmem:[#allocation2 + $0x28] sm:$0xf0]  ;;  %345 = vmatpush.bf16.msra.mxu2 %v6516_v7  ;;  %v6484_v16 = vor.u32 %v9544_v13, %v6483_v11  ;;  %vm309_vm0 = vcmask 261120   ;;  %v9547_v18 = vld [vmem:[#allocation2 + $0x44] sm:$0xf]  ;;  %s11031_s19 = sld [smem:[#allocation20_spill]] }
  0x3c   :  { %358 = vmatpush.bf16.msra.mxu3 %v6520_v8  ;;  %v6488_v17 = vor.u32 %v9540_v14, %v6485_v15  ;;  %v6509_v19 = vld [vmem:[#allocation2 + $0x60] sm:$0xf0]  ;;  %v6523_v22 = vld [vmem:[#allocation2 + $0x50] sm:$0xf]  ;;  %v6531_v24 = vld [vmem:[#allocation2 + $0x58] sm:$0xf] }
  0x3d   :  { %v6512_v21 = vor.u32 %v9547_v18, %v6509_v19  ;;  %v9553_v23 = vld [vmem:[#allocation2 + $0x6c] sm:$0xf0]  ;;  %v9554_v26 = vld [vmem:[#allocation2 + $0x74] sm:$0xf0]  ;;  %v9550_v27 = vld [vmem:[#allocation2 + $0x5c] sm:$0xf] }
  0x3e   :  { %v6524_v25 = vor.u32 %v9553_v23, %v6523_v22  ;;  %v6533_v28 = vld [vmem:[#allocation2 + $0x78] sm:$0xf0]  ;;  %v6532_v29 = vor.u32 %v9554_v26, %v6531_v24  ;;  %v9539_v30 = vld [vmem:[#allocation2 + $0x4] sm:$0xf]  ;;  %v6491_v32 = vld [vmem:[#allocation2 + $0x10] sm:$0xf] }
  0x3f   :  { %320 = vmatpush.bf16.msra.mxu1 %v6476_v12  ;;  %v6477_v31 = vld [vmem:[#allocation2 + $0x20] sm:$0xf0]  ;;  %346 = vmatpush.bf16.msra.mxu2 %v6484_v16  ;;  %v6536_v33 = vor.u32 %v9550_v27, %v6533_v28  ;;  %v9545_v34 = vld [vmem:[#allocation2 + $0x2c] sm:$0xf0]  ;;  %v6499_v35 = vld [vmem:[#allocation2 + $0x18] sm:$0xf] }
  0x40   :  { %359 = vmatpush.bf16.msra.mxu3 %v6488_v17  ;;  %v9546_v36 = vld [vmem:[#allocation2 + $0x34] sm:$0xf0]  ;;  %371 = vmatpush.bf16.msra.mxu0 %v6524_v25  ;;  %v6480_v37 = vor.u32 %v9539_v30, %v6477_v31  ;;  %v6492_v38 = vor.u32 %v9545_v34, %v6491_v32  ;;  %v9542_v39 = vld [vmem:[#allocation2 + $0x1c] sm:$0xf]  ;;  %v9549_v41 = vld [vmem:[#allocation2 + $0x54] sm:$0xf] }
  0x41   :  { %v10688_v20 = vld [vmem:[%s11031_s19] sm:$0xf]  ;;  %v6501_v40 = vld [vmem:[#allocation2 + $0x38] sm:$0xf0]  ;;  %v6500_v42 = vor.u32 %v9546_v36, %v6499_v35  ;;  %v6525_v43 = vld [vmem:[#allocation2 + $0x70] sm:$0xf0] }
  0x42   :  { %6537 = vmatmul.msk.bf16.vlgmr.msra.gmra.mxu1 %vm309_vm0, %v10688_v20  ;;  %v9541_v44 = vld [vmem:[#allocation2 + $0x14] sm:$0xf]  ;;  %6539 = vmatmul.msk.bf16.vlgmr.msra.gmra.mxu2 %vm309_vm0, %v10688_v20  ;;  %v6528_v46 = vor.u32 %v9549_v41, %v6525_v43  ;;  %v6659_v47 = vld [vmem:[#allocation4 + $0xe0] sm:$0xf]  ;;  %v9585_v48 = vld [vmem:[#allocation4 + $0xec] sm:$0xf0]  ;;  %v6504_v50 = vor.u32 %v9542_v39, %v6501_v40 }
  0x43   :  { %332 = vmatpush.bf16.msrb.mxu1 %v6512_v21  ;;  %397 = vmatpush.bf16.msrb.mxu2 %v6532_v29  ;;  %v6493_v45 = vld [vmem:[#allocation2 + $0x30] sm:$0xf0]  ;;  %v6643_v49 = vld [vmem:[#allocation4 + $0xc0] sm:$0xf]  ;;  %v6660_v51 = vor.u32 %v9585_v48, %v6659_v47  ;;  %v9581_v52 = vld [vmem:[#allocation4 + $0xcc] sm:$0xf0] }
  0x44   :  { %6540 = vmatmul.msk.bf16.vlgmr.msra.gmra.mxu3 %vm309_vm0, %v10688_v20  ;;  %v6915_v53 = vld [vmem:[#allocation4 + $0x2e0] sm:$0xf]  ;;  %v9649_v54 = vld [vmem:[#allocation4 + $0x2ec] sm:$0xf0]  ;;  %372 = vmatpush.bf16.msra.mxu0 %v6492_v38  ;;  %v6496_v58 = vor.u32 %v9541_v44, %v6493_v45  ;;  %v6644_v62 = vor.u32 %v9581_v52, %v6643_v49  ;;  %s11032_s3 = sld [smem:[#allocation22_spill]]  ;;  %vm3180_vm1 = vcmask 523264  }
  0x45   :  { %410 = vmatpush.bf16.msrb.mxu3 %v6536_v33  ;;  %v6916_v55 = vor.u32 %v9649_v54, %v6915_v53  ;;  %v7043_v56 = vld [vmem:[#allocation4 + $0x3e0] sm:$0xf]  ;;  %v9681_v57 = vld [vmem:[#allocation4 + $0x3ec] sm:$0xf0]  ;;  %s11033_s5 = sld [smem:[#allocation24_spill]]  ;;  %vm6462_vm5 = vcmask 7168  }
  0x46   :  { %v7044_v59 = vor.u32 %v9681_v57, %v7043_v56  ;;  %v6899_v60 = vld [vmem:[#allocation4 + $0x2c0] sm:$0xf]  ;;  %v9645_v61 = vld [vmem:[#allocation4 + $0x2cc] sm:$0xf0]  ;;  %s11034_s22 = sld [smem:[#allocation26_spill]] }
  0x47   :  { %333 = vmatpush.bf16.msrb.mxu1 %v6480_v37  ;;  %398 = vmatpush.bf16.msrb.mxu2 %v6500_v42  ;;  %v6627_v63 = vld [vmem:[#allocation4 + $0xa0] sm:$0xf]  ;;  %v6900_v0 = vor.u32 %v9645_v61, %v6899_v60  ;;  %v9677_v2 = vld [vmem:[#allocation4 + $0x3cc] sm:$0xf0]  ;;  %s11035_s1 = sld [smem:[#allocation27_spill]] }
  0x48   :  { %1979 = vmatpush.bf16.msrb.mxu0 %v6660_v51  ;;  %v7027_v1 = vld [vmem:[#allocation4 + $0x3c0] sm:$0xf]  ;;  %v9577_v3 = vld [vmem:[#allocation4 + $0xac] sm:$0xf0]  ;;  %s11036_s2 = sld [smem:[#allocation28_spill]] }
  0x49   :  { %411 = vmatpush.bf16.msrb.mxu3 %v6504_v50  ;;  %6541 = vmatmul.msk.bf16.vlgmr.msra.gmra.mxu0 %vm309_vm0, %v10688_v20  ;;  %v6883_v4 = vld [vmem:[#allocation4 + $0x2a0] sm:$0xf]  ;;  %v9641_v5 = vld [vmem:[#allocation4 + $0x2ac] sm:$0xf0]  ;;  %v7028_v6 = vor.u32 %v9677_v2, %v7027_v1  ;;  %v6628_v9 = vor.u32 %v9577_v3, %v6627_v63 }
  0x4a   :  { %v7011_v7 = vld [vmem:[#allocation4 + $0x3a0] sm:$0xf]  ;;  %v9673_v8 = vld [vmem:[#allocation4 + $0x3ac] sm:$0xf0]  ;;  %v6884_v10 = vor.u32 %v9641_v5, %v6883_v4 }
  0x4b   :  { %384 = vmatpush.bf16.msra.mxu1 %v6528_v46  ;;  %2005 = vmatpush.bf16.msra.mxu2 %v6916_v55  ;;  %v6611_v11 = vld [vmem:[#allocation4 + $0x80] sm:$0xf]  ;;  %v9573_v12 = vld [vmem:[#allocation4 + $0x8c] sm:$0xf0]  ;;  %v7012_v13 = vor.u32 %v9673_v8, %v7011_v7 }
  0x4c   :  { %1980 = vmatpush.bf16.msrb.mxu0 %v6644_v62  ;;  %v6787_v14 = vld [vmem:[#allocation4 + $0x1e0] sm:$0xf]  ;;  %v9617_v15 = vld [vmem:[#allocation4 + $0x1ec] sm:$0xf0]  ;;  %v6612_v21 = vor.u32 %v9573_v12, %v6611_v11 }
  0x4d   :  { %2018 = vmatpush.bf16.msra.mxu3 %v7044_v59  ;;  %v6867_v16 = vld [vmem:[#allocation4 + $0x280] sm:$0xf]  ;;  %v9637_v17 = vld [vmem:[#allocation4 + $0x28c] sm:$0xf0]  ;;  %v6788_v24 = vor.u32 %v9617_v15, %v6787_v14 }
  0x4e   :  { %v6995_v18 = vld [vmem:[#allocation4 + $0x380] sm:$0xf]  ;;  %v9669_v19 = vld [vmem:[#allocation4 + $0x38c] sm:$0xf0]  ;;  %v6868_v25 = vor.u32 %v9637_v17, %v6867_v16 }
  0x4f   :  { %385 = vmatpush.bf16.msra.mxu1 %v6496_v58  ;;  %2006 = vmatpush.bf16.msra.mxu2 %v6900_v0  ;;  %v6595_v22 = vld [vmem:[#allocation4 + $0x60] sm:$0xf]  ;;  %v9569_v23 = vld [vmem:[#allocation4 + $0x6c] sm:$0xf0]  ;;  %v6996_v26 = vor.u32 %v9669_v19, %v6995_v18 }
  0x50   :  { %1981 = vmatpush.bf16.msrb.mxu0 %v6628_v9  ;;  %v6771_v27 = vld [vmem:[#allocation4 + $0x1c0] sm:$0xf]  ;;  %v9613_v28 = vld [vmem:[#allocation4 + $0x1cc] sm:$0xf0]  ;;  %v6596_v33 = vor.u32 %v9569_v23, %v6595_v22 }
  0x51   :  { %2019 = vmatpush.bf16.msra.mxu3 %v7028_v6  ;;  %v6851_v29 = vld [vmem:[#allocation4 + $0x260] sm:$0xf]  ;;  %v9633_v30 = vld [vmem:[#allocation4 + $0x26c] sm:$0xf0]  ;;  %v6772_v36 = vor.u32 %v9613_v28, %v6771_v27 }
  0x52   :  { %6538 = vmatmul.msk.bf16.vlgmr.msrb.gmra.mxu1 %vm309_vm0, %v10688_v20  ;;  %v6979_v31 = vld [vmem:[#allocation4 + $0x360] sm:$0xf]  ;;  %v9665_v32 = vld [vmem:[#allocation4 + $0x36c] sm:$0xf0]  ;;  %6543 = vmatmul.msk.bf16.vlgmr.msrb.gmra.mxu2 %vm309_vm0, %v10688_v20  ;;  %v6852_v37 = vor.u32 %v9633_v30, %v6851_v29 }
  0x53   :  { %2007 = vmatpush.bf16.msra.mxu2 %v6884_v10  ;;  %1992 = vmatpush.bf16.msrb.mxu1 %v6788_v24  ;;  %v6579_v34 = vld [vmem:[#allocation4 + $0x40] sm:$0xf]  ;;  %v9565_v35 = vld [vmem:[#allocation4 + $0x4c] sm:$0xf0]  ;;  %v6980_v38 = vor.u32 %v9665_v32, %v6979_v31 }
  0x54   :  { %6544 = vmatmul.msk.bf16.vlgmr.msrb.gmra.mxu3 %vm309_vm0, %v10688_v20  ;;  %1982 = vmatpush.bf16.msrb.mxu0 %v6612_v21  ;;  %v6755_v39 = vld [vmem:[#allocation4 + $0x1a0] sm:$0xf]  ;;  %v9609_v40 = vld [vmem:[#allocation4 + $0x1ac] sm:$0xf0]  ;;  %v6580_v45 = vor.u32 %v9565_v35, %v6579_v34 }
  0x55   :  { %2020 = vmatpush.bf16.msra.mxu3 %v7012_v13  ;;  %v6835_v41 = vld [vmem:[#allocation4 + $0x240] sm:$0xf]  ;;  %v9629_v42 = vld [vmem:[#allocation4 + $0x24c] sm:$0xf0]  ;;  %v6756_v48 = vor.u32 %v9609_v40, %v6755_v39 }
  0x56   :  { %v6963_v43 = vld [vmem:[#allocation4 + $0x340] sm:$0xf]  ;;  %v9661_v44 = vld [vmem:[#allocation4 + $0x34c] sm:$0xf0]  ;;  %v6836_v49 = vor.u32 %v9629_v42, %v6835_v41 }
  0x57   :  { %2008 = vmatpush.bf16.msra.mxu2 %v6868_v25  ;;  %1993 = vmatpush.bf16.msrb.mxu1 %v6772_v36  ;;  %v6563_v46 = vld [vmem:[#allocation4 + $0x20] sm:$0xf]  ;;  %v9561_v47 = vld [vmem:[#allocation4 + $0x2c] sm:$0xf0]  ;;  %v6964_v50 = vor.u32 %v9661_v44, %v6963_v43 }
  0x58   :  { %1983 = vmatpush.bf16.msrb.mxu0 %v6596_v33  ;;  %v6739_v51 = vld [vmem:[#allocation4 + $0x180] sm:$0xf]  ;;  %v9605_v52 = vld [vmem:[#allocation4 + $0x18c] sm:$0xf0]  ;;  %v6564_v57 = vor.u32 %v9561_v47, %v6563_v46 }
  0x59   :  { %2021 = vmatpush.bf16.msra.mxu3 %v6996_v26  ;;  %v6819_v53 = vld [vmem:[#allocation4 + $0x220] sm:$0xf]  ;;  %v9625_v54 = vld [vmem:[#allocation4 + $0x22c] sm:$0xf0]  ;;  %v6740_v60 = vor.u32 %v9605_v52, %v6739_v51 }
  0x5a   :  { %v6947_v55 = vld [vmem:[#allocation4 + $0x320] sm:$0xf]  ;;  %v9657_v56 = vld [vmem:[#allocation4 + $0x32c] sm:$0xf0]  ;;  %v6820_v63 = vor.u32 %v9625_v54, %v6819_v53 }
  0x5b   :  { %2009 = vmatpush.bf16.msra.mxu2 %v6852_v37  ;;  %1994 = vmatpush.bf16.msrb.mxu1 %v6756_v48  ;;  %v6547_v58 = vld [vmem:[#allocation4] sm:$0xf]  ;;  %v9557_v59 = vld [vmem:[#allocation4 + $0xc] sm:$0xf0]  ;;  %v6948_v0 = vor.u32 %v9657_v56, %v6947_v55 }
  0x5c   :  { %1984 = vmatpush.bf16.msrb.mxu0 %v6580_v45  ;;  %v7171_v61 = vld [vmem:[#allocation4 + $0x4e0] sm:$0xf]  ;;  %v9713_v62 = vld [vmem:[#allocation4 + $0x4ec] sm:$0xf0]  ;;  %v6548_v9 = vor.u32 %v9557_v59, %v6547_v58 }
  0x5d   :  { %2022 = vmatpush.bf16.msra.mxu3 %v6980_v38  ;;  %v6723_v1 = vld [vmem:[#allocation4 + $0x160] sm:$0xf]  ;;  %v9601_v2 = vld [vmem:[#allocation4 + $0x16c] sm:$0xf0]  ;;  %v7172_v13 = vor.u32 %v9713_v62, %v7171_v61 }
  0x5e   :  { %v6803_v3 = vld [vmem:[#allocation4 + $0x200] sm:$0xf]  ;;  %v9621_v4 = vld [vmem:[#allocation4 + $0x20c] sm:$0xf0]  ;;  %v6724_v10 = vor.u32 %v9601_v2, %v6723_v1 }
  0x5f   :  { %2010 = vmatpush.bf16.msra.mxu2 %v6836_v49  ;;  %v6931_v5 = vld [vmem:[#allocation4 + $0x300] sm:$0xf]  ;;  %v9653_v6 = vld [vmem:[#allocation4 + $0x30c] sm:$0xf0]  ;;  %1995 = vmatpush.bf16.msrb.mxu1 %v6740_v60  ;;  %v6804_v15 = vor.u32 %v9621_v4, %v6803_v3 }
  0x60   :  { %v7427_v7 = vld [vmem:[#allocation4 + $0x6e0] sm:$0xf]  ;;  %v9777_v8 = vld [vmem:[#allocation4 + $0x6ec] sm:$0xf0]  ;;  %1985 = vmatpush.bf16.msrb.mxu0 %v6564_v57  ;;  %v6932_v19 = vor.u32 %v9653_v6, %v6931_v5 }
  0x61   :  { %2023 = vmatpush.bf16.msra.mxu3 %v6964_v50  ;;  %v7555_v11 = vld [vmem:[#allocation4 + $0x7e0] sm:$0xf]  ;;  %v9809_v12 = vld [vmem:[#allocation4 + $0x7ec] sm:$0xf0]  ;;  %v7428_v21 = vor.u32 %v9777_v8, %v7427_v7 }
  0x62   :  { %v7155_v14 = vld [vmem:[#allocation4 + $0x4c0] sm:$0xf]  ;;  %v9597_v17 = vld [vmem:[#allocation4 + $0x14c] sm:$0xf0]  ;;  %6542 = vmatmul.msk.bf16.vlgmr.msra.gmra.mxu1 %vm309_vm0, %v10688_v20  ;;  %v7556_v24 = vor.u32 %v9809_v12, %v7555_v11 }
  0x63   :  { %2011 = vmatpush.bf16.msra.mxu2 %v6820_v63  ;;  %v6707_v16 = vld [vmem:[#allocation4 + $0x140] sm:$0xf]  ;;  %v9709_v18 = vld [vmem:[#allocation4 + $0x4cc] sm:$0xf0]  ;;  %1996 = vmatpush.bf16.msrb.mxu1 %v6724_v10 }
  0x64   :  { %v7411_v22 = vld [vmem:[#allocation4 + $0x6c0] sm:$0xf]  ;;  %v9773_v23 = vld [vmem:[#allocation4 + $0x6cc] sm:$0xf0]  ;;  %1986 = vmatpush.bf16.msrb.mxu0 %v6548_v9  ;;  %v6708_v26 = vor.u32 %v9597_v17, %v6707_v16  ;;  %v7156_v28 = vor.u32 %v9709_v18, %v7155_v14 }
  0x65   :  { %2024 = vmatpush.bf16.msra.mxu3 %v6948_v0  ;;  %v7539_v25 = vld [vmem:[#allocation4 + $0x7c0] sm:$0xf]  ;;  %v9805_v27 = vld [vmem:[#allocation4 + $0x7cc] sm:$0xf0]  ;;  %v7412_v32 = vor.u32 %v9773_v23, %v7411_v22 }
  0x66   :  { %v6691_v29 = vld [vmem:[#allocation4 + $0x120] sm:$0xf]  ;;  %v9593_v30 = vld [vmem:[#allocation4 + $0x12c] sm:$0xf0]  ;;  %v7540_v33 = vor.u32 %v9805_v27, %v7539_v25 }
  0x67   :  { %2012 = vmatpush.bf16.msra.mxu2 %v6804_v15  ;;  %v7139_v31 = vld [vmem:[#allocation4 + $0x4a0] sm:$0xf]  ;;  %v9705_v20 = vld [vmem:[#allocation4 + $0x4ac] sm:$0xf0]  ;;  %1997 = vmatpush.bf16.msrb.mxu1 %v6708_v26  ;;  %v6692_v36 = vor.u32 %v9593_v30, %v6691_v29 }
  0x68   :  { %2031 = vmatpush.bf16.msra.mxu0 %v7172_v13  ;;  %v7395_v34 = vld [vmem:[#allocation4 + $0x6a0] sm:$0xf]  ;;  %v9769_v35 = vld [vmem:[#allocation4 + $0x6ac] sm:$0xf0]  ;;  %v7140_v39 = vor.u32 %v9705_v20, %v7139_v31 }
  0x69   :  { %2025 = vmatpush.bf16.msra.mxu3 %v6932_v19  ;;  %v7523_v37 = vld [vmem:[#allocation4 + $0x7a0] sm:$0xf]  ;;  %v9801_v38 = vld [vmem:[#allocation4 + $0x7ac] sm:$0xf0]  ;;  %v7396_v44 = vor.u32 %v9769_v35, %v7395_v34 }
  0x6a   :  { %v7123_v40 = vld [vmem:[#allocation4 + $0x480] sm:$0xf]  ;;  %v9589_v42 = vld [vmem:[#allocation4 + $0x10c] sm:$0xf0]  ;;  %v7524_v47 = vor.u32 %v9801_v38, %v7523_v37 }
  0x6b   :  { %2057 = vmatpush.bf16.msrb.mxu2 %v7428_v21  ;;  %v6675_v41 = vld [vmem:[#allocation4 + $0x100] sm:$0xf]  ;;  %v9701_v43 = vld [vmem:[#allocation4 + $0x48c] sm:$0xf0]  ;;  %1998 = vmatpush.bf16.msrb.mxu1 %v6692_v36 }
  0x6c   :  { %2032 = vmatpush.bf16.msra.mxu0 %v7156_v28  ;;  %v7299_v45 = vld [vmem:[#allocation4 + $0x5e0] sm:$0xf]  ;;  %v9745_v46 = vld [vmem:[#allocation4 + $0x5ec] sm:$0xf0]  ;;  %v6676_v50 = vor.u32 %v9589_v42, %v6675_v41  ;;  %v7124_v53 = vor.u32 %v9701_v43, %v7123_v40 }
  0x6d   :  { %2070 = vmatpush.bf16.msrb.mxu3 %v7556_v24  ;;  %v7379_v48 = vld [vmem:[#allocation4 + $0x680] sm:$0xf]  ;;  %v9765_v49 = vld [vmem:[#allocation4 + $0x68c] sm:$0xf0]  ;;  %v7300_v55 = vor.u32 %v9745_v46, %v7299_v45 }
  0x6e   :  { %v7507_v51 = vld [vmem:[#allocation4 + $0x780] sm:$0xf]  ;;  %v9797_v52 = vld [vmem:[#allocation4 + $0x78c] sm:$0xf0]  ;;  %v7380_v57 = vor.u32 %v9765_v49, %v7379_v48 }
  0x6f   :  { %2058 = vmatpush.bf16.msrb.mxu2 %v7412_v32  ;;  %v7107_v54 = vld [vmem:[#allocation4 + $0x460] sm:$0xf]  ;;  %v9697_v56 = vld [vmem:[#allocation4 + $0x46c] sm:$0xf0]  ;;  %v7508_v60 = vor.u32 %v9797_v52, %v7507_v51  ;;  %1999 = vmatpush.bf16.msrb.mxu1 %v6676_v50 }
  0x70   :  { %2033 = vmatpush.bf16.msra.mxu0 %v7140_v39  ;;  %v7283_v58 = vld [vmem:[#allocation4 + $0x5c0] sm:$0xf]  ;;  %v9741_v59 = vld [vmem:[#allocation4 + $0x5cc] sm:$0xf0]  ;;  %v7108_v61 = vor.u32 %v9697_v56, %v7107_v54  ;;  %v9583_v54 = vld [vmem:[#allocation4 + $0xe4] sm:$0xf] }
  0x71   :  { %2071 = vmatpush.bf16.msrb.mxu3 %v7540_v33  ;;  %v7284_v62 = vor.u32 %v9741_v59, %v7283_v58  ;;  %v7091_v63 = vld [vmem:[#allocation4 + $0x440] sm:$0xf]  ;;  %v9693_v0 = vld [vmem:[#allocation4 + $0x44c] sm:$0xf0] }
  0x72   :  { %v7092_v1 = vor.u32 %v9693_v0, %v7091_v63  ;;  %v7363_v2 = vld [vmem:[#allocation4 + $0x660] sm:$0xf]  ;;  %v9761_v3 = vld [vmem:[#allocation4 + $0x66c] sm:$0xf0] }
  0x73   :  { %2059 = vmatpush.bf16.msrb.mxu2 %v7396_v44  ;;  %2044 = vmatpush.bf16.msra.mxu1 %v7300_v55  ;;  %v7491_v4 = vld [vmem:[#allocation4 + $0x760] sm:$0xf]  ;;  %v7364_v5 = vor.u32 %v9761_v3, %v7363_v2  ;;  %v9793_v6 = vld [vmem:[#allocation4 + $0x76c] sm:$0xf0]  ;;  %v6661_v55 = vld [vmem:[#allocation4 + $0xf0] sm:$0xf0] }
  0x74   :  { %2034 = vmatpush.bf16.msra.mxu0 %v7124_v53  ;;  %v7492_v7 = vor.u32 %v9793_v6, %v7491_v4  ;;  %v7075_v8 = vld [vmem:[#allocation4 + $0x420] sm:$0xf]  ;;  %v9689_v9 = vld [vmem:[#allocation4 + $0x42c] sm:$0xf0]  ;;  %v6664_v59 = vor.u32 %v9583_v54, %v6661_v55  ;;  %v9647_v2 = vld [vmem:[#allocation4 + $0x2e4] sm:$0xf] }
  0x75   :  { %2072 = vmatpush.bf16.msrb.mxu3 %v7524_v47  ;;  %v7267_v10 = vld [vmem:[#allocation4 + $0x5a0] sm:$0xf]  ;;  %v7076_v11 = vor.u32 %v9689_v9, %v7075_v8  ;;  %v9737_v12 = vld [vmem:[#allocation4 + $0x5ac] sm:$0xf0]  ;;  %v6917_v3 = vld [vmem:[#allocation4 + $0x2f0] sm:$0xf0] }
  0x76   :  { %v7268_v13 = vor.u32 %v9737_v12, %v7267_v10  ;;  %v7347_v14 = vld [vmem:[#allocation4 + $0x640] sm:$0xf]  ;;  %v9757_v15 = vld [vmem:[#allocation4 + $0x64c] sm:$0xf0]  ;;  %v9679_v8 = vld [vmem:[#allocation4 + $0x3e4] sm:$0xf] }
  0x77   :  { %2060 = vmatpush.bf16.msrb.mxu2 %v7380_v57  ;;  %2045 = vmatpush.bf16.msra.mxu1 %v7284_v62  ;;  %v7475_v16 = vld [vmem:[#allocation4 + $0x740] sm:$0xf]  ;;  %v7348_v17 = vor.u32 %v9757_v15, %v7347_v14  ;;  %v9789_v18 = vld [vmem:[#allocation4 + $0x74c] sm:$0xf0]  ;;  %v6645_v62 = vld [vmem:[#allocation4 + $0xd0] sm:$0xf0]  ;;  %v6920_v15 = vor.u32 %v9647_v2, %v6917_v3 }
  0x78   :  { %2035 = vmatpush.bf16.msra.mxu0 %v7108_v61  ;;  %v7476_v19 = vor.u32 %v9789_v18, %v7475_v16  ;;  %v7059_v21 = vld [vmem:[#allocation4 + $0x400] sm:$0xf]  ;;  %v9685_v22 = vld [vmem:[#allocation4 + $0x40c] sm:$0xf0]  ;;  %v9579_v61 = vld [vmem:[#allocation4 + $0xc4] sm:$0xf] }
  0x79   :  { %2073 = vmatpush.bf16.msrb.mxu3 %v7508_v60  ;;  %v7251_v23 = vld [vmem:[#allocation4 + $0x580] sm:$0xf]  ;;  %v7060_v24 = vor.u32 %v9685_v22, %v7059_v21  ;;  %v9733_v25 = vld [vmem:[#allocation4 + $0x58c] sm:$0xf0]  ;;  %v7045_v9 = vld [vmem:[#allocation4 + $0x3f0] sm:$0xf0] }
  0x7a   :  { %v7252_v26 = vor.u32 %v9733_v25, %v7251_v23  ;;  %v7331_v27 = vld [vmem:[#allocation4 + $0x620] sm:$0xf]  ;;  %v9753_v28 = vld [vmem:[#allocation4 + $0x62c] sm:$0xf0]  ;;  %v6629_v12 = vld [vmem:[#allocation4 + $0xb0] sm:$0xf0]  ;;  %v7048_v16 = vor.u32 %v9679_v8, %v7045_v9 }
  0x7b   :  { %2061 = vmatpush.bf16.msrb.mxu2 %v7364_v5  ;;  %2046 = vmatpush.bf16.msra.mxu1 %v7268_v13  ;;  %v7459_v29 = vld [vmem:[#allocation4 + $0x720] sm:$0xf]  ;;  %v9785_v30 = vld [vmem:[#allocation4 + $0x72c] sm:$0xf0]  ;;  %v7332_v31 = vor.u32 %v9753_v28, %v7331_v27  ;;  %v6901_v23 = vld [vmem:[#allocation4 + $0x2d0] sm:$0xf0] }
  0x7c   :  { %2036 = vmatpush.bf16.msra.mxu0 %v7092_v1  ;;  %v7460_v20 = vor.u32 %v9785_v30, %v7459_v29  ;;  %v7235_v32 = vld [vmem:[#allocation4 + $0x560] sm:$0xf]  ;;  %v9729_v33 = vld [vmem:[#allocation4 + $0x56c] sm:$0xf0]  ;;  %v7029_v25 = vld [vmem:[#allocation4 + $0x3d0] sm:$0xf0] }
  0x7d   :  { %2074 = vmatpush.bf16.msrb.mxu3 %v7492_v7  ;;  %v7236_v34 = vor.u32 %v9729_v33, %v7235_v32  ;;  %v7315_v35 = vld [vmem:[#allocation4 + $0x600] sm:$0xf]  ;;  %v9749_v36 = vld [vmem:[#allocation4 + $0x60c] sm:$0xf0]  ;;  %v6648_v7 = vor.u32 %v9579_v61, %v6645_v62  ;;  %v9571_v27 = vld [vmem:[#allocation4 + $0x84] sm:$0xf] }
  0x7e   :  { %v7443_v37 = vld [vmem:[#allocation4 + $0x700] sm:$0xf]  ;;  %v7316_v38 = vor.u32 %v9749_v36, %v7315_v35  ;;  %v9781_v39 = vld [vmem:[#allocation4 + $0x70c] sm:$0xf0]  ;;  %v6613_v28 = vld [vmem:[#allocation4 + $0x90] sm:$0xf0] }
  0x7f   :  { %2062 = vmatpush.bf16.msrb.mxu2 %v7348_v17  ;;  %2047 = vmatpush.bf16.msra.mxu1 %v7252_v26  ;;  %v7444_v40 = vor.u32 %v9781_v39, %v7443_v37  ;;  %v7219_v41 = vld [vmem:[#allocation4 + $0x540] sm:$0xf]  ;;  %v9725_v42 = vld [vmem:[#allocation4 + $0x54c] sm:$0xf0]  ;;  %v9643_v17 = vld [vmem:[#allocation4 + $0x2c4] sm:$0xf]  ;;  %v6616_v37 = vor.u32 %v9571_v27, %v6613_v28 }
  0x80   :  { %2037 = vmatpush.bf16.msra.mxu0 %v7076_v11  ;;  %v7220_v43 = vor.u32 %v9725_v42, %v7219_v41  ;;  %v7203_v44 = vld [vmem:[#allocation4 + $0x520] sm:$0xf]  ;;  %v9721_v45 = vld [vmem:[#allocation4 + $0x52c] sm:$0xf0]  ;;  %v9575_v11 = vld [vmem:[#allocation4 + $0xa4] sm:$0xf] }
  0x81   :  { %2075 = vmatpush.bf16.msrb.mxu3 %v7476_v19  ;;  %v7204_v46 = vor.u32 %v9721_v45, %v7203_v44  ;;  %v7187_v47 = vld [vmem:[#allocation4 + $0x500] sm:$0xf]  ;;  %v9717_v48 = vld [vmem:[#allocation4 + $0x50c] sm:$0xf0]  ;;  %v6632_v21 = vor.u32 %v9575_v11, %v6629_v12  ;;  %v9639_v33 = vld [vmem:[#allocation4 + $0x2a4] sm:$0xf] }
  0x82   :  { %v7188_v49 = vor.u32 %v9717_v48, %v7187_v47  ;;  %v10709_v50 = vld [vmem:[%s11032_s3] sm:$0xff]  ;;  %v7013_v39 = vld [vmem:[#allocation4 + $0x3b0] sm:$0xf0] }
  0x83   :  { %2063 = vmatpush.bf16.msrb.mxu2 %v7332_v31  ;;  %2048 = vmatpush.bf16.msra.mxu1 %v7236_v34  ;;  %v213_v51 = vperm.slane %v10709_v50, 0  ;;  %v215_v57 = vperm.slane %v10709_v50, 2  ;;  %v216_v58 = vperm.slane %v10709_v50, 3  ;;  %v217_v10 = vperm.slane %v10709_v50, 4  ;;  %v6885_v34 = vld [vmem:[#allocation4 + $0x2b0] sm:$0xf0] }
  0x84   :  { %2038 = vmatpush.bf16.msra.mxu0 %v7060_v24  ;;  %v9675_v24 = vld [vmem:[#allocation4 + $0x3c4] sm:$0xf]  ;;  %v214_v26 = vperm.slane %v10709_v50, 1  ;;  %v6888_v42 = vor.u32 %v9639_v33, %v6885_v34  ;;  %v6789_v45 = vld [vmem:[#allocation4 + $0x1f0] sm:$0xf0]  ;;  %v219_v48 = vperm.slane %v10709_v50, 6 }
  0x85   :  { %2076 = vmatpush.bf16.msrb.mxu3 %v7460_v20  ;;  %v6904_v20 = vor.u32 %v9643_v17, %v6901_v23  ;;  %v7032_v32 = vor.u32 %v9675_v24, %v7029_v25  ;;  %v9567_v41 = vld [vmem:[#allocation4 + $0x64] sm:$0xf]  ;;  %v6997_v55 = vld [vmem:[#allocation4 + $0x390] sm:$0xf0] }
  0x86   :  { %v9615_v44 = vld [vmem:[#allocation4 + $0x1e4] sm:$0xf]  ;;  %v6581_v61 = vld [vmem:[#allocation4 + $0x50] sm:$0xf0] }
  0x87   :  { %2064 = vmatpush.bf16.msrb.mxu2 %v7316_v38  ;;  %2049 = vmatpush.bf16.msra.mxu1 %v7220_v43  ;;  %v9671_v38 = vld [vmem:[#allocation4 + $0x3a4] sm:$0xf]  ;;  %v6597_v43 = vld [vmem:[#allocation4 + $0x70] sm:$0xf0] }
  0x88   :  { %v7016_v47 = vor.u32 %v9671_v38, %v7013_v39  ;;  %v9667_v54 = vld [vmem:[#allocation4 + $0x384] sm:$0xf]  ;;  %v6853_v8 = vld [vmem:[#allocation4 + $0x270] sm:$0xf0] }
  0x89   :  { %2077 = vmatpush.bf16.msrb.mxu3 %v7444_v40  ;;  %v9611_v62 = vld [vmem:[#allocation4 + $0x1c4] sm:$0xf]  ;;  %v7000_v3 = vor.u32 %v9667_v54, %v6997_v55  ;;  %v6837_v27 = vld [vmem:[#allocation4 + $0x250] sm:$0xf0] }
  0x8a   :  { %v9663_v9 = vld [vmem:[#allocation4 + $0x364] sm:$0xf]  ;;  %v6549_v33 = vld [vmem:[#allocation4 + $0x10] sm:$0xf0] }
  0x8b   :  { %2050 = vmatpush.bf16.msra.mxu1 %v7204_v46  ;;  %v9607_v17 = vld [vmem:[#allocation4 + $0x1a4] sm:$0xf]  ;;  %v7173_v39 = vld [vmem:[#allocation4 + $0x4f0] sm:$0xf0] }
  0x8c   :  { %v9627_v24 = vld [vmem:[#allocation4 + $0x244] sm:$0xf]  ;;  %v7157_v55 = vld [vmem:[#allocation4 + $0x4d0] sm:$0xf0] }
  0x8d   :  { %v9659_v28 = vld [vmem:[#allocation4 + $0x344] sm:$0xf] }
  0x8e   :  { %v9603_v34 = vld [vmem:[#allocation4 + $0x184] sm:$0xf] }
  0x8f   :  { %2051 = vmatpush.bf16.msra.mxu1 %v7188_v49  ;;  %v220_v49 = vperm.slane %v10709_v50, 7  ;;  %v9711_v38 = vld [vmem:[#allocation4 + $0x4e4] sm:$0xf] }
  0x90   :  { %v9707_v54 = vld [vmem:[#allocation4 + $0x4c4] sm:$0xf] }
  0xbf   :  { %v322_v52 = vpop.f32.mrf.mxu1 }
  0xc0   :  { %v323_v53 = vadd.f32 %v322_v52, %v213_v51  ;;  %v9635_v51 = vld [vmem:[#allocation4 + $0x284] sm:$0xf] }
  0xc2   :  { %v417_v56 = vmax.f32 %v323_v53, 0.0  ;;  %v6869_v53 = vld [vmem:[#allocation4 + $0x290] sm:$0xf0] }
  0xc3   :  { %v6872_v2 = vor.u32 %v9635_v51, %v6869_v53  ;;  %v7176_v51 = vor.u32 %v9711_v38, %v7173_v39  ;;  %v6725_v53 = vld [vmem:[#allocation4 + $0x170] sm:$0xf0]  ;;  %v9587_v39 = vld [vmem:[#allocation4 + $0x104] sm:$0xf] }
  0xc4   :  { %v10714_v60 = vpack.c.bf16 %v417_v56, %v417_v56 }
  0xc5   :  { %v348_v0 = vpop.f32.mrf.mxu2 }
  0xc6   :  { %v374_v63 = vpop.f32.mrf.mxu0  ;;  %1987 = vmatmul.bf16.vlgmr.msrb.gmra.mxu0 %v10714_v60  ;;  %v349_v4 = vadd.f32 %v348_v0, %v215_v57  ;;  %v6600_v57 = vor.u32 %v9567_v41, %v6597_v43 }
  0xc7   :  { %v361_v1 = vpop.f32.mrf.mxu3  ;;  %2083 = vmatpush.bf16.msrb.mxu0 %v6664_v59  ;;  %v324_v6 = vpop.f32.mrf.mxu1  ;;  %v375_v22 = vadd.f32 %v374_v63, %v217_v10  ;;  %v9563_v59 = vld [vmem:[#allocation4 + $0x44] sm:$0xf]  ;;  %v6773_v63 = vld [vmem:[#allocation4 + $0x1d0] sm:$0xf0] }
  0xc8   :  { %v362_v5 = vadd.f32 %v361_v1, %v216_v58  ;;  %v419_v13 = vmax.f32 %v349_v4, 0.0  ;;  %v6792_v58 = vor.u32 %v9615_v44, %v6789_v45  ;;  %v9631_v4 = vld [vmem:[#allocation4 + $0x264] sm:$0xf]  ;;  %v6981_v10 = vld [vmem:[#allocation4 + $0x370] sm:$0xf0]  ;;  %v6584_v11 = vor.u32 %v9563_v59, %v6581_v61 }
  0xc9   :  { %v421_v36 = vmax.f32 %v375_v22, 0.0  ;;  %v6776_v12 = vor.u32 %v9611_v62, %v6773_v63  ;;  %v6856_v22 = vor.u32 %v9631_v4, %v6853_v8  ;;  %v6984_v23 = vor.u32 %v9663_v9, %v6981_v10  ;;  %v6821_v44 = vld [vmem:[#allocation4 + $0x230] sm:$0xf0]  ;;  %v9619_v61 = vld [vmem:[#allocation4 + $0x204] sm:$0xf] }
  0xca   :  { %v420_v14 = vmax.f32 %v362_v5, 0.0  ;;  %v10718_v18 = vpack.c.bf16 %v419_v13, %v419_v13  ;;  %v9559_v13 = vld [vmem:[#allocation4 + $0x24] sm:$0xf]  ;;  %v6949_v45 = vld [vmem:[#allocation4 + $0x330] sm:$0xf0] }
  0xcb   :  { %2084 = vmatpush.bf16.msrb.mxu0 %v6648_v7  ;;  %v10727_v52 = vpack.c.bf16 %v421_v36, %v421_v36  ;;  %v6840_v36 = vor.u32 %v9627_v24, %v6837_v27  ;;  %v6805_v62 = vld [vmem:[#allocation4 + $0x210] sm:$0xf0]  ;;  %v9651_v63 = vld [vmem:[#allocation4 + $0x304] sm:$0xf] }
  0xcc   :  { %v10720_v19 = vpack.c.bf16 %v420_v14, %v420_v14  ;;  %2013 = vmatmul.bf16.vlgmr.msra.gmra.mxu2 %v10718_v18  ;;  %v6565_v14 = vld [vmem:[#allocation4 + $0x30] sm:$0xf0]  ;;  %v9595_v8 = vld [vmem:[#allocation4 + $0x144] sm:$0xf]  ;;  %v6808_v10 = vor.u32 %v9619_v61, %v6805_v62 }
  0xcd   :  { %2109 = vmatpush.bf16.msra.mxu2 %v6920_v15  ;;  %v350_v30 = vpop.f32.mrf.mxu2  ;;  %v7429_v4 = vld [vmem:[#allocation4 + $0x6f0] sm:$0xf0] }
  0xce   :  { %2026 = vmatmul.bf16.vlgmr.msra.gmra.mxu3 %v10720_v19  ;;  %v376_v29 = vpop.f32.mrf.mxu0  ;;  %v6568_v30 = vor.u32 %v9559_v13, %v6565_v14  ;;  %v6709_v9 = vld [vmem:[#allocation4 + $0x150] sm:$0xf0] }
  0xcf   :  { %2122 = vmatpush.bf16.msra.mxu3 %v7048_v16  ;;  %v363_v31 = vpop.f32.mrf.mxu3  ;;  %2085 = vmatpush.bf16.msrb.mxu0 %v6632_v21  ;;  %v335_v35 = vpop.f32.mrf.mxu1  ;;  %v6757_v21 = vld [vmem:[#allocation4 + $0x1b0] sm:$0xf0] }
  0xd0   :  { %v336_v40 = vadd.f32 %v335_v35, %v214_v26  ;;  %v6965_v29 = vld [vmem:[#allocation4 + $0x350] sm:$0xf0]  ;;  %v6760_v31 = vor.u32 %v9607_v17, %v6757_v21  ;;  %v9771_v17 = vld [vmem:[#allocation4 + $0x6c4] sm:$0xf]  ;;  %v6712_v21 = vor.u32 %v9595_v8, %v6709_v9 }
  0xd1   :  { %2110 = vmatpush.bf16.msra.mxu2 %v6904_v20  ;;  %v218_v20 = vperm.slane %v10709_v50, 5  ;;  %v6741_v35 = vld [vmem:[#allocation4 + $0x190] sm:$0xf0]  ;;  %v9655_v50 = vld [vmem:[#allocation4 + $0x324] sm:$0xf] }
  0xd2   :  { %v418_v46 = vmax.f32 %v336_v40, 0.0  ;;  %v9623_v40 = vld [vmem:[#allocation4 + $0x224] sm:$0xf]  ;;  %v6952_v59 = vor.u32 %v9655_v50, %v6949_v45  ;;  %v7141_v13 = vld [vmem:[#allocation4 + $0x4b0] sm:$0xf0] }
  0xd3   :  { %2123 = vmatpush.bf16.msra.mxu3 %v7032_v32  ;;  %2086 = vmatpush.bf16.msrb.mxu0 %v6616_v37  ;;  %v9555_v32 = vld [vmem:[#allocation4 + $0x4] sm:$0xf]  ;;  %v6968_v37 = vor.u32 %v9659_v28, %v6965_v29  ;;  %v7541_v24 = vld [vmem:[#allocation4 + $0x7d0] sm:$0xf0] }
  0xd4   :  { %v10729_v56 = vpack.c.bf16 %v418_v46, %v418_v46  ;;  %v9591_v28 = vld [vmem:[#allocation4 + $0x124] sm:$0xf]  ;;  %v6693_v29 = vld [vmem:[#allocation4 + $0x130] sm:$0xf0] }
  0xd5   :  { %2111 = vmatpush.bf16.msra.mxu2 %v6888_v42  ;;  %v400_v0 = vpop.f32.mrf.mxu2  ;;  %v9735_v8 = vld [vmem:[#allocation4 + $0x5a4] sm:$0xf]  ;;  %v7269_v9 = vld [vmem:[#allocation4 + $0x5b0] sm:$0xf0] }
  0xd6   :  { %v401_v5 = vadd.f32 %v400_v0, %v219_v48  ;;  %2000 = vmatmul.bf16.vlgmr.msrb.gmra.mxu1 %v10729_v56  ;;  %2039 = vmatmul.bf16.vlgmr.msra.gmra.mxu0 %v10727_v52  ;;  %v6744_v48 = vor.u32 %v9603_v34, %v6741_v35  ;;  %v6933_v0 = vld [vmem:[#allocation4 + $0x310] sm:$0xf0]  ;;  %v6696_v34 = vor.u32 %v9591_v28, %v6693_v29  ;;  %v6667_v29 = vld [vmem:[#allocation4 + $0xe8] sm:$0xf] }
  0xd7   :  { %2124 = vmatpush.bf16.msra.mxu3 %v7016_v47  ;;  %v413_v1 = vpop.f32.mrf.mxu3  ;;  %v337_v7 = vpop.f32.mrf.mxu1  ;;  %2087 = vmatpush.bf16.msrb.mxu0 %v6600_v57  ;;  %v6552_v47 = vor.u32 %v9555_v32, %v6549_v33  ;;  %v9767_v33 = vld [vmem:[#allocation4 + $0x6a4] sm:$0xf]  ;;  %v7397_v35 = vld [vmem:[#allocation4 + $0x6b0] sm:$0xf0] }
  0xd8   :  { %v414_v6 = vadd.f32 %v413_v1, %v220_v49  ;;  %2096 = vmatpush.bf16.msrb.mxu1 %v6792_v58  ;;  %v423_v15 = vmax.f32 %v401_v5, 0.0  ;;  %v9599_v49 = vld [vmem:[#allocation4 + $0x164] sm:$0xf]  ;;  %v6824_v58 = vor.u32 %v9623_v40, %v6821_v44  ;;  %v7160_v7 = vor.u32 %v9707_v54, %v7157_v55  ;;  %v6677_v40 = vld [vmem:[#allocation4 + $0x110] sm:$0xf0] }
  0xd9   :  { %2112 = vmatpush.bf16.msra.mxu2 %v6872_v2  ;;  %v9775_v1 = vld [vmem:[#allocation4 + $0x6e4] sm:$0xf]  ;;  %v7301_v44 = vld [vmem:[#allocation4 + $0x5f0] sm:$0xf0]  ;;  %v7400_v50 = vor.u32 %v9767_v33, %v7397_v35 }
  0xda   :  { %v424_v16 = vmax.f32 %v414_v6, 0.0  ;;  %v10733_v25 = vpack.c.bf16 %v423_v15, %v423_v15  ;;  %v9807_v5 = vld [vmem:[#allocation4 + $0x7e4] sm:$0xf]  ;;  %v7557_v6 = vld [vmem:[#allocation4 + $0x7f0] sm:$0xf0]  ;;  %v7432_v14 = vor.u32 %v9775_v1, %v7429_v4 }
  0xdb   :  { %2125 = vmatpush.bf16.msra.mxu3 %v7000_v3  ;;  %2088 = vmatpush.bf16.msrb.mxu0 %v6584_v11  ;;  %v6728_v3 = vor.u32 %v9599_v49, %v6725_v53  ;;  %v6936_v11 = vor.u32 %v9651_v63, %v6933_v0  ;;  %v7560_v15 = vor.u32 %v9807_v5, %v7557_v6  ;;  %v9795_v49 = vld [vmem:[#allocation4 + $0x784] sm:$0xf]  ;;  %v7365_v0 = vld [vmem:[#allocation4 + $0x670] sm:$0xf0] }
  0xdc   :  { %v10735_v26 = vpack.c.bf16 %v424_v16, %v424_v16  ;;  %2097 = vmatpush.bf16.msrb.mxu1 %v6776_v12  ;;  %2065 = vmatmul.bf16.vlgmr.msrb.gmra.mxu2 %v10733_v25  ;;  %v9703_v12 = vld [vmem:[#allocation4 + $0x4a4] sm:$0xf]  ;;  %v7461_v33 = vld [vmem:[#allocation4 + $0x730] sm:$0xf0] }
  0xdd   :  { %2113 = vmatpush.bf16.msra.mxu2 %v6856_v22  ;;  %v402_v41 = vpop.f32.mrf.mxu2  ;;  %v7413_v22 = vld [vmem:[#allocation4 + $0x6d0] sm:$0xf0]  ;;  %v7144_v27 = vor.u32 %v9703_v12, %v7141_v13  ;;  %v9691_v55 = vld [vmem:[#allocation4 + $0x444] sm:$0xf] }
  0xde   :  { %2078 = vmatmul.bf16.vlgmr.msrb.gmra.mxu3 %v10735_v26  ;;  %v9695_v41 = vld [vmem:[#allocation4 + $0x464] sm:$0xf]  ;;  %v7349_v13 = vld [vmem:[#allocation4 + $0x650] sm:$0xf0] }
  0xdf   :  { %2126 = vmatpush.bf16.msra.mxu3 %v6984_v23  ;;  %v415_v42 = vpop.f32.mrf.mxu3  ;;  %v387_v43 = vpop.f32.mrf.mxu1  ;;  %2089 = vmatpush.bf16.msrb.mxu0 %v6568_v30  ;;  %v9803_v23 = vld [vmem:[#allocation4 + $0x7c4] sm:$0xf] }
  0xe0   :  { %2098 = vmatpush.bf16.msrb.mxu1 %v6760_v31  ;;  %v388_v46 = vadd.f32 %v387_v43, %v218_v20  ;;  %v9699_v30 = vld [vmem:[#allocation4 + $0x484] sm:$0xf]  ;;  %v7125_v31 = vld [vmem:[#allocation4 + $0x490] sm:$0xf0]  ;;  %v7416_v20 = vor.u32 %v9771_v17, %v7413_v22  ;;  %v7544_v32 = vor.u32 %v9803_v23, %v7541_v24  ;;  %v7272_v17 = vor.u32 %v9735_v8, %v7269_v9 }
  0xe1   :  { %2114 = vmatpush.bf16.msra.mxu2 %v6840_v36  ;;  %v9799_v36 = vld [vmem:[#allocation4 + $0x7a4] sm:$0xf]  ;;  %v7128_v38 = vor.u32 %v9699_v30, %v7125_v31  ;;  %v7109_v42 = vld [vmem:[#allocation4 + $0x470] sm:$0xf0]  ;;  %v9586_v30 = vld [vmem:[#allocation4 + $0xf4] sm:$0xf0] }
  0xe2   :  { %v422_v57 = vmax.f32 %v388_v46, 0.0  ;;  %v9743_v43 = vld [vmem:[#allocation4 + $0x5e4] sm:$0xf]  ;;  %v7112_v53 = vor.u32 %v9695_v41, %v7109_v42  ;;  %v7061_v22 = vld [vmem:[#allocation4 + $0x410] sm:$0xf0] }
  0xe3   :  { %2127 = vmatpush.bf16.msra.mxu3 %v6968_v37  ;;  %2090 = vmatpush.bf16.msrb.mxu0 %v6552_v47  ;;  %v7525_v37 = vld [vmem:[#allocation4 + $0x7b0] sm:$0xf0]  ;;  %v9763_v46 = vld [vmem:[#allocation4 + $0x684] sm:$0xf]  ;;  %v6680_v47 = vor.u32 %v9587_v39, %v6677_v40  ;;  %v7304_v54 = vor.u32 %v9743_v43, %v7301_v44  ;;  %v6651_v39 = vld [vmem:[#allocation4 + $0xc8] sm:$0xf] }
  0xe4   :  { %v10740_v2 = vpack.c.bf16 %v422_v57, %v422_v57  ;;  %2099 = vmatpush.bf16.msrb.mxu1 %v6744_v48  ;;  %v7528_v45 = vor.u32 %v9799_v36, %v7525_v37  ;;  %v7381_v48 = vld [vmem:[#allocation4 + $0x690] sm:$0xf0]  ;;  %v9759_v63 = vld [vmem:[#allocation4 + $0x664] sm:$0xf]  ;;  %v6668_v36 = vor.u32 %v9586_v30, %v6667_v29  ;;  %v9582_v42 = vld [vmem:[#allocation4 + $0xd4] sm:$0xf0] }
  0xe5   :  { %2115 = vmatpush.bf16.msra.mxu2 %v6824_v58  ;;  %v7093_v57 = vld [vmem:[#allocation4 + $0x450] sm:$0xf0]  ;;  %v9739_v58 = vld [vmem:[#allocation4 + $0x5c4] sm:$0xf]  ;;  %v7384_v61 = vor.u32 %v9763_v46, %v7381_v48  ;;  %v6923_v46 = vld [vmem:[#allocation4 + $0x2e8] sm:$0xf] }
  0xe6   :  { %2052 = vmatmul.bf16.vlgmr.msra.gmra.mxu1 %v10740_v2  ;;  %2091 = vmatmul.bf16.vlgmr.msrb.gmra.mxu0 %v10714_v60  ;;  %v9791_v1 = vld [vmem:[#allocation4 + $0x764] sm:$0xf]  ;;  %v7096_v4 = vor.u32 %v9691_v55, %v7093_v57  ;;  %v7253_v24 = vld [vmem:[#allocation4 + $0x590] sm:$0xf0]  ;;  %v9650_v48 = vld [vmem:[#allocation4 + $0x2f4] sm:$0xf0] }
  0xe7   :  { %2135 = vmatpush.bf16.msra.mxu0 %v7176_v51  ;;  %2128 = vmatpush.bf16.msra.mxu3 %v6952_v59  ;;  %v389_v16 = vpop.f32.mrf.mxu1  ;;  %v7509_v51 = vld [vmem:[#allocation4 + $0x790] sm:$0xf0]  ;;  %v9687_v6 = vld [vmem:[#allocation4 + $0x424] sm:$0xf]  ;;  %v6603_v30 = vld [vmem:[#allocation4 + $0x68] sm:$0xf] }
  0xe8   :  { %2100 = vmatpush.bf16.msrb.mxu1 %v6728_v3  ;;  %v7285_v59 = vld [vmem:[#allocation4 + $0x5d0] sm:$0xf0]  ;;  %v7512_v62 = vor.u32 %v9795_v49, %v7509_v51  ;;  %v9755_v12 = vld [vmem:[#allocation4 + $0x644] sm:$0xf]  ;;  %v7051_v49 = vld [vmem:[#allocation4 + $0x3e8] sm:$0xf] }
  0xe9   :  { %2116 = vmatpush.bf16.msra.mxu2 %v6808_v10  ;;  %v7493_v3 = vld [vmem:[#allocation4 + $0x770] sm:$0xf0]  ;;  %v7288_v5 = vor.u32 %v9739_v58, %v7285_v59  ;;  %v7368_v10 = vor.u32 %v9759_v63, %v7365_v0  ;;  %v9731_v23 = vld [vmem:[#allocation4 + $0x584] sm:$0xf]  ;;  %v9682_v51 = vld [vmem:[#allocation4 + $0x3f4] sm:$0xf0]  ;;  %v6924_v59 = vor.u32 %v9650_v48, %v6923_v46 }
  0xea   :  { %v9751_v31 = vld [vmem:[#allocation4 + $0x624] sm:$0xf]  ;;  %v7256_v35 = vor.u32 %v9731_v23, %v7253_v24  ;;  %v7317_v44 = vld [vmem:[#allocation4 + $0x610] sm:$0xf0]  ;;  %v9578_v63 = vld [vmem:[#allocation4 + $0xb4] sm:$0xf0] }
  0xeb   :  { %2136 = vmatpush.bf16.msra.mxu0 %v7160_v7  ;;  %2129 = vmatpush.bf16.msra.mxu3 %v6936_v11  ;;  %v7077_v7 = vld [vmem:[#allocation4 + $0x430] sm:$0xf0]  ;;  %v7496_v11 = vor.u32 %v9791_v1, %v7493_v3  ;;  %v9727_v37 = vld [vmem:[#allocation4 + $0x564] sm:$0xf]  ;;  %v6907_v0 = vld [vmem:[#allocation4 + $0x2c8] sm:$0xf] }
  0xec   :  { %2101 = vmatpush.bf16.msrb.mxu1 %v6712_v21  ;;  %2117 = vmatmul.bf16.vlgmr.msra.gmra.mxu2 %v10718_v18  ;;  %v7080_v16 = vor.u32 %v9687_v6, %v7077_v7  ;;  %v9683_v21 = vld [vmem:[#allocation4 + $0x404] sm:$0xf]  ;;  %v7221_v55 = vld [vmem:[#allocation4 + $0x550] sm:$0xf0]  ;;  %v9646_v3 = vld [vmem:[#allocation4 + $0x2d4] sm:$0xf0] }
  0xed   :  { %2161 = vmatpush.bf16.msrb.mxu2 %v7432_v14  ;;  %v9787_v14 = vld [vmem:[#allocation4 + $0x744] sm:$0xf]  ;;  %v7205_v7 = vld [vmem:[#allocation4 + $0x530] sm:$0xf0]  ;;  %v6908_v9 = vor.u32 %v9646_v3, %v6907_v0  ;;  %v6795_v24 = vld [vmem:[#allocation4 + $0x1e8] sm:$0xf] }
  0xee   :  { %2130 = vmatmul.bf16.vlgmr.msra.gmra.mxu3 %v10720_v19  ;;  %v9747_v43 = vld [vmem:[#allocation4 + $0x604] sm:$0xf]  ;;  %v6987_v46 = vld [vmem:[#allocation4 + $0x368] sm:$0xf]  ;;  %v9606_v3 = vld [vmem:[#allocation4 + $0x194] sm:$0xf0] }
  0xef   :  { %2174 = vmatpush.bf16.msrb.mxu3 %v7560_v15  ;;  %2137 = vmatpush.bf16.msra.mxu0 %v7144_v27  ;;  %v7477_v15 = vld [vmem:[#allocation4 + $0x750] sm:$0xf0]  ;;  %v7352_v27 = vor.u32 %v9755_v12, %v7349_v13  ;;  %v7320_v57 = vor.u32 %v9747_v43, %v7317_v44  ;;  %v9719_v6 = vld [vmem:[#allocation4 + $0x524] sm:$0xf]  ;;  %v9574_v12 = vld [vmem:[#allocation4 + $0x94] sm:$0xf0] }
  0xf0   :  { %2102 = vmatpush.bf16.msrb.mxu1 %v6696_v34  ;;  %v7480_v28 = vor.u32 %v9787_v14, %v7477_v15  ;;  %v7064_v34 = vor.u32 %v9683_v21, %v7061_v22  ;;  %v6891_v13 = vld [vmem:[#allocation4 + $0x2a8] sm:$0xf]  ;;  %v7208_v14 = vor.u32 %v9719_v6, %v7205_v7  ;;  %v9642_v15 = vld [vmem:[#allocation4 + $0x2b4] sm:$0xf0]  ;;  %v9715_v21 = vld [vmem:[#allocation4 + $0x504] sm:$0xf] }
  0xf1   :  { %2162 = vmatpush.bf16.msrb.mxu2 %v7416_v20  ;;  %v7333_v20 = vld [vmem:[#allocation4 + $0x630] sm:$0xf0]  ;;  %v6859_v44 = vld [vmem:[#allocation4 + $0x268] sm:$0xf]  ;;  %v9558_v6 = vld [vmem:[#allocation4 + $0x14] sm:$0xf0] }
  0xf2   :  { %v7336_v40 = vor.u32 %v9751_v31, %v7333_v20  ;;  %v7189_v22 = vld [vmem:[#allocation4 + $0x510] sm:$0xf0]  ;;  %v9570_v31 = vld [vmem:[#allocation4 + $0x74] sm:$0xf0]  ;;  %v7179_v7 = vld [vmem:[#allocation4 + $0x4e8] sm:$0xf] }
  0xf3   :  { %2175 = vmatpush.bf16.msrb.mxu3 %v7544_v32  ;;  %2138 = vmatpush.bf16.msra.mxu0 %v7128_v38  ;;  %v9783_v32 = vld [vmem:[#allocation4 + $0x724] sm:$0xf]  ;;  %v7237_v38 = vld [vmem:[#allocation4 + $0x570] sm:$0xf0]  ;;  %v7192_v20 = vor.u32 %v9715_v21, %v7189_v22 }
  0xf4   :  { %2103 = vmatpush.bf16.msrb.mxu1 %v6680_v47  ;;  %v7464_v41 = vor.u32 %v9783_v32, %v7461_v33  ;;  %v7240_v47 = vor.u32 %v9727_v37, %v7237_v38  ;;  %v6875_v32 = vld [vmem:[#allocation4 + $0x288] sm:$0xf]  ;;  %v9638_v33 = vld [vmem:[#allocation4 + $0x294] sm:$0xf0]  ;;  %v6604_v37 = vor.u32 %v9570_v31, %v6603_v30 }
  0xf5   :  { %2163 = vmatpush.bf16.msrb.mxu2 %v7400_v50  ;;  %v9779_v50 = vld [vmem:[#allocation4 + $0x704] sm:$0xf]  ;;  %v6779_v38 = vld [vmem:[#allocation4 + $0x1c8] sm:$0xf]  ;;  %v9654_v31 = vld [vmem:[#allocation4 + $0x314] sm:$0xf0] }
  0xf6   :  { %v6939_v30 = vld [vmem:[#allocation4 + $0x308] sm:$0xf] }
  0xf7   :  { %2176 = vmatpush.bf16.msrb.mxu3 %v7528_v45  ;;  %2139 = vmatpush.bf16.msra.mxu0 %v7112_v53  ;;  %v7445_v45 = vld [vmem:[#allocation4 + $0x710] sm:$0xf0]  ;;  %v6652_v53 = vor.u32 %v9582_v42, %v6651_v39  ;;  %v9614_v39 = vld [vmem:[#allocation4 + $0x1d4] sm:$0xf0] }
  0xf8   :  { %2148 = vmatpush.bf16.msra.mxu1 %v7304_v54  ;;  %v9723_v54 = vld [vmem:[#allocation4 + $0x544] sm:$0xf]  ;;  %v7448_v58 = vor.u32 %v9779_v50, %v7445_v45  ;;  %v9566_v42 = vld [vmem:[#allocation4 + $0x54] sm:$0xf0]  ;;  %v6780_v45 = vor.u32 %v9614_v39, %v6779_v38 }
  0xf9   :  { %2164 = vmatpush.bf16.msrb.mxu2 %v7384_v61  ;;  %2104 = vmatmul.bf16.vlgmr.msrb.gmra.mxu1 %v10729_v56  ;;  %v7052_v61 = vor.u32 %v9682_v51, %v7051_v49  ;;  %v7224_v1 = vor.u32 %v9723_v54, %v7221_v55  ;;  %v9634_v50 = vld [vmem:[#allocation4 + $0x274] sm:$0xf0]  ;;  %v6763_v49 = vld [vmem:[#allocation4 + $0x1a8] sm:$0xf] }
  0xfa   :  { %v9610_v51 = vld [vmem:[#allocation4 + $0x1b4] sm:$0xf0]  ;;  %v6571_v54 = vld [vmem:[#allocation4 + $0x28] sm:$0xf] }
  0xfb   :  { %2177 = vmatpush.bf16.msrb.mxu3 %v7512_v62  ;;  %2140 = vmatpush.bf16.msra.mxu0 %v7096_v4  ;;  %v6635_v62 = vld [vmem:[#allocation4 + $0xa8] sm:$0xf]  ;;  %v9562_v55 = vld [vmem:[#allocation4 + $0x34] sm:$0xf0] }
  0xfc   :  { %2149 = vmatpush.bf16.msra.mxu1 %v7288_v5  ;;  %v7035_v4 = vld [vmem:[#allocation4 + $0x3c8] sm:$0xf]  ;;  %v9678_v5 = vld [vmem:[#allocation4 + $0x3d4] sm:$0xf0]  ;;  %v6636_v8 = vor.u32 %v9578_v63, %v6635_v62  ;;  %v6572_v0 = vor.u32 %v9562_v55, %v6571_v54 }
  0xfd   :  { %2165 = vmatpush.bf16.msrb.mxu2 %v7368_v10  ;;  %v7036_v10 = vor.u32 %v9678_v5, %v7035_v4  ;;  %v6971_v62 = vld [vmem:[#allocation4 + $0x348] sm:$0xf]  ;;  %v9662_v63 = vld [vmem:[#allocation4 + $0x354] sm:$0xf0] }
  0xfe   :  { %v6555_v5 = vld [vmem:[#allocation4 + $0x8] sm:$0xf] }
  0xff   :  { %2178 = vmatpush.bf16.msrb.mxu3 %v7496_v11  ;;  %2141 = vmatpush.bf16.msra.mxu0 %v7080_v16  ;;  %v6619_v11 = vld [vmem:[#allocation4 + $0x88] sm:$0xf] }
 0x100   :  { %2150 = vmatpush.bf16.msra.mxu1 %v7272_v17  ;;  %v7019_v16 = vld [vmem:[#allocation4 + $0x3a8] sm:$0xf]  ;;  %v9674_v17 = vld [vmem:[#allocation4 + $0x3b4] sm:$0xf0]  ;;  %v6620_v23 = vor.u32 %v9574_v12, %v6619_v11 }
 0x101   :  { %2166 = vmatpush.bf16.msrb.mxu2 %v7352_v27  ;;  %v9618_v27 = vld [vmem:[#allocation4 + $0x1f4] sm:$0xf0]  ;;  %v7020_v29 = vor.u32 %v9674_v17, %v7019_v16  ;;  %v6731_v16 = vld [vmem:[#allocation4 + $0x168] sm:$0xf] }
 0x102   :  { %v9626_v11 = vld [vmem:[#allocation4 + $0x234] sm:$0xf0]  ;;  %v7131_v55 = vld [vmem:[#allocation4 + $0x488] sm:$0xf] }
 0x103   :  { %2179 = vmatpush.bf16.msrb.mxu3 %v7480_v28  ;;  %2142 = vmatpush.bf16.msra.mxu0 %v7064_v34  ;;  %v6892_v28 = vor.u32 %v9642_v15, %v6891_v13  ;;  %v6796_v34 = vor.u32 %v9618_v27, %v6795_v24  ;;  %v6955_v13 = vld [vmem:[#allocation4 + $0x328] sm:$0xf]  ;;  %v6556_v15 = vor.u32 %v9558_v6, %v6555_v5  ;;  %v9602_v17 = vld [vmem:[#allocation4 + $0x174] sm:$0xf0] }
 0x104   :  { %2151 = vmatpush.bf16.msra.mxu1 %v7256_v35  ;;  %v7003_v35 = vld [vmem:[#allocation4 + $0x388] sm:$0xf]  ;;  %v9710_v24 = vld [vmem:[#allocation4 + $0x4d4] sm:$0xf0] }
 0x105   :  { %2167 = vmatpush.bf16.msrb.mxu2 %v7336_v40  ;;  %v6876_v40 = vor.u32 %v9638_v33, %v6875_v32  ;;  %v6811_v27 = vld [vmem:[#allocation4 + $0x208] sm:$0xf]  ;;  %v9778_v33 = vld [vmem:[#allocation4 + $0x6f4] sm:$0xf0] }
 0x106   :  { %2143 = vmatmul.bf16.vlgmr.msra.gmra.mxu0 %v10727_v52  ;;  %v7435_v32 = vld [vmem:[#allocation4 + $0x6e8] sm:$0xf]  ;;  %v9746_v6 = vld [vmem:[#allocation4 + $0x5f4] sm:$0xf0] }
 0x107   :  { %2187 = vmatpush.bf16.msrb.mxu0 %v6668_v36  ;;  %2180 = vmatpush.bf16.msrb.mxu3 %v7464_v41  ;;  %v9670_v36 = vld [vmem:[#allocation4 + $0x394] sm:$0xf0]  ;;  %v6587_v41 = vld [vmem:[#allocation4 + $0x48] sm:$0xf] }
 0x108   :  { %2152 = vmatpush.bf16.msra.mxu1 %v7240_v47  ;;  %v7004_v43 = vor.u32 %v9670_v36, %v7003_v35  ;;  %v9666_v47 = vld [vmem:[#allocation4 + $0x374] sm:$0xf0]  ;;  %v6588_v48 = vor.u32 %v9566_v42, %v6587_v41  ;;  %v6715_v36 = vld [vmem:[#allocation4 + $0x148] sm:$0xf]  ;;  %v7436_v41 = vor.u32 %v9778_v33, %v7435_v32 }
 0x109   :  { %2168 = vmatpush.bf16.msrb.mxu2 %v7320_v57  ;;  %v6988_v57 = vor.u32 %v9666_v47, %v6987_v46  ;;  %v9810_v35 = vld [vmem:[#allocation4 + $0x7f4] sm:$0xf0]  ;;  %v7147_v42 = vld [vmem:[#allocation4 + $0x4a8] sm:$0xf] }
 0x10a   :  { %v9774_v46 = vld [vmem:[#allocation4 + $0x6d4] sm:$0xf0]  ;;  %v7547_v47 = vld [vmem:[#allocation4 + $0x7c8] sm:$0xf] }
 0x10b   :  { %2188 = vmatpush.bf16.msrb.mxu0 %v6652_v53  ;;  %2181 = vmatpush.bf16.msrb.mxu3 %v7448_v58  ;;  %v6860_v53 = vor.u32 %v9634_v50, %v6859_v44  ;;  %v6843_v58 = vld [vmem:[#allocation4 + $0x248] sm:$0xf]  ;;  %v9794_v32 = vld [vmem:[#allocation4 + $0x774] sm:$0xf0] }
 0x10c   :  { %2153 = vmatpush.bf16.msra.mxu1 %v7224_v1  ;;  %2169 = vmatmul.bf16.vlgmr.msrb.gmra.mxu2 %v10733_v25  ;;  %v6747_v1 = vld [vmem:[#allocation4 + $0x188] sm:$0xf] }
 0x10d   :  { %2213 = vmatpush.bf16.msra.mxu2 %v6924_v59  ;;  %v9630_v59 = vld [vmem:[#allocation4 + $0x254] sm:$0xf0]  ;;  %v6748_v12 = vor.u32 %v9606_v3, %v6747_v1  ;;  %v6683_v1 = vld [vmem:[#allocation4 + $0x108] sm:$0xf] }
 0x10e   :  { %2182 = vmatmul.bf16.vlgmr.msrb.gmra.mxu3 %v10735_v26  ;;  %v6844_v4 = vor.u32 %v9630_v59, %v6843_v58  ;;  %v9590_v3 = vld [vmem:[#allocation4 + $0x114] sm:$0xf0]  ;;  %v7307_v5 = vld [vmem:[#allocation4 + $0x5e8] sm:$0xf] }
 0x10f   :  { %2226 = vmatpush.bf16.msra.mxu3 %v7052_v61  ;;  %2189 = vmatpush.bf16.msrb.mxu0 %v6636_v8  ;;  %v6764_v61 = vor.u32 %v9610_v51, %v6763_v49  ;;  %v6972_v8 = vor.u32 %v9662_v63, %v6971_v62  ;;  %v6699_v49 = vld [vmem:[#allocation4 + $0x128] sm:$0xf]  ;;  %v9594_v51 = vld [vmem:[#allocation4 + $0x134] sm:$0xf0] }
 0x110   :  { %2154 = vmatpush.bf16.msra.mxu1 %v7208_v14  ;;  %v9658_v14 = vld [vmem:[#allocation4 + $0x334] sm:$0xf0]  ;;  %v6700_v59 = vor.u32 %v9594_v51, %v6699_v49  ;;  %v7531_v63 = vld [vmem:[#allocation4 + $0x7a8] sm:$0xf]  ;;  %v9584_v51 = vld [vmem:[#allocation4 + $0xec] sm:$0xf] }
 0x111   :  { %2214 = vmatpush.bf16.msra.mxu2 %v6908_v9  ;;  %v9714_v9 = vld [vmem:[#allocation4 + $0x4f4] sm:$0xf0] }
 0x112   :  { %v7180_v21 = vor.u32 %v9714_v9, %v7179_v7  ;;  %v9770_v62 = vld [vmem:[#allocation4 + $0x6b4] sm:$0xf0] }
 0x113   :  { %2227 = vmatpush.bf16.msra.mxu3 %v7036_v10  ;;  %2190 = vmatpush.bf16.msrb.mxu0 %v6620_v23  ;;  %v6827_v10 = vld [vmem:[#allocation4 + $0x228] sm:$0xf]  ;;  %v9698_v9 = vld [vmem:[#allocation4 + $0x474] sm:$0xf0] }
 0x114   :  { %2155 = vmatpush.bf16.msra.mxu1 %v7192_v20  ;;  %v6828_v22 = vor.u32 %v9626_v11, %v6827_v10  ;;  %v7163_v23 = vld [vmem:[#allocation4 + $0x4c8] sm:$0xf]  ;;  %v6732_v20 = vor.u32 %v9602_v17, %v6731_v16  ;;  %v6684_v11 = vor.u32 %v9590_v3, %v6683_v1  ;;  %v9798_v16 = vld [vmem:[#allocation4 + $0x794] sm:$0xf0] }
 0x115   :  { %2215 = vmatpush.bf16.msra.mxu2 %v6892_v28  ;;  %v6956_v28 = vor.u32 %v9658_v14, %v6955_v13  ;;  %v7164_v38 = vor.u32 %v9710_v24, %v7163_v23  ;;  %v9766_v13 = vld [vmem:[#allocation4 + $0x694] sm:$0xf0]  ;;  %v7308_v14 = vor.u32 %v9746_v6, %v7307_v5  ;;  %v7099_v24 = vld [vmem:[#allocation4 + $0x448] sm:$0xf]  ;;  %v6653_v5 = vld [vmem:[#allocation4 + $0xd8] sm:$0xf0] }
 0x116   :  { %v9686_v49 = vld [vmem:[#allocation4 + $0x414] sm:$0xf0]  ;;  %v7323_v6 = vld [vmem:[#allocation4 + $0x608] sm:$0xf] }
 0x117   :  { %2228 = vmatpush.bf16.msra.mxu3 %v7020_v29  ;;  %2191 = vmatpush.bf16.msrb.mxu0 %v6604_v37  ;;  %v9622_v29 = vld [vmem:[#allocation4 + $0x214] sm:$0xf0] }
 0x118   :  { %2200 = vmatpush.bf16.msrb.mxu1 %v6796_v34  ;;  %v7563_v34 = vld [vmem:[#allocation4 + $0x7e8] sm:$0xf]  ;;  %v9598_v37 = vld [vmem:[#allocation4 + $0x154] sm:$0xf0]  ;;  %v6812_v39 = vor.u32 %v9622_v29, %v6811_v27 }
 0x119   :  { %2156 = vmatmul.bf16.vlgmr.msra.gmra.mxu1 %v10740_v2  ;;  %2216 = vmatpush.bf16.msra.mxu2 %v6876_v40  ;;  %v6940_v40 = vor.u32 %v9654_v31, %v6939_v30  ;;  %v7564_v44 = vor.u32 %v9810_v35, %v7563_v34  ;;  %v6716_v50 = vor.u32 %v9598_v37, %v6715_v36  ;;  %v9694_v27 = vld [vmem:[#allocation4 + $0x454] sm:$0xf0]  ;;  %v7371_v29 = vld [vmem:[#allocation4 + $0x668] sm:$0xf] }
 0x11a   :  { %v9762_v30 = vld [vmem:[#allocation4 + $0x674] sm:$0xf0]  ;;  %v7100_v33 = vor.u32 %v9694_v27, %v7099_v24  ;;  %v7275_v34 = vld [vmem:[#allocation4 + $0x5a8] sm:$0xf]  ;;  %v9576_v27 = vld [vmem:[#allocation4 + $0xac] sm:$0xf] }
 0x11b   :  { %2229 = vmatpush.bf16.msra.mxu3 %v7004_v43  ;;  %2192 = vmatpush.bf16.msrb.mxu0 %v6588_v48  ;;  %v9706_v43 = vld [vmem:[#allocation4 + $0x4b4] sm:$0xf0]  ;;  %v7372_v36 = vor.u32 %v9762_v30, %v7371_v29  ;;  %v7083_v37 = vld [vmem:[#allocation4 + $0x428] sm:$0xf] }
 0x11c   :  { %2201 = vmatpush.bf16.msrb.mxu1 %v6780_v45  ;;  %v7419_v45 = vld [vmem:[#allocation4 + $0x6c8] sm:$0xf]  ;;  %v9806_v48 = vld [vmem:[#allocation4 + $0x7d4] sm:$0xf0] }
 0x11d   :  { %2217 = vmatpush.bf16.msra.mxu2 %v6860_v53  ;;  %v7148_v53 = vor.u32 %v9706_v43, %v7147_v42  ;;  %v7420_v54 = vor.u32 %v9774_v46, %v7419_v45  ;;  %v7548_v58 = vor.u32 %v9806_v48, %v7547_v47  ;;  %v9738_v35 = vld [vmem:[#allocation4 + $0x5b4] sm:$0xf0]  ;;  %v7483_v43 = vld [vmem:[#allocation4 + $0x748] sm:$0xf] }
 0x11e   :  { %v7276_v42 = vor.u32 %v9738_v35, %v7275_v34  ;;  %v7259_v45 = vld [vmem:[#allocation4 + $0x588] sm:$0xf]  ;;  %v9734_v46 = vld [vmem:[#allocation4 + $0x594] sm:$0xf0] }
 0x11f   :  { %2230 = vmatpush.bf16.msra.mxu3 %v6988_v57  ;;  %2193 = vmatpush.bf16.msrb.mxu0 %v6572_v0  ;;  %v9702_v57 = vld [vmem:[#allocation4 + $0x494] sm:$0xf0]  ;;  %v7067_v48 = vld [vmem:[#allocation4 + $0x408] sm:$0xf] }
 0x120   :  { %2202 = vmatpush.bf16.msrb.mxu1 %v6764_v61  ;;  %v7403_v61 = vld [vmem:[#allocation4 + $0x6a8] sm:$0xf]  ;;  %v9802_v0 = vld [vmem:[#allocation4 + $0x7b4] sm:$0xf0] }
 0x121   :  { %2218 = vmatpush.bf16.msra.mxu2 %v6844_v4  ;;  %v7132_v4 = vor.u32 %v9702_v57, %v7131_v55  ;;  %v7404_v7 = vor.u32 %v9770_v62, %v7403_v61  ;;  %v7532_v10 = vor.u32 %v9802_v0, %v7531_v63  ;;  %v7339_v55 = vld [vmem:[#allocation4 + $0x628] sm:$0xf]  ;;  %v9754_v57 = vld [vmem:[#allocation4 + $0x634] sm:$0xf0]  ;;  %v7068_v62 = vor.u32 %v9686_v49, %v7067_v48  ;;  %v9616_v49 = vld [vmem:[#allocation4 + $0x1ec] sm:$0xf] }
 0x122   :  { %v9786_v61 = vld [vmem:[#allocation4 + $0x734] sm:$0xf0]  ;;  %v7243_v63 = vld [vmem:[#allocation4 + $0x568] sm:$0xf]  ;;  %v7340_v3 = vor.u32 %v9754_v57, %v7339_v55  ;;  %v6605_v55 = vld [vmem:[#allocation4 + $0x78] sm:$0xf0] }
 0x123   :  { %2231 = vmatpush.bf16.msra.mxu3 %v6972_v8  ;;  %2194 = vmatpush.bf16.msrb.mxu0 %v6556_v15  ;;  %v7115_v8 = vld [vmem:[#allocation4 + $0x468] sm:$0xf]  ;;  %v9730_v0 = vld [vmem:[#allocation4 + $0x574] sm:$0xf0] }
 0x124   :  { %2203 = vmatpush.bf16.msrb.mxu1 %v6748_v12  ;;  %v7387_v12 = vld [vmem:[#allocation4 + $0x688] sm:$0xf]  ;;  %v7116_v17 = vor.u32 %v9698_v9, %v7115_v8  ;;  %v9750_v8 = vld [vmem:[#allocation4 + $0x614] sm:$0xf0] }
 0x125   :  { %2219 = vmatpush.bf16.msra.mxu2 %v6828_v22  ;;  %v7515_v15 = vld [vmem:[#allocation4 + $0x788] sm:$0xf]  ;;  %v9742_v22 = vld [vmem:[#allocation4 + $0x5d4] sm:$0xf0]  ;;  %v7388_v23 = vor.u32 %v9766_v13, %v7387_v12  ;;  %v9648_v12 = vld [vmem:[#allocation4 + $0x2ec] sm:$0xf] }
 0x126   :  { %2195 = vmatmul.bf16.vlgmr.msrb.gmra.mxu0 %v10714_v60  ;;  %v7451_v9 = vld [vmem:[#allocation4 + $0x708] sm:$0xf]  ;;  %v6925_v13 = vld [vmem:[#allocation4 + $0x2f8] sm:$0xf0]  ;;  %v9722_v35 = vld [vmem:[#allocation4 + $0x534] sm:$0xf0] }
 0x127   :  { %2239 = vmatpush.bf16.msra.mxu0 %v7180_v21  ;;  %2232 = vmatpush.bf16.msra.mxu3 %v6956_v28  ;;  %v7291_v21 = vld [vmem:[#allocation4 + $0x5c8] sm:$0xf]  ;;  %v7516_v28 = vor.u32 %v9798_v16, %v7515_v15  ;;  %v7053_v15 = vld [vmem:[#allocation4 + $0x3f8] sm:$0xf0]  ;;  %v6928_v24 = vor.u32 %v9648_v12, %v6925_v13  ;;  %v9664_v13 = vld [vmem:[#allocation4 + $0x36c] sm:$0xf] }
 0x128   :  { %2204 = vmatpush.bf16.msrb.mxu1 %v6732_v20  ;;  %v7292_v31 = vor.u32 %v9742_v22, %v7291_v21  ;;  %v7499_v20 = vld [vmem:[#allocation4 + $0x768] sm:$0xf]  ;;  %v7324_v22 = vor.u32 %v9750_v8, %v7323_v6  ;;  %v9564_v6 = vld [vmem:[#allocation4 + $0x4c] sm:$0xf] }
 0x129   :  { %2220 = vmatpush.bf16.msra.mxu2 %v6812_v39  ;;  %v7500_v39 = vor.u32 %v9794_v32, %v7499_v20  ;;  %v7227_v16 = vld [vmem:[#allocation4 + $0x548] sm:$0xf]  ;;  %v6909_v20 = vld [vmem:[#allocation4 + $0x2d8] sm:$0xf0]  ;;  %v9676_v32 = vld [vmem:[#allocation4 + $0x3cc] sm:$0xf] }
 0x12a   :  { %v7211_v34 = vld [vmem:[#allocation4 + $0x528] sm:$0xf] }
 0x12b   :  { %2240 = vmatpush.bf16.msra.mxu0 %v7164_v38  ;;  %2233 = vmatpush.bf16.msra.mxu3 %v6940_v40  ;;  %v9690_v38 = vld [vmem:[#allocation4 + $0x434] sm:$0xf0]  ;;  %v7355_v40 = vld [vmem:[#allocation4 + $0x648] sm:$0xf] }
 0x12c   :  { %2205 = vmatpush.bf16.msrb.mxu1 %v6716_v50  ;;  %2221 = vmatmul.bf16.vlgmr.msra.gmra.mxu2 %v10718_v18  ;;  %v7084_v50 = vor.u32 %v9690_v38, %v7083_v37  ;;  %v9572_v38 = vld [vmem:[#allocation4 + $0x8c] sm:$0xf] }
 0x12d   :  { %2265 = vmatpush.bf16.msrb.mxu2 %v7436_v41  ;;  %v9758_v41 = vld [vmem:[#allocation4 + $0x654] sm:$0xf0] }
 0x12e   :  { %2234 = vmatmul.bf16.vlgmr.msra.gmra.mxu3 %v10720_v19  ;;  %v7356_v47 = vor.u32 %v9758_v41, %v7355_v40 }
 0x12f   :  { %2278 = vmatpush.bf16.msrb.mxu3 %v7564_v44  ;;  %2241 = vmatpush.bf16.msra.mxu0 %v7148_v53  ;;  %v9790_v44 = vld [vmem:[#allocation4 + $0x754] sm:$0xf0] }
 0x130   :  { %2206 = vmatpush.bf16.msrb.mxu1 %v6700_v59  ;;  %v7484_v53 = vor.u32 %v9790_v44, %v7483_v43  ;;  %v7467_v59 = vld [vmem:[#allocation4 + $0x728] sm:$0xf]  ;;  %v9640_v43 = vld [vmem:[#allocation4 + $0x2ac] sm:$0xf]  ;;  %v6893_v44 = vld [vmem:[#allocation4 + $0x2b8] sm:$0xf0] }
 0x131   :  { %2266 = vmatpush.bf16.msrb.mxu2 %v7420_v54  ;;  %v6669_v54 = vld [vmem:[#allocation4 + $0xf8] sm:$0xf0] }
 0x132   :  { %v6672_v1 = vor.u32 %v9584_v51, %v6669_v54  ;;  %v6797_v51 = vld [vmem:[#allocation4 + $0x1f8] sm:$0xf0]  ;;  %v9568_v54 = vld [vmem:[#allocation4 + $0x6c] sm:$0xf] }
 0x133   :  { %2279 = vmatpush.bf16.msrb.mxu3 %v7548_v58  ;;  %2242 = vmatpush.bf16.msra.mxu0 %v7132_v4  ;;  %v7260_v58 = vor.u32 %v9734_v46, %v7259_v45  ;;  %v9580_v4 = vld [vmem:[#allocation4 + $0xcc] sm:$0xf]  ;;  %v7021_v45 = vld [vmem:[#allocation4 + $0x3b8] sm:$0xf0]  ;;  %v7195_v46 = vld [vmem:[#allocation4 + $0x508] sm:$0xf] }
 0x134   :  { %2207 = vmatpush.bf16.msrb.mxu1 %v6684_v11  ;;  %v7244_v11 = vor.u32 %v9730_v0, %v7243_v63  ;;  %v6656_v21 = vor.u32 %v9580_v4, %v6653_v5  ;;  %v9668_v63 = vld [vmem:[#allocation4 + $0x38c] sm:$0xf]  ;;  %v7005_v0 = vld [vmem:[#allocation4 + $0x398] sm:$0xf0] }
 0x135   :  { %2267 = vmatpush.bf16.msrb.mxu2 %v7404_v7  ;;  %v7468_v7 = vor.u32 %v9786_v61, %v7467_v59  ;;  %v9636_v59 = vld [vmem:[#allocation4 + $0x28c] sm:$0xf]  ;;  %v6877_v61 = vld [vmem:[#allocation4 + $0x298] sm:$0xf0] }
 0x136   :  { %v6781_v4 = vld [vmem:[#allocation4 + $0x1d8] sm:$0xf0]  ;;  %v6880_v5 = vor.u32 %v9636_v59, %v6877_v61  ;;  %v9620_v59 = vld [vmem:[#allocation4 + $0x20c] sm:$0xf] }
 0x137   :  { %2280 = vmatpush.bf16.msrb.mxu3 %v7532_v10  ;;  %2243 = vmatpush.bf16.msra.mxu0 %v7116_v17  ;;  %v9782_v10 = vld [vmem:[#allocation4 + $0x714] sm:$0xf0] }
 0x138   :  { %2252 = vmatpush.bf16.msra.mxu1 %v7308_v14  ;;  %v9680_v14 = vld [vmem:[#allocation4 + $0x3ec] sm:$0xf]  ;;  %v9726_v17 = vld [vmem:[#allocation4 + $0x554] sm:$0xf0] }
 0x139   :  { %2208 = vmatmul.bf16.vlgmr.msrb.gmra.mxu1 %v10729_v56  ;;  %2268 = vmatpush.bf16.msrb.mxu2 %v7388_v23  ;;  %v7452_v23 = vor.u32 %v9782_v10, %v7451_v9  ;;  %v7056_v29 = vor.u32 %v9680_v14, %v7053_v15  ;;  %v7228_v30 = vor.u32 %v9726_v17, %v7227_v16  ;;  %v9632_v10 = vld [vmem:[#allocation4 + $0x26c] sm:$0xf]  ;;  %v6989_v14 = vld [vmem:[#allocation4 + $0x378] sm:$0xf0] }
 0x13a   :  { %v7008_v9 = vor.u32 %v9668_v63, %v7005_v0  ;;  %v9608_v16 = vld [vmem:[#allocation4 + $0x1ac] sm:$0xf]  ;;  %v6765_v17 = vld [vmem:[#allocation4 + $0x1b8] sm:$0xf0] }
 0x13b   :  { %2281 = vmatpush.bf16.msrb.mxu3 %v7516_v28  ;;  %2244 = vmatpush.bf16.msra.mxu0 %v7100_v33  ;;  %v6637_v28 = vld [vmem:[#allocation4 + $0xb8] sm:$0xf0]  ;;  %v9652_v63 = vld [vmem:[#allocation4 + $0x30c] sm:$0xf] }
 0x13c   :  { %2253 = vmatpush.bf16.msra.mxu1 %v7292_v31  ;;  %v9644_v31 = vld [vmem:[#allocation4 + $0x2cc] sm:$0xf]  ;;  %v7037_v33 = vld [vmem:[#allocation4 + $0x3d8] sm:$0xf0] }
 0x13d   :  { %2269 = vmatpush.bf16.msrb.mxu2 %v7372_v36  ;;  %v6640_v36 = vor.u32 %v9576_v27, %v6637_v28  ;;  %v6912_v37 = vor.u32 %v9644_v31, %v6909_v20  ;;  %v7040_v41 = vor.u32 %v9676_v32, %v7037_v33  ;;  %v9628_v27 = vld [vmem:[#allocation4 + $0x24c] sm:$0xf]  ;;  %v6845_v28 = vld [vmem:[#allocation4 + $0x258] sm:$0xf0]  ;;  %v6768_v31 = vor.u32 %v9608_v16, %v6765_v17 }
 0x13e   :  { %v9660_v20 = vld [vmem:[#allocation4 + $0x34c] sm:$0xf]  ;;  %v6973_v32 = vld [vmem:[#allocation4 + $0x358] sm:$0xf0] }
 0x13f   :  { %2282 = vmatpush.bf16.msrb.mxu3 %v7500_v39  ;;  %2245 = vmatpush.bf16.msra.mxu0 %v7084_v50  ;;  %v6621_v39 = vld [vmem:[#allocation4 + $0x98] sm:$0xf0]  ;;  %v9672_v50 = vld [vmem:[#allocation4 + $0x3ac] sm:$0xf] }
 0x140   :  { %2254 = vmatpush.bf16.msra.mxu1 %v7276_v42  ;;  %v7212_v42 = vor.u32 %v9722_v35, %v7211_v34  ;;  %v6624_v48 = vor.u32 %v9572_v38, %v6621_v39  ;;  %v7024_v57 = vor.u32 %v9672_v50, %v7021_v45  ;;  %v9604_v34 = vld [vmem:[#allocation4 + $0x18c] sm:$0xf]  ;;  %v6749_v35 = vld [vmem:[#allocation4 + $0x198] sm:$0xf0] }
 0x141   :  { %2270 = vmatpush.bf16.msrb.mxu2 %v7356_v47  ;;  %v9718_v47 = vld [vmem:[#allocation4 + $0x514] sm:$0xf0]  ;;  %v6557_v38 = vld [vmem:[#allocation4 + $0x18] sm:$0xf0]  ;;  %v9712_v39 = vld [vmem:[#allocation4 + $0x4ec] sm:$0xf] }
 0x142   :  { %v6941_v0 = vld [vmem:[#allocation4 + $0x318] sm:$0xf0] }
 0x143   :  { %2283 = vmatpush.bf16.msrb.mxu3 %v7484_v53  ;;  %2246 = vmatpush.bf16.msra.mxu0 %v7068_v62  ;;  %v10756_v40 = vpop.f32.mrf.mxu0  ;;  %v6896_v53 = vor.u32 %v9640_v43, %v6893_v44  ;;  %v6800_v62 = vor.u32 %v9616_v49, %v6797_v51  ;;  %v9624_v43 = vld [vmem:[#allocation4 + $0x22c] sm:$0xf]  ;;  %v6829_v44 = vld [vmem:[#allocation4 + $0x238] sm:$0xf0] }
 0x144   :  { %2255 = vmatpush.bf16.msra.mxu1 %v7260_v58  ;;  %v7196_v58 = vor.u32 %v9718_v47, %v7195_v46  ;;  %v6752_v46 = vor.u32 %v9604_v34, %v6749_v35  ;;  %v9656_v47 = vld [vmem:[#allocation4 + $0x32c] sm:$0xf]  ;;  %v7149_v16 = vld [vmem:[#allocation4 + $0x4b8] sm:$0xf0] }
 0x145   :  { %2271 = vmatpush.bf16.msrb.mxu2 %v7340_v3  ;;  %v9612_v3 = vld [vmem:[#allocation4 + $0x1cc] sm:$0xf] }
 0x146   :  { %2247 = vmatmul.bf16.vlgmr.msra.gmra.mxu0 %v10727_v52  ;;  %v6784_v12 = vor.u32 %v9612_v3, %v6781_v4  ;;  %v9600_v51 = vld [vmem:[#allocation4 + $0x16c] sm:$0xf] }
 0x147   :  { %2291 = vmatpush.bf16.msrb.mxu0 %v6672_v1  ;;  %2284 = vmatpush.bf16.msrb.mxu3 %v7468_v7  ;;  %v6608_v1 = vor.u32 %v9568_v54, %v6605_v55  ;;  %v6589_v7 = vld [vmem:[#allocation4 + $0x58] sm:$0xf0]  ;;  %v6832_v55 = vor.u32 %v9624_v43, %v6829_v44  ;;  %v9700_v35 = vld [vmem:[#allocation4 + $0x48c] sm:$0xf] }
 0x148   :  { %2256 = vmatpush.bf16.msra.mxu1 %v7244_v11  ;;  %v6861_v11 = vld [vmem:[#allocation4 + $0x278] sm:$0xf0]  ;;  %v6592_v15 = vor.u32 %v9564_v6, %v6589_v7  ;;  %v9808_v7 = vld [vmem:[#allocation4 + $0x7ec] sm:$0xf] }
 0x149   :  { %2272 = vmatpush.bf16.msrb.mxu2 %v7324_v22  ;;  %v9560_v22 = vld [vmem:[#allocation4 + $0x2c] sm:$0xf]  ;;  %v7437_v6 = vld [vmem:[#allocation4 + $0x6f8] sm:$0xf0] }
 0x14a   :  { %v9800_v43 = vld [vmem:[#allocation4 + $0x7ac] sm:$0xf]  ;;  %v7533_v44 = vld [vmem:[#allocation4 + $0x7b8] sm:$0xf0] }
 0x14b   :  { %2292 = vmatpush.bf16.msrb.mxu0 %v6656_v21  ;;  %2285 = vmatpush.bf16.msrb.mxu3 %v7452_v23  ;;  %v1990_v8 = vpop.f32.mrf.mxu0  ;;  %v6864_v21 = vor.u32 %v9632_v10, %v6861_v11  ;;  %v6573_v23 = vld [vmem:[#allocation4 + $0x38] sm:$0xf0] }
 0x14c   :  { %2257 = vmatpush.bf16.msra.mxu1 %v7228_v30  ;;  %2273 = vmatmul.bf16.vlgmr.msrb.gmra.mxu2 %v10733_v25  ;;  %v6576_v33 = vor.u32 %v9560_v22, %v6573_v23  ;;  %v7565_v8 = vld [vmem:[#allocation4 + $0x7f8] sm:$0xf0] }
 0x14d   :  { %2317 = vmatpush.bf16.msra.mxu2 %v6928_v24  ;;  %v6992_v24 = vor.u32 %v9664_v13, %v6989_v14  ;;  %v6717_v10 = vld [vmem:[#allocation4 + $0x158] sm:$0xf0]  ;;  %v6944_v13 = vor.u32 %v9652_v63, %v6941_v0  ;;  %v7568_v22 = vor.u32 %v9808_v7, %v7565_v8 }
 0x14e   :  { %2286 = vmatmul.bf16.vlgmr.msrb.gmra.mxu3 %v10735_v26  ;;  %v7517_v0 = vld [vmem:[#allocation4 + $0x798] sm:$0xf0] }
 0x14f   :  { %2330 = vmatpush.bf16.msra.mxu3 %v7056_v29  ;;  %2293 = vmatpush.bf16.msrb.mxu0 %v6640_v36  ;;  %v10761_v29 = vpop.f32.mrf.mxu2  ;;  %v6848_v36 = vor.u32 %v9628_v27, %v6845_v28  ;;  %v7421_v27 = vld [vmem:[#allocation4 + $0x6d8] sm:$0xf0]  ;;  %v9804_v28 = vld [vmem:[#allocation4 + $0x7cc] sm:$0xf] }
 0x150   :  { %2258 = vmatpush.bf16.msra.mxu1 %v7212_v42  ;;  %v7181_v42 = vld [vmem:[#allocation4 + $0x4f8] sm:$0xf0] }
 0x151   :  { %2318 = vmatpush.bf16.msra.mxu2 %v6912_v37  ;;  %v10763_v30 = vpop.f32.mrf.mxu3  ;;  %v9556_v37 = vld [vmem:[#allocation4 + $0xc] sm:$0xf]  ;;  %v7184_v54 = vor.u32 %v9712_v39, %v7181_v42  ;;  %v7405_v42 = vld [vmem:[#allocation4 + $0x6b8] sm:$0xf0] }
 0x152   :  { %v6560_v49 = vor.u32 %v9556_v37, %v6557_v38  ;;  %v7101_v7 = vld [vmem:[#allocation4 + $0x458] sm:$0xf0] }
 0x153   :  { %2331 = vmatpush.bf16.msra.mxu3 %v7040_v41  ;;  %2294 = vmatpush.bf16.msrb.mxu0 %v6624_v48  ;;  %v6976_v41 = vor.u32 %v9660_v20, %v6973_v32  ;;  %v10765_v50 = vpop.f32.mrf.mxu1  ;;  %v10767_v45 = vpop.f32.mrf.mxu0  ;;  %v6957_v48 = vld [vmem:[#allocation4 + $0x338] sm:$0xf0]  ;;  %v9592_v20 = vld [vmem:[#allocation4 + $0x12c] sm:$0xf] }
 0x154   :  { %2259 = vmatpush.bf16.msra.mxu1 %v7196_v58  ;;  %v7165_v58 = vld [vmem:[#allocation4 + $0x4d8] sm:$0xf0]  ;;  %v6960_v61 = vor.u32 %v9656_v47, %v6957_v48 }
 0x155   :  { %2319 = vmatpush.bf16.msra.mxu2 %v6896_v53  ;;  %v6733_v53 = vld [vmem:[#allocation4 + $0x178] sm:$0xf0] }
 0x156   :  { %v6736_v4 = vor.u32 %v9600_v51, %v6733_v53  ;;  %v6701_v32 = vld [vmem:[#allocation4 + $0x138] sm:$0xf0] }
 0x157   :  { %2332 = vmatpush.bf16.msra.mxu3 %v7024_v57  ;;  %2295 = vmatpush.bf16.msrb.mxu0 %v6608_v1  ;;  %v9708_v57 = vld [vmem:[#allocation4 + $0x4cc] sm:$0xf]  ;;  %v2016_v1 = vpop.f32.mrf.mxu2  ;;  %v6704_v39 = vor.u32 %v9592_v20, %v6701_v32  ;;  %v6685_v47 = vld [vmem:[#allocation4 + $0x118] sm:$0xf0] }
 0x158   :  { %2304 = vmatpush.bf16.msrb.mxu1 %v6800_v62  ;;  %v6813_v62 = vld [vmem:[#allocation4 + $0x218] sm:$0xf0]  ;;  %v7168_v11 = vor.u32 %v9708_v57, %v7165_v58  ;;  %v9756_v32 = vld [vmem:[#allocation4 + $0x64c] sm:$0xf] }
 0x159   :  { %2260 = vmatmul.bf16.vlgmr.msra.gmra.mxu1 %v10740_v2  ;;  %2320 = vmatpush.bf16.msra.mxu2 %v6880_v5  ;;  %v2029_v3 = vpop.f32.mrf.mxu3  ;;  %v9776_v5 = vld [vmem:[#allocation4 + $0x6ec] sm:$0xf]  ;;  %v7309_v51 = vld [vmem:[#allocation4 + $0x5f8] sm:$0xf0] }
 0x15a   :  { %v7440_v14 = vor.u32 %v9776_v5, %v7437_v6  ;;  %v9740_v3 = vld [vmem:[#allocation4 + $0x5cc] sm:$0xf] }
 0x15b   :  { %2333 = vmatpush.bf16.msra.mxu3 %v7008_v9  ;;  %2296 = vmatpush.bf16.msrb.mxu0 %v6592_v15  ;;  %v9596_v9 = vld [vmem:[#allocation4 + $0x14c] sm:$0xf]  ;;  %v2003_v17 = vpop.f32.mrf.mxu1 }
 0x15c   :  { %2305 = vmatpush.bf16.msrb.mxu1 %v6784_v12  ;;  %v6816_v12 = vor.u32 %v9620_v59, %v6813_v62  ;;  %v9704_v15 = vld [vmem:[#allocation4 + $0x4ac] sm:$0xf]  ;;  %v6720_v23 = vor.u32 %v9596_v9, %v6717_v10  ;;  %v7389_v62 = vld [vmem:[#allocation4 + $0x698] sm:$0xf0] }
 0x15d   :  { %2321 = vmatpush.bf16.msra.mxu2 %v6864_v21  ;;  %v2042_v21 = vpop.f32.mrf.mxu0  ;;  %v9692_v6 = vld [vmem:[#allocation4 + $0x44c] sm:$0xf] }
 0x15e   :  { %v9736_v17 = vld [vmem:[#allocation4 + $0x5ac] sm:$0xf]  ;;  %v7277_v21 = vld [vmem:[#allocation4 + $0x5b8] sm:$0xf0] }
 0x15f   :  { %2334 = vmatpush.bf16.msra.mxu3 %v6992_v24  ;;  %2297 = vmatpush.bf16.msrb.mxu0 %v6576_v33  ;;  %v9772_v24 = vld [vmem:[#allocation4 + $0x6cc] sm:$0xf]  ;;  %v7152_v33 = vor.u32 %v9704_v15, %v7149_v16  ;;  %v7501_v15 = vld [vmem:[#allocation4 + $0x778] sm:$0xf0]  ;;  %v7104_v16 = vor.u32 %v9692_v6, %v7101_v7 }
 0x160   :  { %2306 = vmatpush.bf16.msrb.mxu1 %v6768_v31  ;;  %v7549_v31 = vld [vmem:[#allocation4 + $0x7d8] sm:$0xf0]  ;;  %v7424_v34 = vor.u32 %v9772_v24, %v7421_v27  ;;  %v9688_v24 = vld [vmem:[#allocation4 + $0x42c] sm:$0xf] }
 0x161   :  { %2322 = vmatpush.bf16.msra.mxu2 %v6848_v36  ;;  %v7133_v36 = vld [vmem:[#allocation4 + $0x498] sm:$0xf0]  ;;  %v10772_v37 = vpop.f32.mrf.mxu3  ;;  %v7552_v38 = vor.u32 %v9804_v28, %v7549_v31  ;;  %v9748_v6 = vld [vmem:[#allocation4 + $0x60c] sm:$0xf] }
 0x162   :  { %v7136_v48 = vor.u32 %v9700_v35, %v7133_v36  ;;  %v7085_v27 = vld [vmem:[#allocation4 + $0x438] sm:$0xf0]  ;;  %v9788_v35 = vld [vmem:[#allocation4 + $0x74c] sm:$0xf] }
 0x163   :  { %2335 = vmatpush.bf16.msra.mxu3 %v6976_v41  ;;  %2298 = vmatpush.bf16.msrb.mxu0 %v6560_v49  ;;  %v9768_v41 = vld [vmem:[#allocation4 + $0x6ac] sm:$0xf]  ;;  %v10776_v57 = vpop.f32.mrf.mxu1  ;;  %v7485_v36 = vld [vmem:[#allocation4 + $0x758] sm:$0xf0] }
 0x164   :  { %2307 = vmatpush.bf16.msrb.mxu1 %v6752_v46  ;;  %v9588_v46 = vld [vmem:[#allocation4 + $0x10c] sm:$0xf]  ;;  %v7408_v53 = vor.u32 %v9768_v41, %v7405_v42  ;;  %v7325_v7 = vld [vmem:[#allocation4 + $0x618] sm:$0xf0] }
 0x165   :  { %2323 = vmatpush.bf16.msra.mxu2 %v6832_v55  ;;  %v9744_v49 = vld [vmem:[#allocation4 + $0x5ec] sm:$0xf]  ;;  %v7117_v55 = vld [vmem:[#allocation4 + $0x478] sm:$0xf0]  ;;  %v10778_v58 = vpop.f32.mrf.mxu0  ;;  %v6688_v59 = vor.u32 %v9588_v46, %v6685_v47  ;;  %v7627_v46 = vld [vmem:[#allocation6 + $0x70] sm:$0xf] }
 0x166   :  { %2299 = vmatmul.bf16.vlgmr.msrb.gmra.mxu0 %v10714_v60  ;;  %v10770_v60 = vpop.f32.mrf.mxu2  ;;  %v7312_v63 = vor.u32 %v9744_v49, %v7309_v51  ;;  %v9732_v41 = vld [vmem:[#allocation4 + $0x58c] sm:$0xf]  ;;  %v9826_v49 = vld [vmem:[#allocation6 + $0x74] sm:$0xf0] }
 0x167   :  { %2343 = vmatpush.bf16.msra.mxu0 %v7184_v54  ;;  %2336 = vmatpush.bf16.msra.mxu3 %v6960_v61  ;;  %v9696_v54 = vld [vmem:[#allocation4 + $0x46c] sm:$0xf] }
 0x168   :  { %2308 = vmatpush.bf16.msrb.mxu1 %v6736_v4  ;;  %v9764_v61 = vld [vmem:[#allocation4 + $0x68c] sm:$0xf]  ;;  %v7120_v1 = vor.u32 %v9696_v54, %v7117_v55  ;;  %v7293_v4 = vld [vmem:[#allocation4 + $0x5d8] sm:$0xf0] }
 0x169   :  { %2324 = vmatpush.bf16.msra.mxu2 %v6816_v12  ;;  %v7392_v5 = vor.u32 %v9764_v61, %v7389_v62  ;;  %v2081_v9 = vpop.f32.mrf.mxu3  ;;  %v7373_v12 = vld [vmem:[#allocation4 + $0x678] sm:$0xf0]  ;;  %v9752_v51 = vld [vmem:[#allocation4 + $0x62c] sm:$0xf] }
 0x16a   :  { %v9728_v62 = vld [vmem:[#allocation4 + $0x56c] sm:$0xf] }
 0x16b   :  { %2344 = vmatpush.bf16.msra.mxu0 %v7168_v11  ;;  %2337 = vmatpush.bf16.msra.mxu3 %v6944_v13  ;;  %v9760_v11 = vld [vmem:[#allocation4 + $0x66c] sm:$0xf]  ;;  %v7296_v13 = vor.u32 %v9740_v3, %v7293_v4  ;;  %v2055_v28 = vpop.f32.mrf.mxu1 }
 0x16c   :  { %2309 = vmatpush.bf16.msrb.mxu1 %v6720_v23  ;;  %2325 = vmatmul.bf16.vlgmr.msra.gmra.mxu2 %v10718_v18  ;;  %v7536_v18 = vor.u32 %v9800_v43, %v7533_v44  ;;  %v7376_v23 = vor.u32 %v9760_v11, %v7373_v12  ;;  %v9684_v43 = vld [vmem:[#allocation4 + $0x40c] sm:$0xf]  ;;  %v7069_v44 = vld [vmem:[#allocation4 + $0x418] sm:$0xf0] }
 0x16d   :  { %2369 = vmatpush.bf16.msrb.mxu2 %v7440_v14  ;;  %v9792_v14 = vld [vmem:[#allocation4 + $0x76c] sm:$0xf]  ;;  %v2094_v31 = vpop.f32.mrf.mxu0  ;;  %v7072_v61 = vor.u32 %v9684_v43, %v7069_v44  ;;  %v7453_v11 = vld [vmem:[#allocation4 + $0x718] sm:$0xf0] }
 0x16e   :  { %2338 = vmatmul.bf16.vlgmr.msra.gmra.mxu3 %v10720_v19  ;;  %v9796_v19 = vld [vmem:[#allocation4 + $0x78c] sm:$0xf]  ;;  %v2068_v8 = vpop.f32.mrf.mxu2  ;;  %v7504_v20 = vor.u32 %v9792_v14, %v7501_v15  ;;  %v7229_v14 = vld [vmem:[#allocation4 + $0x558] sm:$0xf0] }
 0x16f   :  { %2382 = vmatpush.bf16.msrb.mxu3 %v7568_v22  ;;  %2345 = vmatpush.bf16.msra.mxu0 %v7152_v33  ;;  %v7520_v10 = vor.u32 %v9796_v19, %v7517_v0  ;;  %v10783_v22 = vld [vmem:[%s11033_s5] sm:$0xf]  ;;  %v7357_v33 = vld [vmem:[#allocation4 + $0x658] sm:$0xf0]  ;;  %v7628_v19 = vor.u32 %v9826_v49, %v7627_v46 }
 0x170   :  { %2310 = vmatpush.bf16.msrb.mxu1 %v6704_v39  ;;  %v7088_v39 = vor.u32 %v9688_v24, %v7085_v27  ;;  %v7360_v42 = vor.u32 %v9756_v32, %v7357_v33  ;;  %v7213_v31 = vld [vmem:[#allocation4 + $0x538] sm:$0xf0]  ;;  %v7603_v32 = vld [vmem:[#allocation6 + $0x40] sm:$0xf]  ;;  %v9820_v33 = vld [vmem:[#allocation6 + $0x44] sm:$0xf0] }
 0x171   :  { %2370 = vmatpush.bf16.msrb.mxu2 %v7424_v34  ;;  %v7280_v34 = vor.u32 %v9736_v17, %v7277_v21  ;;  %v10789_v54 = vpop.f32.mrf.mxu3  ;;  %v7611_v21 = vld [vmem:[#allocation6 + $0x50] sm:$0xf]  ;;  %v692_v43 = vperm.slane %v10783_v22, 1  ;;  %v7683_v49 = vld [vmem:[#allocation6 + $0xe0] sm:$0xf] }
 0x173   :  { %2383 = vmatpush.bf16.msrb.mxu3 %v7552_v38  ;;  %2346 = vmatpush.bf16.msra.mxu0 %v7136_v48  ;;  %v691_v38 = vperm.slane %v10783_v22, 0  ;;  %v7488_v48 = vor.u32 %v9788_v35, %v7485_v36 }
 0x174   :  { %2311 = vmatpush.bf16.msrb.mxu1 %v6688_v59  ;;  %v7469_v59 = vld [vmem:[#allocation4 + $0x738] sm:$0xf0] }
 0x175   :  { %2371 = vmatpush.bf16.msrb.mxu2 %v7408_v53  ;;  %v7341_v53 = vld [vmem:[#allocation4 + $0x638] sm:$0xf0]  ;;  %v1989_v3 = vadd.f32 %v10756_v40, %v691_v38 }
 0x176   :  { %v10787_v47 = vpop.f32.mrf.mxu2  ;;  %v7344_v0 = vor.u32 %v9752_v51, %v7341_v53  ;;  %v2105_v8 = vpop.f32.mrf.mxu1  ;;  %v7197_v38 = vld [vmem:[#allocation4 + $0x518] sm:$0xf0]  ;;  %v9840_v51 = vld [vmem:[#allocation6 + $0xe4] sm:$0xf0]  ;;  %v7587_v53 = vld [vmem:[#allocation6 + $0x20] sm:$0xf] }
 0x177   :  { %2384 = vmatpush.bf16.msrb.mxu3 %v7536_v18  ;;  %2347 = vmatpush.bf16.msra.mxu0 %v7120_v1  ;;  %v9784_v18 = vld [vmem:[#allocation4 + $0x72c] sm:$0xf]  ;;  %v7619_v1 = vld [vmem:[#allocation6 + $0x60] sm:$0xf]  ;;  %v2002_v12 = vadd.f32 %v10765_v50, %v1989_v3  ;;  %v7755_v3 = vld [vmem:[#allocation6 + $0x170] sm:$0xf] }
 0x178   :  { %2356 = vmatpush.bf16.msra.mxu1 %v7312_v63  ;;  %v7245_v63 = vld [vmem:[#allocation4 + $0x578] sm:$0xf0]  ;;  %v7472_v4 = vor.u32 %v9784_v18, %v7469_v59  ;;  %v9720_v50 = vld [vmem:[#allocation4 + $0x52c] sm:$0xf]  ;;  %v2093_v18 = vadd.f32 %v10778_v58, %v692_v43  ;;  %v7684_v59 = vor.u32 %v9840_v51, %v7683_v49  ;;  %v9821_v43 = vld [vmem:[#allocation6 + $0x54] sm:$0xf] }
 0x179   :  { %2312 = vmatmul.bf16.vlgmr.msrb.gmra.mxu1 %v10729_v56  ;;  %2372 = vmatpush.bf16.msrb.mxu2 %v7392_v5  ;;  %v7261_v56 = vld [vmem:[#allocation4 + $0x598] sm:$0xf0]  ;;  %v9824_v5 = vld [vmem:[#allocation6 + $0x64] sm:$0xf0]  ;;  %v7248_v9 = vor.u32 %v9728_v62, %v7245_v63  ;;  %v2133_v24 = vpop.f32.mrf.mxu3  ;;  %v2015_v28 = vadd.f32 %v10761_v29, %v2002_v12  ;;  %v7216_v35 = vor.u32 %v9720_v50, %v7213_v31  ;;  %v7579_v63 = vld [vmem:[#allocation6 + $0x10] sm:$0xf] }
 0x17a   :  { %v7264_v55 = vor.u32 %v9732_v41, %v7261_v56  ;;  %v7620_v15 = vor.u32 %v9824_v5, %v7619_v1  ;;  %v7604_v29 = vor.u32 %v9820_v33, %v7603_v32  ;;  %v9842_v41 = vld [vmem:[#allocation6 + $0xf4] sm:$0xf0]  ;;  %v7595_v56 = vld [vmem:[#allocation6 + $0x30] sm:$0xf]  ;;  %v7747_v12 = vld [vmem:[#allocation6 + $0x160] sm:$0xf] }
 0x17b   :  { %2385 = vmatpush.bf16.msrb.mxu3 %v7520_v10  ;;  %2348 = vmatpush.bf16.msra.mxu0 %v7104_v16  ;;  %v9780_v10 = vld [vmem:[#allocation4 + $0x70c] sm:$0xf]  ;;  %v7328_v16 = vor.u32 %v9748_v6, %v7325_v7  ;;  %v2028_v36 = vadd.f32 %v10763_v30, %v2015_v28  ;;  %v9814_v1 = vld [vmem:[#allocation6 + $0x14] sm:$0xf0]  ;;  %v9823_v32 = vld [vmem:[#allocation6 + $0x64] sm:$0xf] }
 0x17c   :  { %2357 = vmatpush.bf16.msra.mxu1 %v7296_v13  ;;  %v9724_v13 = vld [vmem:[#allocation4 + $0x54c] sm:$0xf]  ;;  %v7456_v17 = vor.u32 %v9780_v10, %v7453_v11  ;;  %v7580_v7 = vor.u32 %v9814_v1, %v7579_v63  ;;  %v9836_v10 = vld [vmem:[#allocation6 + $0xc4] sm:$0xf0]  ;;  %v9834_v24 = vld [vmem:[#allocation6 + $0xb4] sm:$0xf0] }
 0x17d   :  { %2373 = vmatpush.bf16.msrb.mxu2 %v7376_v23  ;;  %v9822_v23 = vld [vmem:[#allocation6 + $0x54] sm:$0xf0]  ;;  %v7232_v27 = vor.u32 %v9724_v13, %v7229_v14  ;;  %v7621_v33 = vld [vmem:[#allocation6 + $0x68] sm:$0xf0]  ;;  %v7723_v51 = vld [vmem:[#allocation6 + $0x130] sm:$0xf] }
 0x17e   :  { %v2120_v40 = vpop.f32.mrf.mxu2  ;;  %v9854_v50 = vld [vmem:[#allocation6 + $0x154] sm:$0xf0] }
 0x17f   :  { %2386 = vmatpush.bf16.msrb.mxu3 %v7504_v20  ;;  %2349 = vmatpush.bf16.msra.mxu0 %v7088_v39  ;;  %v7612_v20 = vor.u32 %v9822_v23, %v7611_v21  ;;  %v7691_v39 = vld [vmem:[#allocation6 + $0xf0] sm:$0xf]  ;;  %v9830_v49 = vld [vmem:[#allocation6 + $0x94] sm:$0xf0] }
 0x180   :  { %2358 = vmatpush.bf16.msra.mxu1 %v7280_v34  ;;  %v2107_v34 = vpop.f32.mrf.mxu1  ;;  %v7692_v30 = vor.u32 %v9842_v41, %v7691_v39  ;;  %v7659_v23 = vld [vmem:[#allocation6 + $0xb0] sm:$0xf]  ;;  %v7731_v39 = vld [vmem:[#allocation6 + $0x140] sm:$0xf]  ;;  %v9852_v41 = vld [vmem:[#allocation6 + $0x144] sm:$0xf0] }
 0x181   :  { %2374 = vmatpush.bf16.msrb.mxu2 %v7360_v42  ;;  %v9818_v42 = vld [vmem:[#allocation6 + $0x34] sm:$0xf0] }
 0x183   :  { %2387 = vmatpush.bf16.msrb.mxu3 %v7488_v48  ;;  %2350 = vmatpush.bf16.msra.mxu0 %v7072_v61  ;;  %v2144_v44 = vpop.f32.mrf.mxu0  ;;  %v2041_v48 = vadd.f32 %v10767_v45, %v2028_v36  ;;  %v2106_v61 = vadd.f32 %v2105_v8, %v2093_v18  ;;  %v9838_v45 = vld [vmem:[#allocation6 + $0xd4] sm:$0xf0]  ;;  %v7571_v8 = vld [vmem:[#allocation6] sm:$0xf] }
 0x184   :  { %2359 = vmatpush.bf16.msra.mxu1 %v7264_v55  ;;  %v9816_v55 = vld [vmem:[#allocation6 + $0x24] sm:$0xf0] }
 0x185   :  { %2375 = vmatpush.bf16.msrb.mxu2 %v7344_v0  ;;  %v7588_v62 = vor.u32 %v9816_v55, %v7587_v53  ;;  %v2119_v6 = vadd.f32 %v10787_v47, %v2106_v61  ;;  %v7605_v61 = vld [vmem:[#allocation6 + $0x48] sm:$0xf0] }
 0x186   :  { %2351 = vmatmul.bf16.vlgmr.msra.gmra.mxu0 %v10727_v52  ;;  %v9716_v52 = vld [vmem:[#allocation4 + $0x50c] sm:$0xf] }
 0x187   :  { %2793 = vmatpush.bf16.msrb.mxu0 %v7628_v19  ;;  %2388 = vmatpush.bf16.msrb.mxu3 %v7472_v4  ;;  %v7200_v46 = vor.u32 %v9716_v52, %v7197_v38  ;;  %v7675_v19 = vld [vmem:[#allocation6 + $0xd0] sm:$0xf]  ;;  %v2132_v47 = vadd.f32 %v10789_v54, %v2119_v6  ;;  %v7651_v52 = vld [vmem:[#allocation6 + $0xa0] sm:$0xf]  ;;  %v9832_v54 = vld [vmem:[#allocation6 + $0xa4] sm:$0xf0] }
 0x188   :  { %2360 = vmatpush.bf16.msra.mxu1 %v7248_v9  ;;  %v7676_v58 = vor.u32 %v9838_v45, %v7675_v19  ;;  %v7667_v9 = vld [vmem:[#allocation6 + $0xc0] sm:$0xf]  ;;  %v9828_v45 = vld [vmem:[#allocation6 + $0x84] sm:$0xf0] }
 0x189   :  { %2376 = vmatpush.bf16.msrb.mxu2 %v7328_v16  ;;  %v7629_v16 = vld [vmem:[#allocation6 + $0x78] sm:$0xf0]  ;;  %v2145_v31 = vadd.f32 %v2144_v44, %v2132_v47  ;;  %v7635_v19 = vld [vmem:[#allocation6 + $0x80] sm:$0xf]  ;;  %v9813_v47 = vld [vmem:[#allocation6 + $0x14] sm:$0xf] }
 0x18a   :  { %v7613_v44 = vld [vmem:[#allocation6 + $0x58] sm:$0xf0] }
 0x18b   :  { %2794 = vmatpush.bf16.msrb.mxu0 %v7620_v15  ;;  %2389 = vmatpush.bf16.msrb.mxu3 %v7456_v17  ;;  %v2146_v4 = vpop.f32.mrf.mxu0  ;;  %v9825_v15 = vld [vmem:[#allocation6 + $0x74] sm:$0xf]  ;;  %v7668_v17 = vor.u32 %v9836_v10, %v7667_v9  ;;  %v7616_v53 = vor.u32 %v9821_v43, %v7613_v44 }
 0x18c   :  { %2361 = vmatpush.bf16.msra.mxu1 %v7232_v27  ;;  %2377 = vmatmul.bf16.vlgmr.msrb.gmra.mxu2 %v10733_v25  ;;  %v7596_v25 = vor.u32 %v9818_v42, %v7595_v56  ;;  %v7632_v28 = vor.u32 %v9825_v15, %v7629_v16  ;;  %v9848_v4 = vld [vmem:[#allocation6 + $0x124] sm:$0xf0]  ;;  %v9815_v15 = vld [vmem:[#allocation6 + $0x24] sm:$0xf]  ;;  %v7589_v16 = vld [vmem:[#allocation6 + $0x28] sm:$0xf0] }
 0x18e   :  { %2390 = vmatmul.bf16.vlgmr.msrb.gmra.mxu3 %v10735_v26  ;;  %v2054_v26 = vadd.f32 %v10776_v57, %v2041_v48  ;;  %v9858_v57 = vld [vmem:[#allocation6 + $0x174] sm:$0xf0]  ;;  %v7652_v48 = vor.u32 %v9832_v54, %v7651_v52  ;;  %v9835_v52 = vld [vmem:[#allocation6 + $0xc4] sm:$0xf]  ;;  %v7669_v54 = vld [vmem:[#allocation6 + $0xc8] sm:$0xf0] }
 0x18f   :  { %2795 = vmatpush.bf16.msrb.mxu0 %v7612_v20  ;;  %v7756_v5 = vor.u32 %v9858_v57, %v7755_v3  ;;  %v2170_v13 = vpop.f32.mrf.mxu2  ;;  %v7693_v3 = vld [vmem:[#allocation6 + $0xf8] sm:$0xf0]  ;;  %v7715_v57 = vld [vmem:[#allocation6 + $0x120] sm:$0xf]  ;;  %v7672_v44 = vor.u32 %v9835_v52, %v7669_v54 }
 0x190   :  { %2362 = vmatpush.bf16.msra.mxu1 %v7216_v35  ;;  %v2067_v0 = vadd.f32 %v10770_v60, %v2054_v26  ;;  %v9812_v60 = vld [vmem:[#allocation6 + $0x4] sm:$0xf0]  ;;  %v7660_v35 = vor.u32 %v9834_v24, %v7659_v23  ;;  %v9850_v26 = vld [vmem:[#allocation6 + $0x134] sm:$0xf0]  ;;  %v7716_v6 = vor.u32 %v9848_v4, %v7715_v57  ;;  %v7592_v23 = vor.u32 %v9815_v15, %v7589_v16  ;;  %v7677_v24 = vld [vmem:[#allocation6 + $0xd8] sm:$0xf0] }
 0x191   :  { %2819 = vmatpush.bf16.msra.mxu2 %v7756_v5  ;;  %v2183_v14 = vpop.f32.mrf.mxu3  ;;  %v7572_v21 = vor.u32 %v9812_v60, %v7571_v8  ;;  %v7724_v55 = vor.u32 %v9850_v26, %v7723_v51  ;;  %v9817_v5 = vld [vmem:[#allocation6 + $0x34] sm:$0xf]  ;;  %v9846_v60 = vld [vmem:[#allocation6 + $0x114] sm:$0xf0]  ;;  %v7725_v57 = vld [vmem:[#allocation6 + $0x138] sm:$0xf0] }
 0x192   :  { %v2080_v11 = vadd.f32 %v10772_v37, %v2067_v0  ;;  %v7739_v37 = vld [vmem:[#allocation6 + $0x150] sm:$0xf]  ;;  %v9841_v0 = vld [vmem:[#allocation6 + $0xf4] sm:$0xf] }
 0x193   :  { %2796 = vmatpush.bf16.msrb.mxu0 %v7604_v29  ;;  %v7740_v34 = vor.u32 %v9854_v50, %v7739_v37  ;;  %v7624_v29 = vor.u32 %v9823_v32, %v7621_v33  ;;  %v7696_v10 = vor.u32 %v9841_v0, %v7693_v3  ;;  %v7581_v37 = vld [vmem:[#allocation6 + $0x18] sm:$0xf0]  ;;  %v9829_v0 = vld [vmem:[#allocation6 + $0x94] sm:$0xf] }
 0x194   :  { %2363 = vmatpush.bf16.msra.mxu1 %v7200_v46  ;;  %v2395_v27 = vmax.f32 %v2080_v11, 0.0  ;;  %v7732_v46 = vor.u32 %v9852_v41, %v7731_v39  ;;  %v7707_v11 = vld [vmem:[#allocation6 + $0x110] sm:$0xf]  ;;  %v9855_v39 = vld [vmem:[#allocation6 + $0x164] sm:$0xf] }
 0x195   :  { %v7749_v41 = vld [vmem:[#allocation6 + $0x168] sm:$0xf0]  ;;  %v9849_v3 = vld [vmem:[#allocation6 + $0x134] sm:$0xf] }
 0x196   :  { %v2157_v20 = vpop.f32.mrf.mxu1  ;;  %v10807_v38 = vpack.c.bf16 %v2395_v27, %v2395_v27  ;;  %v7699_v27 = vld [vmem:[#allocation6 + $0x100] sm:$0xf] }
 0x197   :  { %2797 = vmatpush.bf16.msrb.mxu0 %v7596_v25  ;;  %2364 = vmatmul.bf16.vlgmr.msra.gmra.mxu1 %v10740_v2  ;;  %v9856_v2 = vld [vmem:[#allocation6 + $0x164] sm:$0xf0]  ;;  %v2158_v36 = vadd.f32 %v2157_v20, %v2145_v31  ;;  %v2172_v56 = vpop.f32.mrf.mxu2  ;;  %v9857_v31 = vld [vmem:[#allocation6 + $0x174] sm:$0xf]  ;;  %v7757_v20 = vld [vmem:[#allocation6 + $0x178] sm:$0xf0] }
 0x198   :  { %2806 = vmatpush.bf16.msrb.mxu1 %v7692_v30  ;;  %v7748_v40 = vor.u32 %v9856_v2, %v7747_v12  ;;  %v7643_v30 = vld [vmem:[#allocation6 + $0x90] sm:$0xf]  ;;  %v9839_v2 = vld [vmem:[#allocation6 + $0xe4] sm:$0xf]  ;;  %v7760_v32 = vor.u32 %v9857_v31, %v7757_v20  ;;  %v9872_v31 = vld [vmem:[#allocation6 + $0x1e4] sm:$0xf0] }
 0x199   :  { %v2185_v42 = vpop.f32.mrf.mxu3  ;;  %v2171_v25 = vadd.f32 %v2170_v13, %v2158_v36  ;;  %v7685_v13 = vld [vmem:[#allocation6 + $0xe8] sm:$0xf0]  ;;  %v9811_v36 = vld [vmem:[#allocation6 + $0x4] sm:$0xf] }
 0x19a   :  { %2820 = vmatpush.bf16.msra.mxu2 %v7748_v40  ;;  %v7752_v42 = vor.u32 %v9855_v39, %v7749_v41  ;;  %v7795_v39 = vld [vmem:[#allocation6 + $0x1c0] sm:$0xf]  ;;  %v9868_v41 = vld [vmem:[#allocation6 + $0x1c4] sm:$0xf0] }
 0x19b   :  { %2798 = vmatpush.bf16.msrb.mxu0 %v7588_v62  ;;  %v7644_v62 = vor.u32 %v9830_v49, %v7643_v30  ;;  %v2184_v63 = vadd.f32 %v2183_v14, %v2171_v25  ;;  %v7708_v14 = vor.u32 %v9846_v60, %v7707_v11  ;;  %v7661_v30 = vld [vmem:[#allocation6 + $0xb8] sm:$0xf0]  ;;  %v9853_v25 = vld [vmem:[#allocation6 + $0x154] sm:$0xf]  ;;  %v693_v11 = vperm.slane %v10783_v22, 2 }
 0x19c   :  { %2807 = vmatpush.bf16.msrb.mxu1 %v7684_v59  ;;  %v9819_v59 = vld [vmem:[#allocation6 + $0x44] sm:$0xf]  ;;  %v7741_v49 = vld [vmem:[#allocation6 + $0x158] sm:$0xf0] }
 0x19d   :  { %v7608_v1 = vor.u32 %v9819_v59, %v7605_v61  ;;  %v2396_v8 = vmax.f32 %v2184_v63, 0.0  ;;  %v7744_v26 = vor.u32 %v9853_v25, %v7741_v49  ;;  %v9851_v59 = vld [vmem:[#allocation6 + $0x144] sm:$0xf]  ;;  %v7733_v61 = vld [vmem:[#allocation6 + $0x148] sm:$0xf0] }
 0x19e   :  { %2821 = vmatpush.bf16.msra.mxu2 %v7740_v34  ;;  %v2159_v18 = vpop.f32.mrf.mxu1  ;;  %v7736_v63 = vor.u32 %v9851_v59, %v7733_v61  ;;  %v9862_v59 = vld [vmem:[#allocation6 + $0x194] sm:$0xf0] }
 0x19f   :  { %2799 = vmatpush.bf16.msrb.mxu0 %v7580_v7  ;;  %v7636_v7 = vor.u32 %v9828_v45, %v7635_v19  ;;  %v10812_v40 = vpack.c.bf16 %v2396_v8, %v2396_v8  ;;  %v7653_v18 = vld [vmem:[#allocation6 + $0xa8] sm:$0xf0]  ;;  %v9847_v8 = vld [vmem:[#allocation6 + $0x124] sm:$0xf] }
 0x1a0   :  { %2808 = vmatpush.bf16.msrb.mxu1 %v7676_v58  ;;  %v7597_v58 = vld [vmem:[#allocation6 + $0x38] sm:$0xf0] }
 0x1a1   :  { %v7600_v12 = vor.u32 %v9817_v5, %v7597_v58  ;;  %v7728_v5 = vor.u32 %v9849_v3, %v7725_v57 }
 0x1a2   :  { %2822 = vmatpush.bf16.msra.mxu2 %v7732_v46 }
 0x1a3   :  { %2800 = vmatpush.bf16.msrb.mxu0 %v7572_v21  ;;  %v10810_v9 = vpop.f32.mrf.mxu0  ;;  %v9837_v21 = vld [vmem:[#allocation6 + $0xd4] sm:$0xf] }
 0x1a4   :  { %2809 = vmatpush.bf16.msrb.mxu1 %v7668_v17  ;;  %v7688_v17 = vor.u32 %v9839_v2, %v7685_v13  ;;  %v7680_v34 = vor.u32 %v9837_v21, %v7677_v24  ;;  %v2197_v15 = vadd.f32 %v10810_v9, %v693_v11  ;;  %v9874_v24 = vld [vmem:[#allocation6 + $0x1f4] sm:$0xf0] }
 0x1a6   :  { %2801 = vmatmul.bf16.vlgmr.msrb.gmra.mxu0 %v10807_v38  ;;  %2823 = vmatpush.bf16.msra.mxu2 %v7724_v55  ;;  %v9831_v55 = vld [vmem:[#allocation6 + $0xa4] sm:$0xf] }
 0x1a7   :  { %2845 = vmatpush.bf16.msra.mxu0 %v7632_v28  ;;  %v9844_v28 = vld [vmem:[#allocation6 + $0x104] sm:$0xf0]  ;;  %v7656_v45 = vor.u32 %v9831_v55, %v7653_v18  ;;  %v7771_v18 = vld [vmem:[#allocation6 + $0x190] sm:$0xf] }
 0x1a8   :  { %2810 = vmatpush.bf16.msrb.mxu1 %v7660_v35  ;;  %v7700_v50 = vor.u32 %v9844_v28, %v7699_v27  ;;  %v7584_v35 = vor.u32 %v9813_v47, %v7581_v37  ;;  %v7701_v47 = vld [vmem:[#allocation6 + $0x108] sm:$0xf0] }
 0x1aa   :  { %2824 = vmatpush.bf16.msra.mxu2 %v7716_v6  ;;  %v9827_v6 = vld [vmem:[#allocation6 + $0x84] sm:$0xf] }
 0x1ab   :  { %2846 = vmatpush.bf16.msra.mxu0 %v7624_v29  ;;  %v2198_v33 = vpop.f32.mrf.mxu0  ;;  %v7573_v29 = vld [vmem:[#allocation6 + $0x8] sm:$0xf0] }
 0x1ac   :  { %2811 = vmatpush.bf16.msrb.mxu1 %v7652_v48  ;;  %v7576_v46 = vor.u32 %v9811_v36, %v7573_v29  ;;  %v9833_v48 = vld [vmem:[#allocation6 + $0xb4] sm:$0xf]  ;;  %v9870_v36 = vld [vmem:[#allocation6 + $0x1d4] sm:$0xf0] }
 0x1ae   :  { %2825 = vmatpush.bf16.msra.mxu2 %v7708_v14 }
 0x1af   :  { %2847 = vmatpush.bf16.msra.mxu0 %v7616_v53  ;;  %v2222_v56 = vpop.f32.mrf.mxu2  ;;  %v7664_v53 = vor.u32 %v9833_v48, %v7661_v30  ;;  %v7787_v48 = vld [vmem:[#allocation6 + $0x1b0] sm:$0xf]  ;;  %v9866_v30 = vld [vmem:[#allocation6 + $0x1b4] sm:$0xf0] }
 0x1b0   :  { %2812 = vmatpush.bf16.msrb.mxu1 %v7644_v62 }
 0x1b1   :  { %v10815_v43 = vpop.f32.mrf.mxu3 }
 0x1b2   :  { %2826 = vmatpush.bf16.msra.mxu2 %v7700_v50  ;;  %v7811_v50 = vld [vmem:[#allocation6 + $0x1e0] sm:$0xf] }
 0x1b3   :  { %2848 = vmatpush.bf16.msra.mxu0 %v7608_v1  ;;  %v7645_v1 = vld [vmem:[#allocation6 + $0x98] sm:$0xf0] }
 0x1b4   :  { %2813 = vmatpush.bf16.msrb.mxu1 %v7636_v7  ;;  %v7648_v58 = vor.u32 %v9829_v0, %v7645_v1  ;;  %v7637_v7 = vld [vmem:[#allocation6 + $0x88] sm:$0xf0]  ;;  %v9873_v0 = vld [vmem:[#allocation6 + $0x1f4] sm:$0xf]  ;;  %v7821_v1 = vld [vmem:[#allocation6 + $0x1f8] sm:$0xf0] }
 0x1b5   :  { %v7640_v2 = vor.u32 %v9827_v6, %v7637_v7  ;;  %v7824_v3 = vor.u32 %v9873_v0, %v7821_v1  ;;  %v9882_v1 = vld [vmem:[#allocation7 + $0x38] sm:$0xff] }
 0x1b6   :  { %2871 = vmatpush.bf16.msrb.mxu2 %v7760_v32  ;;  %v2209_v51 = vpop.f32.mrf.mxu1  ;;  %v7812_v32 = vor.u32 %v9872_v31, %v7811_v50 }
 0x1b7   :  { %2849 = vmatpush.bf16.msra.mxu0 %v7600_v12  ;;  %2814 = vmatmul.bf16.vlgmr.msrb.gmra.mxu1 %v10812_v40  ;;  %v2224_v62 = vpop.f32.mrf.mxu2  ;;  %v7709_v12 = vld [vmem:[#allocation6 + $0x118] sm:$0xf0]  ;;  %v2210_v16 = vadd.f32 %v2209_v51, %v2197_v15  ;;  %v9865_v15 = vld [vmem:[#allocation6 + $0x1b4] sm:$0xf] }
 0x1b8   :  { %2858 = vmatpush.bf16.msra.mxu1 %v7696_v10  ;;  %v7717_v10 = vld [vmem:[#allocation6 + $0x128] sm:$0xf0]  ;;  %v7772_v62 = vor.u32 %v9862_v59, %v7771_v18 }
 0x1b9   :  { %v2237_v19 = vpop.f32.mrf.mxu3  ;;  %v7720_v60 = vor.u32 %v9847_v8, %v7717_v10  ;;  %v2223_v28 = vadd.f32 %v2222_v56, %v2210_v16  ;;  %v9869_v8 = vld [vmem:[#allocation6 + $0x1d4] sm:$0xf]  ;;  %v7805_v10 = vld [vmem:[#allocation6 + $0x1d8] sm:$0xf0] }
 0x1ba   :  { %2872 = vmatpush.bf16.msrb.mxu2 %v7752_v42  ;;  %v7796_v42 = vor.u32 %v9868_v41, %v7795_v39  ;;  %v9860_v19 = vld [vmem:[#allocation6 + $0x184] sm:$0xf0]  ;;  %v7789_v16 = vld [vmem:[#allocation6 + $0x1b8] sm:$0xf0] }
 0x1bb   :  { %2850 = vmatpush.bf16.msra.mxu0 %v7592_v23  ;;  %v7819_v23 = vld [vmem:[#allocation6 + $0x1f0] sm:$0xf]  ;;  %v2236_v9 = vadd.f32 %v10815_v43, %v2223_v28  ;;  %v7788_v43 = vor.u32 %v9866_v30, %v7787_v48  ;;  %v9861_v28 = vld [vmem:[#allocation6 + $0x194] sm:$0xf] }
 0x1bc   :  { %2859 = vmatpush.bf16.msra.mxu1 %v7688_v17  ;;  %v9843_v17 = vld [vmem:[#allocation6 + $0x104] sm:$0xf]  ;;  %v7820_v27 = vor.u32 %v9874_v24, %v7819_v23  ;;  %v7781_v23 = vld [vmem:[#allocation6 + $0x1a8] sm:$0xf0]  ;;  %v694_v24 = vperm.slane %v10783_v22, 3 }
 0x1bd   :  { %v7704_v21 = vor.u32 %v9843_v17, %v7701_v47  ;;  %v7792_v47 = vor.u32 %v9865_v15, %v7789_v16  ;;  %v9885_v15 = vld [vmem:[#allocation7 + $0x50] sm:$0xff]  ;;  %v9884_v16 = vld [vmem:[#allocation7 + $0x48] sm:$0xff] }
 0x1be   :  { %2873 = vmatpush.bf16.msrb.mxu2 %v7744_v26  ;;  %v2211_v4 = vpop.f32.mrf.mxu1  ;;  %2832 = vmatpush.bf16.msra.mxu3 %v7820_v27  ;;  %v7779_v26 = vld [vmem:[#allocation6 + $0x1a0] sm:$0xf] }
 0x1bf   :  { %2851 = vmatpush.bf16.msra.mxu0 %v7584_v35  ;;  %v7803_v35 = vld [vmem:[#allocation6 + $0x1d0] sm:$0xf]  ;;  %v9871_v4 = vld [vmem:[#allocation6 + $0x1e4] sm:$0xf] }
 0x1c0   :  { %2860 = vmatpush.bf16.msra.mxu1 %v7680_v34  ;;  %v7804_v52 = vor.u32 %v9870_v36, %v7803_v35 }
 0x1c2   :  { %2874 = vmatpush.bf16.msrb.mxu2 %v7736_v63  ;;  %2833 = vmatpush.bf16.msra.mxu3 %v7812_v32  ;;  %v7763_v63 = vld [vmem:[#allocation6 + $0x180] sm:$0xf] }
 0x1c3   :  { %2852 = vmatpush.bf16.msra.mxu0 %v7576_v46  ;;  %v2248_v13 = vpop.f32.mrf.mxu0 }
 0x1c4   :  { %2861 = vmatpush.bf16.msra.mxu1 %v7672_v44  ;;  %v2249_v34 = vadd.f32 %v2248_v13, %v2236_v9  ;;  %v9859_v9 = vld [vmem:[#allocation6 + $0x184] sm:$0xf] }
 0x1c6   :  { %2853 = vmatmul.bf16.vlgmr.msra.gmra.mxu0 %v10807_v38  ;;  %2875 = vmatpush.bf16.msrb.mxu2 %v7728_v5  ;;  %v9845_v38 = vld [vmem:[#allocation6 + $0x114] sm:$0xf]  ;;  %v7813_v5 = vld [vmem:[#allocation6 + $0x1e8] sm:$0xf0] }
 0x1c7   :  { %v7712_v14 = vor.u32 %v9845_v38, %v7709_v12  ;;  %2834 = vmatpush.bf16.msra.mxu3 %v7804_v52  ;;  %v7816_v6 = vor.u32 %v9871_v4, %v7813_v5  ;;  %v9867_v38 = vld [vmem:[#allocation6 + $0x1c4] sm:$0xf]  ;;  %v7797_v12 = vld [vmem:[#allocation6 + $0x1c8] sm:$0xf0]  ;;  %3033 = vmatpush.bf16.msrb.mxu0 %v9882_v1  ;;  %v9889_v4 = vld [vmem:[#allocation7 + $0x70] sm:$0xff] }
 0x1c8   :  { %2862 = vmatpush.bf16.msra.mxu1 %v7664_v53  ;;  %v9864_v53 = vld [vmem:[#allocation6 + $0x1a4] sm:$0xf0]  ;;  %v7800_v13 = vor.u32 %v9867_v38, %v7797_v12 }
 0x1c9   :  { %v7780_v55 = vor.u32 %v9864_v53, %v7779_v26  ;;  %v9880_v5 = vld [vmem:[#allocation7 + $0x28] sm:$0xff] }
 0x1ca   :  { %2876 = vmatpush.bf16.msrb.mxu2 %v7720_v60  ;;  %v7808_v60 = vor.u32 %v9869_v8, %v7805_v10  ;;  %v9877_v10 = vld [vmem:[#allocation7 + $0x10] sm:$0xff]  ;;  %v9876_v38 = vld [vmem:[#allocation7 + $0x8] sm:$0xff] }
 0x1cb   :  { %v2250_v37 = vpop.f32.mrf.mxu0  ;;  %2835 = vmatpush.bf16.msra.mxu3 %v7796_v42  ;;  %v9888_v12 = vld [vmem:[#allocation7 + $0x68] sm:$0xff] }
 0x1cc   :  { %2863 = vmatpush.bf16.msra.mxu1 %v7656_v45  ;;  %v7764_v45 = vor.u32 %v9860_v19, %v7763_v63  ;;  %v7773_v37 = vld [vmem:[#allocation6 + $0x198] sm:$0xf0] }
 0x1cd   :  { %v7776_v31 = vor.u32 %v9861_v28, %v7773_v37 }
 0x1ce   :  { %2877 = vmatpush.bf16.msrb.mxu2 %v7712_v14 }
 0x1cf   :  { %v2274_v20 = vpop.f32.mrf.mxu2  ;;  %2836 = vmatpush.bf16.msra.mxu3 %v7788_v43 }
 0x1d0   :  { %2864 = vmatpush.bf16.msra.mxu1 %v7648_v58 }
 0x1d1   :  { %v2287_v33 = vpop.f32.mrf.mxu3 }
 0x1d2   :  { %2878 = vmatpush.bf16.msrb.mxu2 %v7704_v21  ;;  %v9863_v21 = vld [vmem:[#allocation6 + $0x1a4] sm:$0xf] }
 0x1d3   :  { %2837 = vmatpush.bf16.msra.mxu3 %v7780_v55  ;;  %v7784_v27 = vor.u32 %v9863_v21, %v7781_v23  ;;  %v9897_v21 = vld [vmem:[%s11002_s9 + $0x30] sm:$0xff] }
 0x1d4   :  { %2865 = vmatpush.bf16.msra.mxu1 %v7640_v2 }
 0x1d7   :  { %2866 = vmatmul.bf16.vlgmr.msra.gmra.mxu1 %v10812_v40  ;;  %v2261_v40 = vpop.f32.mrf.mxu1  ;;  %v2276_v56 = vpop.f32.mrf.mxu2  ;;  %2838 = vmatpush.bf16.msra.mxu3 %v7772_v62 }
 0x1d8   :  { %v2262_v54 = vadd.f32 %v2261_v40, %v2249_v34 }
 0x1d9   :  { %v2289_v46 = vpop.f32.mrf.mxu3 }
 0x1da   :  { %v2275_v29 = vadd.f32 %v2274_v20, %v2262_v54 }
 0x1db   :  { %2839 = vmatpush.bf16.msra.mxu3 %v7764_v45 }
 0x1dc   :  { %v2288_v44 = vadd.f32 %v2287_v33, %v2275_v29  ;;  %v7765_v33 = vld [vmem:[#allocation6 + $0x188] sm:$0xf0] }
 0x1dd   :  { %v7768_v34 = vor.u32 %v9859_v9, %v7765_v33 }
 0x1de   :  { %v2397_v25 = vmax.f32 %v2288_v44, 0.0 }
 0x1df   :  { %v2263_v49 = vpop.f32.mrf.mxu1  ;;  %2884 = vmatpush.bf16.msrb.mxu3 %v7824_v3  ;;  %v9890_v3 = vld [vmem:[#allocation7 + $0x78] sm:$0xff] }
 0x1e0   :  { %v2466_v51 = vpack.c.bf16 %v2397_v25, %v2397_v25  ;;  %v2463_v25 = vld [vmem:[%s10999_s6] sm:$0x3]  ;;  %3046 = vmatpush.bf16.msrb.mxu1 %v9890_v3  ;;  %v7980_v3 = vld [vmem:[#allocation9 + $0x50] sm:$0xf] }
 0x1e1   :  { %v2470_v62 = vperm.slane %v2463_v25, 1 }
 0x1e2   :  { %2827 = vmatmul.bf16.vlgmr.msra.gmra.mxu2 %v2466_v51 }
 0x1e3   :  { %v2300_v61 = vpop.f32.mrf.mxu0  ;;  %2885 = vmatpush.bf16.msrb.mxu3 %v7816_v6  ;;  %v9879_v6 = vld [vmem:[#allocation7 + $0x20] sm:$0xff] }
 0x1e4   :  { %v2301_v20 = vadd.f32 %v2300_v61, %v694_v24  ;;  %3047 = vmatpush.bf16.msrb.mxu1 %v9889_v4  ;;  %v9913_v4 = vld [vmem:[#allocation9 + $0x54] sm:$0xf] }
 0x1e7   :  { %2886 = vmatpush.bf16.msrb.mxu3 %v7808_v60 }
 0x1e8   :  { %3048 = vmatpush.bf16.msrb.mxu1 %v9888_v12  ;;  %v7964_v12 = vld [vmem:[#allocation9 + $0x30] sm:$0xf] }
 0x1eb   :  { %v2302_v57 = vpop.f32.mrf.mxu0  ;;  %2887 = vmatpush.bf16.msrb.mxu3 %v7800_v13  ;;  %v9887_v13 = vld [vmem:[#allocation7 + $0x60] sm:$0xff] }
 0x1ec   :  { %v9881_v57 = vld [vmem:[#allocation7 + $0x30] sm:$0xff]  ;;  %3049 = vmatpush.bf16.msrb.mxu1 %v9887_v13 }
 0x1ed   :  { %3034 = vmatpush.bf16.msrb.mxu0 %v9881_v57  ;;  %v9914_v57 = vld [vmem:[#allocation9 + $0x54] sm:$0xf0]  ;;  %v9909_v13 = vld [vmem:[#allocation9 + $0x34] sm:$0xf] }
 0x1ef   :  { %v2326_v58 = vpop.f32.mrf.mxu2  ;;  %2888 = vmatpush.bf16.msrb.mxu3 %v7792_v47  ;;  %v9898_v47 = vld [vmem:[%s11002_s9 + $0x38] sm:$0xff] }
 0x1f0   :  { %3129 = vmatpush.bf16.msra.mxu2 %v9898_v47  ;;  %v9908_v47 = vld [vmem:[#allocation9 + $0x24] sm:$0xf0] }
 0x1f1   :  { %v2339_v7 = vpop.f32.mrf.mxu3  ;;  %3035 = vmatpush.bf16.msrb.mxu0 %v9880_v5  ;;  %v7982_v5 = vld [vmem:[#allocation9 + $0x58] sm:$0xf0] }
 0x1f2   :  { %2879 = vmatmul.bf16.vlgmr.msrb.gmra.mxu2 %v2466_v51  ;;  %v2469_v51 = vperm.slane %v2463_v25, 0 }
 0x1f3   :  { %2889 = vmatpush.bf16.msrb.mxu3 %v7784_v27 }
 0x1f4   :  { %3130 = vmatpush.bf16.msra.mxu2 %v9897_v21  ;;  %v9907_v21 = vld [vmem:[#allocation9 + $0x24] sm:$0xf] }
 0x1f5   :  { %3036 = vmatpush.bf16.msrb.mxu0 %v9879_v6  ;;  %v7985_v6 = vor.u32 %v9913_v4, %v7982_v5  ;;  %v9943_v5 = vld [vmem:[#allocation10 + $0xc4] sm:$0xf] }
 0x1f6   :  { %v2313_v11 = vpop.f32.mrf.mxu1 }
 0x1f7   :  { %v2328_v2 = vpop.f32.mrf.mxu2  ;;  %v2314_v32 = vadd.f32 %v2313_v11, %v2301_v20  ;;  %2890 = vmatpush.bf16.msrb.mxu3 %v7776_v31 }
 0x1f8   :  { %v9875_v2 = vld [vmem:[#allocation7] sm:$0xff] }
 0x1f9   :  { %v2341_v14 = vpop.f32.mrf.mxu3  ;;  %v2327_v35 = vadd.f32 %v2326_v58, %v2314_v32 }
 0x1fa   :  { %v9886_v14 = vld [vmem:[#allocation7 + $0x58] sm:$0xff] }
 0x1fb   :  { %2891 = vmatpush.bf16.msrb.mxu3 %v7768_v34  ;;  %v2340_v52 = vadd.f32 %v2339_v7, %v2327_v35  ;;  %v9878_v7 = vld [vmem:[#allocation7 + $0x18] sm:$0xff]  ;;  %3050 = vmatpush.bf16.msrb.mxu1 %v9886_v14  ;;  %v9896_v35 = vld [vmem:[%s11002_s9 + $0x28] sm:$0xff] }
 0x1fc   :  { %3037 = vmatpush.bf16.msrb.mxu0 %v9878_v7  ;;  %3131 = vmatpush.bf16.msra.mxu2 %v9896_v35  ;;  %v7972_v7 = vld [vmem:[#allocation9 + $0x40] sm:$0xf]  ;;  %v7966_v14 = vld [vmem:[#allocation9 + $0x38] sm:$0xf0] }
 0x1fe   :  { %v2315_v17 = vpop.f32.mrf.mxu1 }
 0x1ff   :  { %3051 = vmatpush.bf16.msrb.mxu1 %v9885_v15  ;;  %v9883_v17 = vld [vmem:[#allocation7 + $0x40] sm:$0xff] }
 0x200   :  { %3038 = vmatpush.bf16.msrb.mxu0 %v9877_v10  ;;  %v9911_v10 = vld [vmem:[#allocation9 + $0x44] sm:$0xf] }
 0x203   :  { %v2352_v50 = vpop.f32.mrf.mxu0  ;;  %3052 = vmatpush.bf16.msrb.mxu1 %v9884_v16  ;;  %v7969_v16 = vor.u32 %v9909_v13, %v7966_v14  ;;  %v8198_v13 = vld [vmem:[#allocation10 + $0x190] sm:$0xf0] }
 0x204   :  { %v2353_v29 = vadd.f32 %v2352_v50, %v2340_v52  ;;  %3039 = vmatpush.bf16.msrb.mxu0 %v9876_v38  ;;  %v9893_v52 = vld [vmem:[%s11002_s9 + $0x10] sm:$0xff] }
 0x205   :  { %v8086_v14 = vld [vmem:[#allocation10 + $0xb0] sm:$0xf0] }
 0x207   :  { %3053 = vmatpush.bf16.msrb.mxu1 %v9883_v17  ;;  %v7956_v17 = vld [vmem:[#allocation9 + $0x20] sm:$0xf] }
 0x208   :  { %3040 = vmatpush.bf16.msrb.mxu0 %v9875_v2  ;;  %v9910_v2 = vld [vmem:[#allocation9 + $0x34] sm:$0xf0] }
 0x209   :  { %v7965_v15 = vor.u32 %v9910_v2, %v7964_v12  ;;  %v9939_v12 = vld [vmem:[#allocation10 + $0xa4] sm:$0xf] }
 0x20a   :  { %v9967_v2 = vld [vmem:[#allocation10 + $0x184] sm:$0xf] }
 0x20b   :  { %v2354_v36 = vpop.f32.mrf.mxu0 }
 0x20c   :  { %v9895_v36 = vld [vmem:[%s11002_s9 + $0x20] sm:$0xff] }
 0x20d   :  { %3132 = vmatpush.bf16.msra.mxu2 %v9895_v36  ;;  %v7950_v36 = vld [vmem:[#allocation9 + $0x18] sm:$0xf0] }
 0x20f   :  { %v2378_v40 = vpop.f32.mrf.mxu2 }
 0x211   :  { %v2391_v54 = vpop.f32.mrf.mxu3 }
 0x214   :  { %v2365_v22 = vpop.f32.mrf.mxu1 }
 0x215   :  { %v2366_v39 = vadd.f32 %v2365_v22, %v2353_v29  ;;  %v9891_v29 = vld [vmem:[%s11002_s9] sm:$0xff]  ;;  %v9902_v22 = vld [vmem:[%s11004_s11 + $0x18] sm:$0xff] }
 0x217   :  { %v2379_v41 = vadd.f32 %v2378_v40, %v2366_v39  ;;  %v2380_v56 = vpop.f32.mrf.mxu2  ;;  %v9894_v40 = vld [vmem:[%s11002_s9 + $0x18] sm:$0xff]  ;;  %v9901_v39 = vld [vmem:[%s11004_s11 + $0x10] sm:$0xff] }
 0x218   :  { %3133 = vmatpush.bf16.msra.mxu2 %v9894_v40 }
 0x219   :  { %v2392_v42 = vadd.f32 %v2391_v54, %v2379_v41  ;;  %v2393_v44 = vpop.f32.mrf.mxu3  ;;  %v9892_v54 = vld [vmem:[%s11002_s9 + $0x8] sm:$0xff] }
 0x21b   :  { %v2398_v46 = vmax.f32 %v2392_v42, 0.0  ;;  %v10319_v42 = vld [vmem:[%s11001_s8] ss:$0 sm:$0xff] }
 0x21c   :  { %v2367_v48 = vpop.f32.mrf.mxu1  ;;  %3134 = vmatpush.bf16.msra.mxu2 %v9893_v52  ;;  %v7940_v52 = vld [vmem:[#allocation9] sm:$0xf] }
 0x21d   :  { %v2467_v30 = vpack.c.bf16 %v2398_v46, %v2398_v46 }
 0x21f   :  { %2840 = vmatmul.bf16.vlgmr.msra.gmra.mxu3 %v2467_v30 }
 0x220   :  { %3135 = vmatpush.bf16.msra.mxu2 %v9892_v54  ;;  %3188 = vmatpush.bf16.msra.mxu3 %v9902_v22  ;;  %v9904_v54 = vld [vmem:[#allocation9 + $0x4] sm:$0xf0] }
 0x221   :  { %v7941_v22 = vor.u32 %v9904_v54, %v7940_v52  ;;  %v8164_v52 = vld [vmem:[#allocation10 + $0x140] sm:$0xf]  ;;  %v9961_v54 = vld [vmem:[#allocation10 + $0x14c] sm:$0xf0] }
 0x223   :  { %v2802_v43 = vpop.f32.mrf.mxu0 }
 0x224   :  { %v2803_v26 = vadd.f32 %v2802_v43, %v2469_v51  ;;  %3136 = vmatpush.bf16.msra.mxu2 %v9891_v29  ;;  %3189 = vmatpush.bf16.msra.mxu3 %v9901_v39  ;;  %v9899_v51 = vld [vmem:[%s11004_s11] sm:$0xff]  ;;  %v7942_v39 = vld [vmem:[#allocation9 + $0x8] sm:$0xf0] }
 0x225   :  { %v9903_v29 = vld [vmem:[#allocation9 + $0x4] sm:$0xf] }
 0x22b   :  { %v2804_v49 = vpop.f32.mrf.mxu0 }
 0x22c   :  { %v9900_v49 = vld [vmem:[%s11004_s11 + $0x8] sm:$0xff] }
 0x22d   :  { %3190 = vmatpush.bf16.msra.mxu3 %v9900_v49  ;;  %v9975_v49 = vld [vmem:[#allocation10 + $0x1c4] sm:$0xf] }
 0x22f   :  { %2892 = vmatmul.bf16.vlgmr.msrb.gmra.mxu3 %v2467_v30 }
 0x231   :  { %3191 = vmatpush.bf16.msra.mxu3 %v9899_v51  ;;  %v8230_v51 = vld [vmem:[#allocation10 + $0x1d0] sm:$0xf0] }
 0x234   :  { %v2815_v53 = vpop.f32.mrf.mxu1 }
 0x235   :  { %v2816_v55 = vadd.f32 %v2815_v53, %v2803_v26  ;;  %v7996_v26 = vld [vmem:[#allocation9 + $0x70] sm:$0xf]  ;;  %v9918_v53 = vld [vmem:[#allocation9 + $0x74] sm:$0xf0] }
 0x23c   :  { %v2817_v18 = vpop.f32.mrf.mxu1 }
 0x23d   :  { %v7997_v18 = vor.u32 %v9918_v53, %v7996_v26  ;;  %v8116_v26 = vld [vmem:[#allocation10 + $0xe0] sm:$0xf] }
 0x23f   :  { %3301 = vmatpush.bf16.msrb.mxu3 %v7997_v18  ;;  %v9947_v18 = vld [vmem:[#allocation10 + $0xe4] sm:$0xf] }
 0x243   :  { %v2854_v59 = vpop.f32.mrf.mxu0 }
 0x244   :  { %v2855_v63 = vadd.f32 %v2854_v59, %v2470_v62  ;;  %v7998_v59 = vld [vmem:[#allocation9 + $0x78] sm:$0xf0]  ;;  %v9916_v62 = vld [vmem:[#allocation9 + $0x64] sm:$0xf0] }
 0x24b   :  { %v2856_v61 = vpop.f32.mrf.mxu0 }
 0x24c   :  { %v7988_v61 = vld [vmem:[#allocation9 + $0x60] sm:$0xf] }
 0x254   :  { %v2867_v19 = vpop.f32.mrf.mxu1 }
 0x255   :  { %v2868_v45 = vadd.f32 %v2867_v19, %v2855_v63  ;;  %v9915_v19 = vld [vmem:[#allocation9 + $0x64] sm:$0xf] }
 0x25c   :  { %v2869_v0 = vpop.f32.mrf.mxu1 }
 0x25d   :  { %v7989_v0 = vor.u32 %v9916_v62, %v7988_v61  ;;  %v8233_v61 = vor.u32 %v9975_v49, %v8230_v51  ;;  %v10321_v49 = vld [vmem:[%s11005_s12] ss:$0 sm:$0xff]  ;;  %v9955_v51 = vld [vmem:[#allocation10 + $0x124] sm:$0xf] }
 0x25f   :  { %3302 = vmatpush.bf16.msrb.mxu3 %v7989_v0  ;;  %v9971_v0 = vld [vmem:[#allocation10 + $0x1a4] sm:$0xf] }
 0x265   :  { %v2828_v58 = vpop.f32.mrf.mxu2 }
 0x266   :  { %v2829_v23 = vadd.f32 %v2828_v58, %v2816_v55  ;;  %v9917_v55 = vld [vmem:[#allocation9 + $0x74] sm:$0xf]  ;;  %v7981_v58 = vor.u32 %v9914_v57, %v7980_v3  ;;  %v8100_v3 = vld [vmem:[#allocation10 + $0xc0] sm:$0xf]  ;;  %v9945_v57 = vld [vmem:[#allocation10 + $0xcc] sm:$0xf0] }
 0x267   :  { %v8001_v63 = vor.u32 %v9917_v55, %v7998_v59  ;;  %v9949_v55 = vld [vmem:[#allocation10 + $0xec] sm:$0xf0]  ;;  %v8118_v59 = vld [vmem:[#allocation10 + $0xf0] sm:$0xf0]  ;;  %v8101_v4 = vor.u32 %v9945_v57, %v8100_v3  ;;  %v9951_v3 = vld [vmem:[#allocation10 + $0x104] sm:$0xf] }
 0x268   :  { %3303 = vmatpush.bf16.msrb.mxu3 %v7981_v58  ;;  %v8117_v62 = vor.u32 %v9949_v55, %v8116_v26  ;;  %v8102_v58 = vld [vmem:[#allocation10 + $0xd0] sm:$0xf0] }
 0x269   :  { %3314 = vmatpush.bf16.msra.mxu0 %v8001_v63  ;;  %v8121_v63 = vor.u32 %v9947_v18, %v8118_v59  ;;  %v8150_v26 = vld [vmem:[#allocation10 + $0x130] sm:$0xf0]  ;;  %v8020_v18 = vld [vmem:[#allocation10 + $0x20] sm:$0xf] }
 0x26a   :  { %3725 = vmatpush.bf16.msra.mxu1 %v8117_v62  ;;  %v9953_v62 = vld [vmem:[#allocation10 + $0x10c] sm:$0xf0]  ;;  %v8134_v57 = vld [vmem:[#allocation10 + $0x110] sm:$0xf0] }
 0x26d   :  { %v2830_v8 = vpop.f32.mrf.mxu2 }
 0x26e   :  { %v9912_v8 = vld [vmem:[#allocation9 + $0x44] sm:$0xf0]  ;;  %3726 = vmatpush.bf16.msra.mxu1 %v8101_v4 }
 0x26f   :  { %v8252_v4 = vld [vmem:[#allocation10 + $0x1e8] sm:$0xf] }
 0x275   :  { %v2880_v11 = vpop.f32.mrf.mxu2 }
 0x276   :  { %v2881_v31 = vadd.f32 %v2880_v11, %v2868_v45  ;;  %v7990_v45 = vld [vmem:[#allocation9 + $0x68] sm:$0xf0] }
 0x277   :  { %v7993_v1 = vor.u32 %v9915_v19, %v7990_v45  ;;  %v7974_v11 = vld [vmem:[#allocation9 + $0x48] sm:$0xf0]  ;;  %v8212_v19 = vld [vmem:[#allocation10 + $0x1a0] sm:$0xf]  ;;  %v9973_v45 = vld [vmem:[#allocation10 + $0x1ac] sm:$0xf0] }
 0x278   :  { %v7977_v38 = vor.u32 %v9911_v10, %v7974_v11  ;;  %v9969_v10 = vld [vmem:[#allocation10 + $0x18c] sm:$0xf0] }
 0x279   :  { %3315 = vmatpush.bf16.msra.mxu0 %v7993_v1  ;;  %v8214_v1 = vld [vmem:[#allocation10 + $0x1b0] sm:$0xf0] }
 0x27a   :  { %v8217_v11 = vor.u32 %v9971_v0, %v8214_v1  ;;  %v8153_v1 = vor.u32 %v9955_v51, %v8150_v26  ;;  %v8092_v26 = vld [vmem:[#allocation10 + $0xa8] sm:$0xf] }
 0x27d   :  { %v2882_v60 = vpop.f32.mrf.mxu2  ;;  %3316 = vmatpush.bf16.msra.mxu0 %v7985_v6  ;;  %v8213_v6 = vor.u32 %v9973_v45, %v8212_v19  ;;  %v9923_v19 = vld [vmem:[#allocation10 + $0x24] sm:$0xf]  ;;  %v8022_v45 = vld [vmem:[#allocation10 + $0x30] sm:$0xf0] }
 0x27e   :  { %v7973_v60 = vor.u32 %v9912_v8, %v7972_v7  ;;  %v8105_v7 = vor.u32 %v9943_v5, %v8102_v58  ;;  %v8196_v8 = vld [vmem:[#allocation10 + $0x180] sm:$0xf]  ;;  %v9982_v58 = vld [vmem:[#allocation10 + $0x1f4] sm:$0xf0] }
 0x280   :  { %3304 = vmatpush.bf16.msrb.mxu3 %v7973_v60  ;;  %v8084_v60 = vld [vmem:[#allocation10 + $0xa0] sm:$0xf] }
 0x281   :  { %3317 = vmatpush.bf16.msra.mxu0 %v7977_v38  ;;  %v9941_v38 = vld [vmem:[#allocation10 + $0xac] sm:$0xf0] }
 0x284   :  { %3305 = vmatpush.bf16.msrb.mxu3 %v7965_v15  ;;  %v8085_v15 = vor.u32 %v9941_v38, %v8084_v60  ;;  %v9921_v60 = vld [vmem:[#allocation10 + $0xc] sm:$0xf0]  ;;  %v9919_v38 = vld [vmem:[#allocation10 + $0x4] sm:$0xf] }
 0x285   :  { %3318 = vmatpush.bf16.msra.mxu0 %v7969_v16  ;;  %v8089_v16 = vor.u32 %v9939_v12, %v8086_v14 }
 0x286   :  { %3727 = vmatpush.bf16.msra.mxu1 %v8085_v15  ;;  %v8137_v15 = vor.u32 %v9951_v3, %v8134_v57  ;;  %v8076_v3 = vld [vmem:[#allocation10 + $0x88] sm:$0xf]  ;;  %v9938_v57 = vld [vmem:[#allocation10 + $0x94] sm:$0xf0] }
 0x2a2   :  { %v2841_v24 = vpop.f32.mrf.mxu3 }
 0x2a3   :  { %v2842_v27 = vadd.f32 %v2841_v24, %v2829_v23  ;;  %v7958_v23 = vld [vmem:[#allocation9 + $0x28] sm:$0xf0]  ;;  %v7957_v24 = vor.u32 %v9908_v47, %v7956_v17  ;;  %v8068_v17 = vld [vmem:[#allocation10 + $0x80] sm:$0xf]  ;;  %v8197_v47 = vor.u32 %v9969_v10, %v8196_v8  ;;  %v8025_v10 = vor.u32 %v9923_v19, %v8022_v45 }
 0x2a4   :  { %v9964_v19 = vld [vmem:[#allocation10 + $0x16c] sm:$0xf] }
 0x2a5   :  { %v2897_v28 = vmax.f32 %v2842_v27, 0.0  ;;  %v7961_v27 = vor.u32 %v9907_v21, %v7958_v23  ;;  %3306 = vmatpush.bf16.msrb.mxu3 %v7957_v24  ;;  %v9937_v21 = vld [vmem:[#allocation10 + $0x8c] sm:$0xf0]  ;;  %v9935_v23 = vld [vmem:[#allocation10 + $0x84] sm:$0xf] }
 0x2a6   :  { %v8070_v24 = vld [vmem:[#allocation10 + $0x90] sm:$0xf0] }
 0x2a7   :  { %v2932_v37 = vpack.c.bf16 %v2897_v28, %v2897_v28  ;;  %v10320_v28 = vld [vmem:[%s11003_s10] ss:$0 sm:$0xff]  ;;  %3319 = vmatpush.bf16.msra.mxu0 %v7961_v27  ;;  %v8201_v27 = vor.u32 %v9967_v2, %v8198_v13  ;;  %v8006_v2 = vld [vmem:[#allocation10 + $0x10] sm:$0xf0]  ;;  %v8124_v13 = vld [vmem:[#allocation10 + $0xe8] sm:$0xf] }
 0x2a9   :  { %3041 = vmatmul.bf16.vlgmr.msrb.gmra.mxu0 %v2932_v37 }
 0x2aa   :  { %v2843_v50 = vpop.f32.mrf.mxu3 }
 0x2b2   :  { %v2893_v20 = vpop.f32.mrf.mxu3 }
 0x2b3   :  { %v2894_v32 = vadd.f32 %v2893_v20, %v2881_v31 }
 0x2b5   :  { %v2898_v9 = vmax.f32 %v2894_v32, 0.0 }
 0x2b7   :  { %v2933_v33 = vpack.c.bf16 %v2898_v9, %v2898_v9  ;;  %v7948_v9 = vld [vmem:[#allocation9 + $0x10] sm:$0xf] }
 0x2b9   :  { %3054 = vmatmul.bf16.vlgmr.msrb.gmra.mxu1 %v2933_v33  ;;  %v9906_v33 = vld [vmem:[#allocation9 + $0x14] sm:$0xf0] }
 0x2ba   :  { %v2895_v34 = vpop.f32.mrf.mxu3  ;;  %v7949_v35 = vor.u32 %v9906_v33, %v7948_v9  ;;  %v8052_v9 = vld [vmem:[#allocation10 + $0x60] sm:$0xf] }
 0x2bb   :  { %v9905_v34 = vld [vmem:[#allocation9 + $0x14] sm:$0xf] }
 0x2bc   :  { %v7953_v40 = vor.u32 %v9905_v34, %v7950_v36  ;;  %3307 = vmatpush.bf16.msrb.mxu3 %v7949_v35  ;;  %v9933_v34 = vld [vmem:[#allocation10 + $0x6c] sm:$0xf0]  ;;  %v9931_v35 = vld [vmem:[#allocation10 + $0x64] sm:$0xf]  ;;  %v8054_v36 = vld [vmem:[#allocation10 + $0x70] sm:$0xf0] }
 0x2be   :  { %3320 = vmatpush.bf16.msra.mxu0 %v7953_v40 }
 0x2c0   :  { %3308 = vmatpush.bf16.msrb.mxu3 %v7941_v22  ;;  %v8166_v22 = vld [vmem:[#allocation10 + $0x150] sm:$0xf0] }
 0x326   :  { %v3042_v41 = vpop.f32.mrf.mxu0 }
 0x327   :  { %v3043_v44 = vadd.f32 %v10319_v42, %v3042_v41  ;;  %v7945_v41 = vor.u32 %v9903_v29, %v7942_v39  ;;  %v9981_v42 = vld [vmem:[#allocation10 + $0x1ec] sm:$0xf0]  ;;  %v9959_v29 = vld [vmem:[#allocation10 + $0x144] sm:$0xf]  ;;  %v8053_v39 = vor.u32 %v9933_v34, %v8052_v9 }
 0x329   :  { %3321 = vmatpush.bf16.msra.mxu0 %v7945_v41  ;;  %v8057_v41 = vor.u32 %v9931_v35, %v8054_v36  ;;  %v8220_v36 = vld [vmem:[#allocation10 + $0x1a8] sm:$0xf] }
 0x32e   :  { %v3044_v56 = vpop.f32.mrf.mxu0 }
 0x32f   :  { %v8244_v56 = vld [vmem:[#allocation10 + $0x1e0] sm:$0xf] }
 0x336   :  { %v3055_v46 = vpop.f32.mrf.mxu1 }
 0x337   :  { %v3056_v48 = vadd.f32 %v3055_v46, %v3043_v44  ;;  %v9979_v44 = vld [vmem:[#allocation10 + $0x1e4] sm:$0xf]  ;;  %v8245_v46 = vor.u32 %v9981_v42, %v8244_v56  ;;  %v8036_v56 = vld [vmem:[#allocation10 + $0x40] sm:$0xf]  ;;  %v8165_v42 = vor.u32 %v9961_v54, %v8164_v52  ;;  %v9972_v52 = vld [vmem:[#allocation10 + $0x1ac] sm:$0xf] }
 0x339   :  { %v3059_v30 = vmax.f32 %v3056_v48, 0.0  ;;  %v8246_v48 = vld [vmem:[#allocation10 + $0x1f0] sm:$0xf0]  ;;  %3738 = vmatpush.bf16.msrb.mxu2 %v8245_v46  ;;  %v9927_v46 = vld [vmem:[#allocation10 + $0x44] sm:$0xf] }
 0x33b   :  { %v3077_v43 = vpack.c.bf16 %v3059_v30, %v3059_v30  ;;  %v8228_v30 = vld [vmem:[#allocation10 + $0x1c0] sm:$0xf] }
 0x33d   :  { %3137 = vmatmul.bf16.vlgmr.msra.gmra.mxu2 %v3077_v43  ;;  %v9977_v43 = vld [vmem:[#allocation10 + $0x1cc] sm:$0xf0] }
 0x33e   :  { %v3057_v25 = vpop.f32.mrf.mxu1  ;;  %v8229_v53 = vor.u32 %v9977_v43, %v8228_v30  ;;  %v8169_v30 = vor.u32 %v9959_v29, %v8166_v22  ;;  %v8148_v43 = vld [vmem:[#allocation10 + $0x120] sm:$0xf]  ;;  %v8222_v29 = vld [vmem:[#allocation10 + $0x1b8] sm:$0xf0] }
 0x33f   :  { %v8249_v25 = vor.u32 %v9979_v44, %v8246_v48  ;;  %v9929_v44 = vld [vmem:[#allocation10 + $0x4c] sm:$0xf0]  ;;  %v8038_v48 = vld [vmem:[#allocation10 + $0x50] sm:$0xf0]  ;;  %v8225_v22 = vor.u32 %v9972_v52, %v8222_v29  ;;  %v8028_v52 = vld [vmem:[#allocation10 + $0x28] sm:$0xf] }
 0x340   :  { %3739 = vmatpush.bf16.msrb.mxu2 %v8229_v53  ;;  %v8037_v53 = vor.u32 %v9929_v44, %v8036_v56  ;;  %v8041_v55 = vor.u32 %v9927_v46, %v8038_v48  ;;  %v9944_v56 = vld [vmem:[#allocation10 + $0xcc] sm:$0xf]  ;;  %v8110_v44 = vld [vmem:[#allocation10 + $0xd8] sm:$0xf0]  ;;  %v8204_v48 = vld [vmem:[#allocation10 + $0x188] sm:$0xf] }
 0x341   :  { %3764 = vmatpush.bf16.msrb.mxu0 %v8249_v25  ;;  %v9957_v25 = vld [vmem:[#allocation10 + $0x12c] sm:$0xf0]  ;;  %v8113_v46 = vor.u32 %v9944_v56, %v8110_v44  ;;  %v9924_v29 = vld [vmem:[#allocation10 + $0x2c] sm:$0xf]  ;;  %v8012_v56 = vld [vmem:[#allocation10 + $0x8] sm:$0xf] }
 0x342   :  { %v8149_v59 = vor.u32 %v9957_v25, %v8148_v43  ;;  %v9968_v43 = vld [vmem:[#allocation10 + $0x18c] sm:$0xf] }
 0x343   :  { %v9920_v44 = vld [vmem:[#allocation10 + $0xc] sm:$0xf] }
 0x344   :  { %3740 = vmatpush.bf16.msrb.mxu2 %v8213_v6  ;;  %v9980_v6 = vld [vmem:[#allocation10 + $0x1ec] sm:$0xf] }
 0x345   :  { %3765 = vmatpush.bf16.msrb.mxu0 %v8233_v61  ;;  %v8132_v61 = vld [vmem:[#allocation10 + $0x100] sm:$0xf] }
 0x346   :  { %v8133_v14 = vor.u32 %v9953_v62, %v8132_v61  ;;  %v8188_v62 = vld [vmem:[#allocation10 + $0x168] sm:$0xf] }
 0x348   :  { %3741 = vmatpush.bf16.msrb.mxu2 %v8197_v47  ;;  %v8126_v47 = vld [vmem:[#allocation10 + $0xf8] sm:$0xf0] }
 0x349   :  { %3766 = vmatpush.bf16.msrb.mxu0 %v8217_v11  ;;  %v8004_v11 = vld [vmem:[#allocation10] sm:$0xf] }
 0x34d   :  { %3767 = vmatpush.bf16.msrb.mxu0 %v8201_v27  ;;  %v8236_v27 = vld [vmem:[#allocation10 + $0x1c8] sm:$0xf] }
 0x3c0   :  { %v3138_v37 = vpop.f32.mrf.mxu2 }
 0x3c1   :  { %v3139_v50 = vadd.f32 %v10320_v28, %v3138_v37  ;;  %v8180_v28 = vld [vmem:[#allocation10 + $0x160] sm:$0xf]  ;;  %v9965_v37 = vld [vmem:[#allocation10 + $0x16c] sm:$0xf0] }
 0x3c2   :  { %v8181_v33 = vor.u32 %v9965_v37, %v8180_v28  ;;  %v9978_v28 = vld [vmem:[#allocation10 + $0x1d4] sm:$0xf0]  ;;  %v9976_v37 = vld [vmem:[#allocation10 + $0x1cc] sm:$0xf] }
 0x3c3   :  { %v3142_v31 = vmax.f32 %v3139_v50, 0.0  ;;  %v9963_v50 = vld [vmem:[#allocation10 + $0x164] sm:$0xf]  ;;  %v8237_v34 = vor.u32 %v9978_v28, %v8236_v27  ;;  %v8044_v27 = vld [vmem:[#allocation10 + $0x48] sm:$0xf] }
 0x3c4   :  { %3742 = vmatpush.bf16.msrb.mxu2 %v8181_v33  ;;  %v9930_v28 = vld [vmem:[#allocation10 + $0x54] sm:$0xf0] }
 0x3c5   :  { %v3152_v20 = vpack.c.bf16 %v3142_v31, %v3142_v31  ;;  %v8182_v31 = vld [vmem:[#allocation10 + $0x170] sm:$0xf0] }
 0x3c6   :  { %v8185_v40 = vor.u32 %v9963_v50, %v8182_v31  ;;  %v8238_v50 = vld [vmem:[#allocation10 + $0x1d8] sm:$0xf0]  ;;  %v8005_v31 = vor.u32 %v9921_v60, %v8004_v11 }
 0x3c7   :  { %7937 = vmatmul.msk.bf16.vlgmr.msra.gmra.mxu3 %vm3180_vm1, %v3152_v20  ;;  %v8069_v20 = vor.u32 %v9937_v21, %v8068_v17  ;;  %v9948_v17 = vld [vmem:[#allocation10 + $0xec] sm:$0xf]  ;;  %v8241_v35 = vor.u32 %v9976_v37, %v8238_v50  ;;  %v8174_v60 = vld [vmem:[#allocation10 + $0x158] sm:$0xf0]  ;;  %v8045_v50 = vor.u32 %v9930_v28, %v8044_v27  ;;  %v8644_v27 = vld [vmem:[#allocation12 + $0x300] sm:$0xf] }
 0x3c8   :  { %v3140_v32 = vpop.f32.mrf.mxu2  ;;  %3751 = vmatpush.bf16.msra.mxu3 %v8121_v63  ;;  %3768 = vmatpush.bf16.msrb.mxu0 %v8185_v40  ;;  %v9925_v63 = vld [vmem:[#allocation10 + $0x2c] sm:$0xf0]  ;;  %v8129_v9 = vor.u32 %v9948_v17, %v8126_v47  ;;  %v9974_v40 = vld [vmem:[#allocation10 + $0x1b4] sm:$0xf0]  ;;  %v8156_v17 = vld [vmem:[#allocation10 + $0x128] sm:$0xf] }
 0x3c9   :  { %v8073_v32 = vor.u32 %v9935_v23, %v8070_v24  ;;  %3728 = vmatpush.bf16.msra.mxu1 %v8069_v20  ;;  %3743 = vmatpush.bf16.msrb.mxu2 %v8165_v42  ;;  %v8021_v8 = vor.u32 %v9925_v63, %v8020_v18  ;;  %v8253_v23 = vor.u32 %v9982_v58, %v8252_v4  ;;  %v9966_v63 = vld [vmem:[#allocation10 + $0x174] sm:$0xf0]  ;;  %v9936_v4 = vld [vmem:[#allocation10 + $0x8c] sm:$0xf]  ;;  %v8078_v58 = vld [vmem:[#allocation10 + $0x98] sm:$0xf0] }
 0x3ca   :  { %v8009_v20 = vor.u32 %v9919_v38, %v8006_v2  ;;  %v8221_v54 = vor.u32 %v9974_v40, %v8220_v36  ;;  %v8189_v45 = vor.u32 %v9966_v63, %v8188_v62  ;;  %v9934_v2 = vld [vmem:[#allocation10 + $0x74] sm:$0xf0]  ;;  %v8708_v62 = vld [vmem:[#allocation12 + $0x380] sm:$0xf] }
 0x3cb   :  { %v9958_v47 = vld [vmem:[#allocation10 + $0x134] sm:$0xf0]  ;;  %v10099_v63 = vld [vmem:[#allocation12 + $0x39c] sm:$0xf0] }
 0x3cc   :  { %3752 = vmatpush.bf16.msra.mxu3 %v8105_v7  ;;  %3769 = vmatpush.bf16.msrb.mxu0 %v8169_v30  ;;  %v8254_v7 = vld [vmem:[#allocation10 + $0x1f8] sm:$0xf0]  ;;  %v9970_v30 = vld [vmem:[#allocation10 + $0x194] sm:$0xf0]  ;;  %v10083_v28 = vld [vmem:[#allocation12 + $0x31c] sm:$0xf0] }
 0x3cd   :  { %3729 = vmatpush.bf16.msra.mxu1 %v8053_v39  ;;  %3744 = vmatpush.bf16.msrb.mxu2 %v8149_v59  ;;  %v8257_v24 = vor.u32 %v9980_v6, %v8254_v7  ;;  %v8108_v39 = vld [vmem:[#allocation10 + $0xc8] sm:$0xf]  ;;  %v8205_v25 = vor.u32 %v9970_v30, %v8204_v48  ;;  %v8094_v59 = vld [vmem:[#allocation10 + $0xb8] sm:$0xf0]  ;;  %v8081_v6 = vor.u32 %v9936_v4, %v8078_v58  ;;  %v8996_v4 = vld [vmem:[#allocation12 + $0x5c0] sm:$0xf] }
 0x3ce   :  { %v8172_v7 = vld [vmem:[#allocation10 + $0x148] sm:$0xf]  ;;  %v8014_v48 = vld [vmem:[#allocation10 + $0x18] sm:$0xf0] }
 0x3cf   :  { %v8017_v30 = vor.u32 %v9920_v44, %v8014_v48 }
 0x3d0   :  { %3753 = vmatpush.bf16.msra.mxu3 %v8089_v16  ;;  %3770 = vmatpush.bf16.msrb.mxu0 %v8153_v1  ;;  %v9950_v16 = vld [vmem:[#allocation10 + $0xf4] sm:$0xf0] }
 0x3d1   :  { %3730 = vmatpush.bf16.msra.mxu1 %v8037_v53  ;;  %3745 = vmatpush.bf16.msrb.mxu2 %v8133_v14  ;;  %v9942_v53 = vld [vmem:[#allocation10 + $0xb4] sm:$0xf0] }
 0x3d2   :  { %v8093_v18 = vor.u32 %v9942_v53, %v8092_v26  ;;  %v8740_v26 = vld [vmem:[#allocation12 + $0x3c0] sm:$0xf] }
 0x3d3   :  { %v10107_v53 = vld [vmem:[#allocation12 + $0x3dc] sm:$0xf0] }
 0x3d4   :  { %3754 = vmatpush.bf16.msra.mxu3 %v8073_v32  ;;  %v8125_v32 = vor.u32 %v9950_v16, %v8124_v13  ;;  %3771 = vmatpush.bf16.msrb.mxu0 %v8137_v15  ;;  %v9932_v13 = vld [vmem:[#allocation10 + $0x6c] sm:$0xf]  ;;  %v8062_v15 = vld [vmem:[#allocation10 + $0x78] sm:$0xf0] }
 0x3d5   :  { %3731 = vmatpush.bf16.msra.mxu1 %v8021_v8  ;;  %3790 = vmatpush.bf16.msra.mxu2 %v8253_v23  ;;  %v9962_v8 = vld [vmem:[#allocation10 + $0x154] sm:$0xf0]  ;;  %v8065_v16 = vor.u32 %v9932_v13, %v8062_v15  ;;  %v8157_v23 = vor.u32 %v9958_v47, %v8156_v17  ;;  %v10035_v15 = vld [vmem:[#allocation12 + $0x19c] sm:$0xf0] }
 0x3d6   :  { %v8173_v11 = vor.u32 %v9962_v8, %v8172_v7  ;;  %v8709_v7 = vor.u32 %v10099_v63, %v8708_v62  ;;  %v8676_v8 = vld [vmem:[#allocation12 + $0x340] sm:$0xf] }
 0x3d7   :  { %v10163_v17 = vld [vmem:[#allocation12 + $0x59c] sm:$0xf0] }
 0x3d8   :  { %3755 = vmatpush.bf16.msra.mxu3 %v8057_v41  ;;  %v9946_v41 = vld [vmem:[#allocation10 + $0xd4] sm:$0xf0]  ;;  %v8548_v62 = vld [vmem:[#allocation12 + $0x240] sm:$0xf] }
 0x3d9   :  { %3732 = vmatpush.bf16.msra.mxu1 %v8005_v31  ;;  %3791 = vmatpush.bf16.msra.mxu2 %v8237_v34  ;;  %v8109_v42 = vor.u32 %v9946_v41, %v8108_v39  ;;  %v9928_v31 = vld [vmem:[#allocation10 + $0x4c] sm:$0xf]  ;;  %v8030_v39 = vld [vmem:[#allocation10 + $0x38] sm:$0xf0] }
 0x3da   :  { %v9952_v34 = vld [vmem:[#allocation10 + $0x10c] sm:$0xf]  ;;  %v8033_v41 = vor.u32 %v9924_v29, %v8030_v39 }
 0x3dc   :  { %3756 = vmatpush.bf16.msra.mxu3 %v8041_v55  ;;  %v9940_v55 = vld [vmem:[#allocation10 + $0xac] sm:$0xf] }
 0x3dd   :  { %3777 = vmatpush.bf16.msrb.mxu1 %v8125_v32  ;;  %3792 = vmatpush.bf16.msra.mxu2 %v8221_v54  ;;  %v8097_v61 = vor.u32 %v9940_v55, %v8094_v59  ;;  %v8140_v32 = vld [vmem:[#allocation10 + $0x108] sm:$0xf]  ;;  %v9926_v54 = vld [vmem:[#allocation10 + $0x34] sm:$0xf0]  ;;  %v8741_v59 = vor.u32 %v10107_v53, %v8740_v26  ;;  %v10011_v53 = vld [vmem:[#allocation12 + $0xdc] sm:$0xf0] }
 0x3e0   :  { %3757 = vmatpush.bf16.msra.mxu3 %v8025_v10  ;;  %v9960_v10 = vld [vmem:[#allocation10 + $0x14c] sm:$0xf] }
 0x3e1   :  { %3778 = vmatpush.bf16.msrb.mxu1 %v8109_v42  ;;  %3793 = vmatpush.bf16.msra.mxu2 %v8205_v25  ;;  %v8177_v38 = vor.u32 %v9960_v10, %v8174_v60  ;;  %v9922_v42 = vld [vmem:[#allocation10 + $0x14] sm:$0xf0]  ;;  %v9220_v10 = vld [vmem:[#allocation12 + $0x780] sm:$0xf] }
 0x3e2   :  { %v10091_v60 = vld [vmem:[#allocation12 + $0x35c] sm:$0xf0] }
 0x3e4   :  { %3758 = vmatpush.bf16.msra.mxu3 %v8009_v20  ;;  %v8046_v20 = vld [vmem:[#allocation10 + $0x58] sm:$0xf0] }
 0x3e5   :  { %3779 = vmatpush.bf16.msrb.mxu1 %v8093_v18  ;;  %3794 = vmatpush.bf16.msra.mxu2 %v8189_v45  ;;  %v8484_v45 = vld [vmem:[#allocation12 + $0x1c0] sm:$0xf] }
 0x3e9   :  { %3795 = vmatpush.bf16.msra.mxu2 %v8173_v11 }
 0x3ed   :  { %3796 = vmatpush.bf16.msra.mxu2 %v8157_v23  ;;  %v9188_v23 = vld [vmem:[#allocation12 + $0x740] sm:$0xf] }
 0x44a   :  { %v3193_v0 = vpop.f32.mrf.mxu3 }
 0x44b   :  { %v3194_v5 = vadd.f32 %v10321_v49, %v3193_v0  ;;  %v8206_v49 = vld [vmem:[#allocation10 + $0x198] sm:$0xf0] }
 0x44c   :  { %v8209_v51 = vor.u32 %v9968_v43, %v8206_v49  ;;  %v8190_v0 = vld [vmem:[#allocation10 + $0x178] sm:$0xf0]  ;;  %v3214_v43 = vld [vmem:[%s11007_s14] sm:$0x3] }
 0x44d   :  { %v3197_v12 = vmax.f32 %v3194_v5, 0.0  ;;  %v8193_v1 = vor.u32 %v9964_v19, %v8190_v0  ;;  %v8077_v5 = vor.u32 %v9938_v57, %v8076_v3  ;;  %v3218_v25 = vperm.slane %v3214_v43, 1  ;;  %v9252_v0 = vld [vmem:[#allocation12 + $0x7c0] sm:$0xf] }
 0x44e   :  { %v3217_v18 = vperm.slane %v3214_v43, 0  ;;  %v10043_v57 = vld [vmem:[#allocation12 + $0x1dc] sm:$0xf0] }
 0x44f   :  { %v3215_v21 = vpack.c.bf16 %v3197_v12, %v3197_v12  ;;  %3780 = vmatpush.bf16.msrb.mxu1 %v8077_v5  ;;  %v8060_v12 = vld [vmem:[#allocation10 + $0x68] sm:$0xf]  ;;  %v10171_v5 = vld [vmem:[#allocation12 + $0x5dc] sm:$0xf0] }
 0x450   :  { %v8061_v14 = vor.u32 %v9934_v2, %v8060_v12  ;;  %v8485_v12 = vor.u32 %v10043_v57, %v8484_v45  ;;  %v8452_v2 = vld [vmem:[#allocation12 + $0x180] sm:$0xf]  ;;  %v8997_v13 = vor.u32 %v10171_v5, %v8996_v4 }
 0x451   :  { %3309 = vmatmul.bf16.vlgmr.msrb.gmra.mxu3 %v3215_v21  ;;  %3322 = vmatmul.bf16.vlgmr.msra.gmra.mxu0 %v3215_v21  ;;  %v9956_v21 = vld [vmem:[#allocation10 + $0x12c] sm:$0xf]  ;;  %v9124_v43 = vld [vmem:[#allocation12 + $0x6c0] sm:$0xf] }
 0x452   :  { %v3195_v33 = vpop.f32.mrf.mxu3  ;;  %3816 = vmatpush.bf16.msra.mxu0 %v8257_v24  ;;  %3803 = vmatpush.bf16.msrb.mxu3 %v8129_v9  ;;  %v8158_v24 = vld [vmem:[#allocation10 + $0x138] sm:$0xf0]  ;;  %v8049_v9 = vor.u32 %v9928_v31, %v8046_v20  ;;  %v8420_v31 = vld [vmem:[#allocation12 + $0x140] sm:$0xf] }
 0x453   :  { %3781 = vmatpush.bf16.msrb.mxu1 %v8061_v14  ;;  %v8161_v37 = vor.u32 %v9956_v21, %v8158_v24  ;;  %v9954_v33 = vld [vmem:[#allocation10 + $0x114] sm:$0xf0]  ;;  %v8677_v21 = vor.u32 %v10091_v60, %v8676_v8  ;;  %v10219_v24 = vld [vmem:[#allocation12 + $0x75c] sm:$0xf0]  ;;  %v10103_v60 = vld [vmem:[#allocation12 + $0x3c4] sm:$0xf] }
 0x454   :  { %v8141_v36 = vor.u32 %v9954_v33, %v8140_v32  ;;  %v10027_v32 = vld [vmem:[#allocation12 + $0x15c] sm:$0xf0] }
 0x455   :  { %v10155_v33 = vld [vmem:[#allocation12 + $0x55c] sm:$0xf0]  ;;  %v8421_v29 = vor.u32 %v10027_v32, %v8420_v31  ;;  %v10031_v32 = vld [vmem:[#allocation12 + $0x184] sm:$0xf] }
 0x456   :  { %3817 = vmatpush.bf16.msra.mxu0 %v8241_v35  ;;  %3804 = vmatpush.bf16.msrb.mxu3 %v8113_v46  ;;  %v8142_v35 = vld [vmem:[#allocation10 + $0x118] sm:$0xf0]  ;;  %v8013_v46 = vor.u32 %v9922_v42, %v8012_v56  ;;  %v8900_v56 = vld [vmem:[#allocation12 + $0x500] sm:$0xf] }
 0x457   :  { %v8145_v40 = vor.u32 %v9952_v34, %v8142_v35  ;;  %3782 = vmatpush.bf16.msrb.mxu1 %v8045_v50  ;;  %3797 = vmatpush.bf16.msra.mxu2 %v8141_v36  ;;  %v8453_v50 = vor.u32 %v10035_v15, %v8452_v2  ;;  %v9189_v34 = vor.u32 %v10219_v24, %v9188_v23  ;;  %v8612_v36 = vld [vmem:[#allocation12 + $0x2c0] sm:$0xf] }
 0x458   :  { %v8645_v35 = vor.u32 %v10083_v28, %v8644_v27  ;;  %v10147_v42 = vld [vmem:[#allocation12 + $0x51c] sm:$0xf0]  ;;  %v10039_v28 = vld [vmem:[#allocation12 + $0x1c4] sm:$0xf] }
 0x459   :  { %v8901_v26 = vor.u32 %v10147_v42, %v8900_v56  ;;  %v9092_v45 = vld [vmem:[#allocation12 + $0x680] sm:$0xf] }
 0x45a   :  { %3818 = vmatpush.bf16.msra.mxu0 %v8225_v22  ;;  %3805 = vmatpush.bf16.msrb.mxu3 %v8097_v61  ;;  %v8029_v22 = vor.u32 %v9926_v54, %v8028_v52  ;;  %v9156_v52 = vld [vmem:[#allocation12 + $0x700] sm:$0xf] }
 0x45b   :  { %v10211_v54 = vld [vmem:[#allocation12 + $0x71c] sm:$0xf0] }
 0x45c   :  { %3783 = vmatpush.bf16.msrb.mxu1 %v8029_v22  ;;  %v8388_v22 = vld [vmem:[#allocation12 + $0x100] sm:$0xf]  ;;  %v9157_v48 = vor.u32 %v10211_v54, %v9156_v52  ;;  %v8390_v52 = vld [vmem:[#allocation12 + $0x120] sm:$0xf0] }
 0x45d   :  { %v10003_v4 = vld [vmem:[#allocation12 + $0x9c] sm:$0xf0] }
 0x45e   :  { %3819 = vmatpush.bf16.msra.mxu0 %v8209_v51  ;;  %3806 = vmatpush.bf16.msrb.mxu3 %v8081_v6  ;;  %v8836_v5 = vld [vmem:[#allocation12 + $0x480] sm:$0xf] }
 0x45f   :  { %v10051_v8 = vld [vmem:[#allocation12 + $0x21c] sm:$0xf0] }
 0x460   :  { %3784 = vmatpush.bf16.msrb.mxu1 %v8013_v46  ;;  %v8580_v46 = vld [vmem:[#allocation12 + $0x280] sm:$0xf] }
 0x461   :  { %v9995_v2 = vld [vmem:[#allocation12 + $0x5c] sm:$0xf0] }
 0x462   :  { %3820 = vmatpush.bf16.msra.mxu0 %v8193_v1  ;;  %3807 = vmatpush.bf16.msrb.mxu3 %v8065_v16  ;;  %v10235_v1 = vld [vmem:[#allocation12 + $0x7dc] sm:$0xf0] }
 0x463   :  { %v9253_v58 = vor.u32 %v10235_v1, %v9252_v0  ;;  %v8964_v16 = vld [vmem:[#allocation12 + $0x580] sm:$0xf] }
 0x464   :  { %v8965_v20 = vor.u32 %v10163_v17, %v8964_v16  ;;  %v10195_v0 = vld [vmem:[#allocation12 + $0x69c] sm:$0xf0] }
 0x465   :  { %v10123_v15 = vld [vmem:[#allocation12 + $0x45c] sm:$0xf0] }
 0x466   :  { %3821 = vmatpush.bf16.msra.mxu0 %v8177_v38  ;;  %3808 = vmatpush.bf16.msrb.mxu3 %v8049_v9  ;;  %v10227_v38 = vld [vmem:[#allocation12 + $0x79c] sm:$0xf0] }
 0x467   :  { %v9221_v47 = vor.u32 %v10227_v38, %v9220_v10  ;;  %v8932_v9 = vld [vmem:[#allocation12 + $0x540] sm:$0xf]  ;;  %v8742_v38 = vld [vmem:[#allocation12 + $0x3e0] sm:$0xf0] }
 0x468   :  { %v8933_v39 = vor.u32 %v10155_v33, %v8932_v9  ;;  %v8745_v17 = vor.u32 %v10103_v60, %v8742_v38  ;;  %v8260_v24 = vld [vmem:[#allocation12] sm:$0xf]  ;;  %v8454_v9 = vld [vmem:[#allocation12 + $0x1a0] sm:$0xf0] }
 0x469   :  { %v9987_v27 = vld [vmem:[#allocation12 + $0x1c] sm:$0xf0]  ;;  %v8457_v33 = vor.u32 %v10031_v32, %v8454_v9  ;;  %v8934_v38 = vld [vmem:[#allocation12 + $0x560] sm:$0xf0] }
 0x46a   :  { %3822 = vmatpush.bf16.msra.mxu0 %v8161_v37  ;;  %3809 = vmatpush.bf16.msrb.mxu3 %v8033_v41  ;;  %v10019_v41 = vld [vmem:[#allocation12 + $0x11c] sm:$0xf0]  ;;  %v8261_v31 = vor.u32 %v9987_v27, %v8260_v24  ;;  %v10143_v24 = vld [vmem:[#allocation12 + $0x504] sm:$0xf] }
 0x46b   :  { %v10115_v56 = vld [vmem:[#allocation12 + $0x41c] sm:$0xf0]  ;;  %v8902_v27 = vld [vmem:[#allocation12 + $0x520] sm:$0xf0] }
 0x46c   :  { %v9190_v32 = vld [vmem:[#allocation12 + $0x760] sm:$0xf0] }
 0x46e   :  { %3823 = vmatpush.bf16.msra.mxu0 %v8145_v40  ;;  %3810 = vmatpush.bf16.msrb.mxu3 %v8017_v30  ;;  %v10075_v40 = vld [vmem:[#allocation12 + $0x2dc] sm:$0xf0] }
 0x46f   :  { %v8613_v44 = vor.u32 %v10075_v40, %v8612_v36  ;;  %v10067_v30 = vld [vmem:[#allocation12 + $0x29c] sm:$0xf0]  ;;  %v10015_v40 = vld [vmem:[#allocation12 + $0x104] sm:$0xf] }
 0x470   :  { %v8393_v54 = vor.u32 %v10015_v40, %v8390_v52  ;;  %v8518_v40 = vld [vmem:[#allocation12 + $0x220] sm:$0xf0] }
 0x471   :  { %v10207_v52 = vld [vmem:[#allocation12 + $0x704] sm:$0xf] }
 0x4ce   :  { %v3323_v49 = vpop.f32.mrf.mxu0 }
 0x4cf   :  { %v3324_v51 = vadd.f32 %v3323_v49, %v3218_v25  ;;  %v10203_v25 = vld [vmem:[#allocation12 + $0x6dc] sm:$0xf0]  ;;  %v8389_v49 = vor.u32 %v10019_v41, %v8388_v22  ;;  %v8678_v22 = vld [vmem:[#allocation12 + $0x360] sm:$0xf0] }
 0x4d0   :  { %v9125_v63 = vor.u32 %v10203_v25, %v9124_v43  ;;  %v8772_v41 = vld [vmem:[#allocation12 + $0x400] sm:$0xf]  ;;  %v8998_v43 = vld [vmem:[#allocation12 + $0x5e0] sm:$0xf0] }
 0x4d1   :  { %v3328_v55 = vmax.f32 %v3324_v51, 0.0  ;;  %v8356_v51 = vld [vmem:[#allocation12 + $0xc0] sm:$0xf]  ;;  %v8773_v42 = vor.u32 %v10115_v56, %v8772_v41  ;;  %v8838_v41 = vld [vmem:[#allocation12 + $0x4a0] sm:$0xf0] }
 0x4d2   :  { %v8357_v1 = vor.u32 %v10011_v53, %v8356_v51  ;;  %v9060_v25 = vld [vmem:[#allocation12 + $0x640] sm:$0xf]  ;;  %v10079_v53 = vld [vmem:[#allocation12 + $0x304] sm:$0xf] }
 0x4d3   :  { %v10874_v61 = vpack.c.bf16 %v3328_v55, %v3328_v55  ;;  %v8868_v55 = vld [vmem:[#allocation12 + $0x4c0] sm:$0xf] }
 0x4d4   :  { %v3310_v19 = vpop.f32.mrf.mxu3 }
 0x4d5   :  { %v3311_v3 = vadd.f32 %v3310_v19, %v3217_v18  ;;  %3746 = vmatmul.bf16.vlgmr.msrb.gmra.mxu2 %v10874_v61  ;;  %3772 = vmatmul.bf16.vlgmr.msrb.gmra.mxu0 %v10874_v61  ;;  %v10139_v18 = vld [vmem:[#allocation12 + $0x4dc] sm:$0xf0] }
 0x4d6   :  { %v3325_v6 = vpop.f32.mrf.mxu0  ;;  %5404 = vmatpush.bf16.msrb.mxu2 %v8741_v59  ;;  %5430 = vmatpush.bf16.msrb.mxu0 %v9253_v58  ;;  %v8581_v59 = vor.u32 %v10067_v30, %v8580_v46  ;;  %v10059_v19 = vld [vmem:[#allocation12 + $0x25c] sm:$0xf0]  ;;  %v8869_v57 = vor.u32 %v10139_v18, %v8868_v55  ;;  %v8358_v46 = vld [vmem:[#allocation12 + $0xe0] sm:$0xf0] }
 0x4d7   :  { %v3327_v11 = vmax.f32 %v3311_v3, 0.0  ;;  %v8324_v3 = vld [vmem:[#allocation12 + $0x80] sm:$0xf]  ;;  %v9093_v6 = vor.u32 %v10195_v0, %v9092_v45  ;;  %v8646_v55 = vld [vmem:[#allocation12 + $0x320] sm:$0xf0] }
 0x4d8   :  { %v10131_v58 = vld [vmem:[#allocation12 + $0x49c] sm:$0xf0]  ;;  %v8325_v10 = vor.u32 %v10003_v4, %v8324_v3  ;;  %v8649_v18 = vor.u32 %v10079_v53, %v8646_v55  ;;  %v8966_v45 = vld [vmem:[#allocation12 + $0x5a0] sm:$0xf0] }
 0x4d9   :  { %v10878_v14 = vpack.c.bf16 %v3327_v11, %v3327_v11  ;;  %v8292_v11 = vld [vmem:[#allocation12 + $0x40] sm:$0xf]  ;;  %v10071_v4 = vld [vmem:[#allocation12 + $0x2c4] sm:$0xf] }
 0x4da   :  { %5405 = vmatpush.bf16.msrb.mxu2 %v8709_v7  ;;  %5431 = vmatpush.bf16.msrb.mxu0 %v9221_v47  ;;  %v8516_v7 = vld [vmem:[#allocation12 + $0x200] sm:$0xf]  ;;  %v8293_v47 = vor.u32 %v9995_v2, %v8292_v11  ;;  %v10151_v11 = vld [vmem:[#allocation12 + $0x544] sm:$0xf] }
 0x4db   :  { %3733 = vmatmul.bf16.vlgmr.msra.gmra.mxu1 %v10878_v14  ;;  %3759 = vmatmul.bf16.vlgmr.msra.gmra.mxu3 %v10878_v14  ;;  %v8517_v16 = vor.u32 %v10051_v8, %v8516_v7  ;;  %v9028_v0 = vld [vmem:[#allocation12 + $0x600] sm:$0xf]  ;;  %v9991_v8 = vld [vmem:[#allocation12 + $0x44] sm:$0xf] }
 0x4dc   :  { %v3312_v37 = vpop.f32.mrf.mxu3  ;;  %5391 = vmatpush.bf16.msra.mxu1 %v8485_v12  ;;  %5417 = vmatpush.bf16.msra.mxu3 %v8997_v13  ;;  %v8837_v12 = vor.u32 %v10131_v58, %v8836_v5  ;;  %v8804_v13 = vld [vmem:[#allocation12 + $0x440] sm:$0xf]  ;;  %v8614_v5 = vld [vmem:[#allocation12 + $0x2e0] sm:$0xf0] }
 0x4dd   :  { %v8805_v23 = vor.u32 %v10123_v15, %v8804_v13  ;;  %v8486_v37 = vld [vmem:[#allocation12 + $0x1e0] sm:$0xf0] }
 0x4de   :  { %5406 = vmatpush.bf16.msrb.mxu2 %v8677_v21  ;;  %5432 = vmatpush.bf16.msrb.mxu0 %v9189_v34  ;;  %v8710_v21 = vld [vmem:[#allocation12 + $0x3a0] sm:$0xf0] }
 0x4df   :  { %v10023_v34 = vld [vmem:[#allocation12 + $0x144] sm:$0xf] }
 0x4e0   :  { %5392 = vmatpush.bf16.msra.mxu1 %v8453_v50  ;;  %5418 = vmatpush.bf16.msra.mxu3 %v8965_v20  ;;  %v8489_v20 = vor.u32 %v10039_v28, %v8486_v37  ;;  %v10231_v58 = vld [vmem:[#allocation12 + $0x7c4] sm:$0xf]  ;;  %v8905_v28 = vor.u32 %v10143_v24, %v8902_v27  ;;  %v8428_v27 = vld [vmem:[#allocation12 + $0x148] sm:$0xf] }
 0x4e1   :  { %v10063_v2 = vld [vmem:[#allocation12 + $0x284] sm:$0xf] }
 0x4e2   :  { %5407 = vmatpush.bf16.msrb.mxu2 %v8645_v35  ;;  %5433 = vmatpush.bf16.msrb.mxu0 %v9157_v48  ;;  %v8422_v35 = vld [vmem:[#allocation12 + $0x160] sm:$0xf0] }
 0x4e3   :  { %v8425_v36 = vor.u32 %v10023_v34, %v8422_v35  ;;  %v10167_v48 = vld [vmem:[#allocation12 + $0x5c4] sm:$0xf] }
 0x4e4   :  { %5393 = vmatpush.bf16.msra.mxu1 %v8421_v29  ;;  %5419 = vmatpush.bf16.msra.mxu3 %v8933_v39  ;;  %v10087_v29 = vld [vmem:[#allocation12 + $0x344] sm:$0xf]  ;;  %v9001_v51 = vor.u32 %v10167_v48, %v8998_v43 }
 0x4e5   :  { %3798 = vmatmul.bf16.vlgmr.msra.gmra.mxu2 %v10874_v61  ;;  %3824 = vmatmul.bf16.vlgmr.msra.gmra.mxu0 %v10874_v61  ;;  %v8549_v61 = vor.u32 %v10059_v19, %v8548_v62  ;;  %v8681_v39 = vor.u32 %v10087_v29, %v8678_v22  ;;  %v8326_v62 = vld [vmem:[#allocation12 + $0xa0] sm:$0xf0] }
 0x4e6   :  { %5408 = vmatpush.bf16.msrb.mxu2 %v8613_v44  ;;  %5434 = vmatpush.bf16.msrb.mxu0 %v9125_v63  ;;  %v10007_v44 = vld [vmem:[#allocation12 + $0xc4] sm:$0xf] }
 0x4e7   :  { %v8361_v30 = vor.u32 %v10007_v44, %v8358_v46  ;;  %v10159_v63 = vld [vmem:[#allocation12 + $0x584] sm:$0xf] }
 0x4e8   :  { %5394 = vmatpush.bf16.msra.mxu1 %v8389_v49  ;;  %5420 = vmatpush.bf16.msra.mxu3 %v8901_v26  ;;  %v10187_v49 = vld [vmem:[#allocation12 + $0x65c] sm:$0xf0]  ;;  %v8969_v3 = vor.u32 %v10159_v63, %v8966_v45  ;;  %v8582_v13 = vld [vmem:[#allocation12 + $0x2a0] sm:$0xf0] }
 0x4e9   :  { %v9061_v26 = vor.u32 %v10187_v49, %v9060_v25  ;;  %v10223_v15 = vld [vmem:[#allocation12 + $0x784] sm:$0xf] }
 0x4ea   :  { %5409 = vmatpush.bf16.msrb.mxu2 %v8581_v59  ;;  %5435 = vmatpush.bf16.msrb.mxu0 %v9093_v6  ;;  %v9999_v59 = vld [vmem:[#allocation12 + $0x84] sm:$0xf] }
 0x4eb   :  { %3785 = vmatmul.bf16.vlgmr.msrb.gmra.mxu1 %v10878_v14  ;;  %3811 = vmatmul.bf16.vlgmr.msrb.gmra.mxu3 %v10878_v14  ;;  %v10095_v14 = vld [vmem:[#allocation12 + $0x384] sm:$0xf]  ;;  %v8329_v19 = vor.u32 %v9999_v59, %v8326_v62 }
 0x4ec   :  { %5395 = vmatpush.bf16.msra.mxu1 %v8357_v1  ;;  %5421 = vmatpush.bf16.msra.mxu3 %v8869_v57  ;;  %v8713_v50 = vor.u32 %v10095_v14, %v8710_v21  ;;  %v10179_v1 = vld [vmem:[#allocation12 + $0x61c] sm:$0xf0]  ;;  %v9254_v6 = vld [vmem:[#allocation12 + $0x7e0] sm:$0xf0] }
 0x4ed   :  { %v9029_v57 = vor.u32 %v10179_v1, %v9028_v0  ;;  %v9257_v7 = vor.u32 %v10231_v58, %v9254_v6  ;;  %v9983_v14 = vld [vmem:[#allocation12 + $0x4] sm:$0xf] }
 0x4ee   :  { %5410 = vmatpush.bf16.msrb.mxu2 %v8549_v61  ;;  %5436 = vmatpush.bf16.msrb.mxu0 %v9061_v26  ;;  %v8617_v61 = vor.u32 %v10071_v4, %v8614_v5  ;;  %v8262_v21 = vld [vmem:[#allocation12 + $0x20] sm:$0xf0] }
 0x4ef   :  { %v10055_v37 = vld [vmem:[#allocation12 + $0x244] sm:$0xf] }
 0x4f0   :  { %5396 = vmatpush.bf16.msra.mxu1 %v8325_v10  ;;  %5422 = vmatpush.bf16.msra.mxu3 %v8837_v12  ;;  %v8294_v10 = vld [vmem:[#allocation12 + $0x60] sm:$0xf0]  ;;  %v8937_v12 = vor.u32 %v10151_v11, %v8934_v38 }
 0x4f1   :  { %v8297_v60 = vor.u32 %v9991_v8, %v8294_v10  ;;  %v8870_v34 = vld [vmem:[#allocation12 + $0x4e0] sm:$0xf0]  ;;  %v10044_v8 = vld [vmem:[#allocation12 + $0x1e4] sm:$0xf0] }
 0x4f2   :  { %5411 = vmatpush.bf16.msrb.mxu2 %v8517_v16  ;;  %5437 = vmatpush.bf16.msrb.mxu0 %v9029_v57  ;;  %v8585_v16 = vor.u32 %v10063_v2, %v8582_v13  ;;  %v9158_v29 = vld [vmem:[#allocation12 + $0x720] sm:$0xf0]  ;;  %v8460_v2 = vld [vmem:[#allocation12 + $0x188] sm:$0xf] }
 0x4f3   :  { %v9161_v22 = vor.u32 %v10207_v52, %v9158_v29  ;;  %v9126_v44 = vld [vmem:[#allocation12 + $0x6e0] sm:$0xf0]  ;;  %v10036_v13 = vld [vmem:[#allocation12 + $0x1a4] sm:$0xf0] }
 0x4f4   :  { %5397 = vmatpush.bf16.msra.mxu1 %v8293_v47  ;;  %5423 = vmatpush.bf16.msra.mxu3 %v8805_v23  ;;  %v8265_v23 = vor.u32 %v9983_v14, %v8262_v21  ;;  %v10119_v48 = vld [vmem:[#allocation12 + $0x444] sm:$0xf]  ;;  %v10108_v14 = vld [vmem:[#allocation12 + $0x3e4] sm:$0xf0] }
 0x4f5   :  { %v10191_v25 = vld [vmem:[#allocation12 + $0x684] sm:$0xf]  ;;  %v8684_v29 = vld [vmem:[#allocation12 + $0x348] sm:$0xf] }
 0x4f6   :  { %5456 = vmatpush.bf16.msra.mxu2 %v8745_v17  ;;  %5482 = vmatpush.bf16.msra.mxu0 %v9257_v7  ;;  %v9222_v17 = vld [vmem:[#allocation12 + $0x7a0] sm:$0xf0]  ;;  %v8492_v7 = vld [vmem:[#allocation12 + $0x1c8] sm:$0xf] }
 0x4f7   :  { %v9225_v47 = vor.u32 %v10223_v15, %v9222_v17  ;;  %v9094_v49 = vld [vmem:[#allocation12 + $0x6a0] sm:$0xf0] }
 0x4f8   :  { %5398 = vmatpush.bf16.msra.mxu1 %v8261_v31  ;;  %5424 = vmatpush.bf16.msra.mxu3 %v8773_v42  ;;  %v10199_v42 = vld [vmem:[#allocation12 + $0x6c4] sm:$0xf] }
 0x4f9   :  { %v9129_v46 = vor.u32 %v10199_v42, %v9126_v44  ;;  %v10111_v26 = vld [vmem:[#allocation12 + $0x404] sm:$0xf]  ;;  %v8364_v42 = vld [vmem:[#allocation12 + $0xc8] sm:$0xf] }
 0x4fa   :  { %5457 = vmatpush.bf16.msra.mxu2 %v8713_v50  ;;  %5483 = vmatpush.bf16.msra.mxu0 %v9225_v47  ;;  %v8550_v50 = vld [vmem:[#allocation12 + $0x260] sm:$0xf0]  ;;  %v8748_v47 = vld [vmem:[#allocation12 + $0x3c8] sm:$0xf] }
 0x4fb   :  { %v8553_v31 = vor.u32 %v10055_v37, %v8550_v50  ;;  %v8774_v53 = vld [vmem:[#allocation12 + $0x420] sm:$0xf0]  ;;  %v8749_v37 = vor.u32 %v10108_v14, %v8748_v47  ;;  %v9228_v47 = vld [vmem:[#allocation12 + $0x788] sm:$0xf] }
 0x4fc   :  { %5443 = vmatpush.bf16.msrb.mxu1 %v8489_v20  ;;  %5469 = vmatpush.bf16.msrb.mxu3 %v9001_v51  ;;  %v10215_v20 = vld [vmem:[#allocation12 + $0x744] sm:$0xf]  ;;  %v9097_v51 = vor.u32 %v10191_v25, %v9094_v49  ;;  %v8777_v55 = vor.u32 %v10111_v26, %v8774_v53  ;;  %v8652_v49 = vld [vmem:[#allocation12 + $0x308] sm:$0xf] }
 0x4fd   :  { %v9193_v9 = vor.u32 %v10215_v20, %v9190_v32  ;;  %v9062_v59 = vld [vmem:[#allocation12 + $0x660] sm:$0xf0]  ;;  %v8716_v20 = vld [vmem:[#allocation12 + $0x388] sm:$0xf] }
 0x4fe   :  { %5458 = vmatpush.bf16.msra.mxu2 %v8681_v39  ;;  %v10127_v39 = vld [vmem:[#allocation12 + $0x484] sm:$0xf]  ;;  %v10100_v32 = vld [vmem:[#allocation12 + $0x3a4] sm:$0xf0] }
 0x4ff   :  { %5484 = vmatpush.bf16.msra.mxu0 %v9193_v9  ;;  %v8841_v56 = vor.u32 %v10127_v39, %v8838_v41  ;;  %v10175_v45 = vld [vmem:[#allocation12 + $0x604] sm:$0xf]  ;;  %v8717_v52 = vor.u32 %v10100_v32, %v8716_v20  ;;  %v10228_v14 = vld [vmem:[#allocation12 + $0x7a4] sm:$0xf0] }
 0x500   :  { %5444 = vmatpush.bf16.msrb.mxu1 %v8457_v33  ;;  %5470 = vmatpush.bf16.msrb.mxu3 %v8969_v3  ;;  %v10135_v33 = vld [vmem:[#allocation12 + $0x4c4] sm:$0xf]  ;;  %v9229_v32 = vor.u32 %v10228_v14, %v9228_v47  ;;  %v10116_v47 = vld [vmem:[#allocation12 + $0x424] sm:$0xf0]  ;;  %v10008_v14 = vld [vmem:[#allocation12 + $0xcc] sm:$0xf] }
 0x501   :  { %v8873_v35 = vor.u32 %v10135_v33, %v8870_v34  ;;  %v9030_v0 = vld [vmem:[#allocation12 + $0x620] sm:$0xf0]  ;;  %v8396_v34 = vld [vmem:[#allocation12 + $0x108] sm:$0xf] }
 0x502   :  { %5459 = vmatpush.bf16.msra.mxu2 %v8649_v18  ;;  %v10183_v18 = vld [vmem:[#allocation12 + $0x644] sm:$0xf]  ;;  %v9033_v3 = vor.u32 %v10175_v45, %v9030_v0  ;;  %v10164_v45 = vld [vmem:[#allocation12 + $0x5a4] sm:$0xf0] }
 0x503   :  { %5485 = vmatpush.bf16.msra.mxu0 %v9161_v22  ;;  %v9065_v62 = vor.u32 %v10183_v18, %v9062_v59  ;;  %v10092_v22 = vld [vmem:[#allocation12 + $0x364] sm:$0xf0] }
 0x504   :  { %5445 = vmatpush.bf16.msrb.mxu1 %v8425_v36  ;;  %5471 = vmatpush.bf16.msrb.mxu3 %v8937_v12  ;;  %v10047_v36 = vld [vmem:[#allocation12 + $0x204] sm:$0xf]  ;;  %v8332_v18 = vld [vmem:[#allocation12 + $0x88] sm:$0xf] }
 0x506   :  { %5460 = vmatpush.bf16.msra.mxu2 %v8617_v61 }
 0x507   :  { %5486 = vmatpush.bf16.msra.mxu0 %v9129_v46  ;;  %v10012_v46 = vld [vmem:[#allocation12 + $0xe4] sm:$0xf0] }
 0x508   :  { %5446 = vmatpush.bf16.msrb.mxu1 %v8393_v54  ;;  %5472 = vmatpush.bf16.msrb.mxu3 %v8905_v28  ;;  %v8521_v54 = vor.u32 %v10047_v36, %v8518_v40  ;;  %v10028_v28 = vld [vmem:[#allocation12 + $0x164] sm:$0xf0]  ;;  %v8365_v53 = vor.u32 %v10012_v46, %v8364_v42  ;;  %v10032_v42 = vld [vmem:[#allocation12 + $0x18c] sm:$0xf] }
 0x509   :  { %v8429_v33 = vor.u32 %v10028_v28, %v8428_v27  ;;  %v8268_v27 = vld [vmem:[#allocation12 + $0x8] sm:$0xf] }
 0x50a   :  { %5461 = vmatpush.bf16.msra.mxu2 %v8585_v16  ;;  %v9988_v28 = vld [vmem:[#allocation12 + $0x24] sm:$0xf0] }
 0x50b   :  { %5487 = vmatpush.bf16.msra.mxu0 %v9097_v51  ;;  %v10084_v51 = vld [vmem:[#allocation12 + $0x324] sm:$0xf0] }
 0x50c   :  { %5447 = vmatpush.bf16.msrb.mxu1 %v8361_v30  ;;  %5473 = vmatpush.bf16.msrb.mxu3 %v8873_v35  ;;  %v8806_v30 = vld [vmem:[#allocation12 + $0x460] sm:$0xf0]  ;;  %v10020_v35 = vld [vmem:[#allocation12 + $0x124] sm:$0xf0] }
 0x50d   :  { %v8809_v43 = vor.u32 %v10119_v48, %v8806_v30  ;;  %v8397_v41 = vor.u32 %v10020_v35, %v8396_v34  ;;  %v9004_v48 = vld [vmem:[#allocation12 + $0x5c8] sm:$0xf] }
 0x50e   :  { %5462 = vmatpush.bf16.msra.mxu2 %v8553_v31  ;;  %v10172_v30 = vld [vmem:[#allocation12 + $0x5e4] sm:$0xf0] }
 0x50f   :  { %5488 = vmatpush.bf16.msra.mxu0 %v9065_v62  ;;  %v8556_v34 = vld [vmem:[#allocation12 + $0x248] sm:$0xf] }
 0x510   :  { %5448 = vmatpush.bf16.msrb.mxu1 %v8329_v19  ;;  %5474 = vmatpush.bf16.msrb.mxu3 %v8841_v56  ;;  %v10889_v19 = vld [vmem:[%s11009_s16] sm:$0xf]  ;;  %v10060_v35 = vld [vmem:[#allocation12 + $0x264] sm:$0xf0] }
 0x511   :  { %v3397_v1 = vperm.slane %v10889_v19, 0  ;;  %v3398_v6 = vperm.slane %v10889_v19, 1  ;;  %v3399_v31 = vperm.slane %v10889_v19, 2  ;;  %v3400_v56 = vperm.slane %v10889_v19, 3  ;;  %v8972_v19 = vld [vmem:[#allocation12 + $0x588] sm:$0xf] }
 0x512   :  { %5463 = vmatpush.bf16.msra.mxu2 %v8521_v54  ;;  %v8524_v46 = vld [vmem:[#allocation12 + $0x208] sm:$0xf] }
 0x513   :  { %5489 = vmatpush.bf16.msra.mxu0 %v9033_v3  ;;  %v8653_v3 = vor.u32 %v10084_v51, %v8652_v49  ;;  %v10104_v49 = vld [vmem:[#allocation12 + $0x3cc] sm:$0xf] }
 0x514   :  { %5449 = vmatpush.bf16.msrb.mxu1 %v8297_v60  ;;  %5475 = vmatpush.bf16.msrb.mxu3 %v8809_v43  ;;  %v8493_v60 = vor.u32 %v10044_v8, %v8492_v7  ;;  %v8685_v43 = vor.u32 %v10092_v22, %v8684_v29  ;;  %v8973_v7 = vor.u32 %v10164_v45, %v8972_v19  ;;  %v8300_v8 = vld [vmem:[#allocation12 + $0x48] sm:$0xf]  ;;  %v8750_v51 = vld [vmem:[#allocation12 + $0x3e8] sm:$0xf0] }
 0x515   :  { %v8876_v22 = vld [vmem:[#allocation12 + $0x4c8] sm:$0xf]  ;;  %v8430_v19 = vld [vmem:[#allocation12 + $0x168] sm:$0xf0]  ;;  %v8753_v45 = vor.u32 %v10104_v49, %v8750_v51 }
 0x516   :  { %v10152_v49 = vld [vmem:[#allocation12 + $0x54c] sm:$0xf] }
 0x517   :  { %v8942_v51 = vld [vmem:[#allocation12 + $0x568] sm:$0xf0] }
 0x518   :  { %5450 = vmatpush.bf16.msrb.mxu1 %v8265_v23  ;;  %5476 = vmatpush.bf16.msrb.mxu3 %v8777_v55  ;;  %v8461_v23 = vor.u32 %v10036_v13, %v8460_v2  ;;  %v9005_v55 = vor.u32 %v10172_v30, %v9004_v48  ;;  %v10052_v48 = vld [vmem:[#allocation12 + $0x224] sm:$0xf0] }
 0x519   :  { %v9164_v30 = vld [vmem:[#allocation12 + $0x708] sm:$0xf] }
 0x552   :  { %v3773_v63 = vpop.f32.mrf.mxu0 }
 0x558   :  { %v3734_v57 = vpop.f32.mrf.mxu1  ;;  %v3747_v4 = vpop.f32.mrf.mxu2 }
 0x559   :  { %v3735_v5 = vadd.f32 %v3734_v57, %v3397_v1  ;;  %v8620_v57 = vld [vmem:[#allocation12 + $0x2c8] sm:$0xf] }
 0x55a   :  { %v3775_v58 = vpop.f32.mrf.mxu0 }
 0x55b   :  { %v3748_v61 = vadd.f32 %v3747_v4, %v3735_v5  ;;  %v10076_v5 = vld [vmem:[#allocation12 + $0x2e4] sm:$0xf0] }
 0x55c   :  { %v9260_v58 = vld [vmem:[#allocation12 + $0x7c8] sm:$0xf]  ;;  %v8621_v2 = vor.u32 %v10076_v5, %v8620_v57  ;;  %v10096_v57 = vld [vmem:[#allocation12 + $0x38c] sm:$0xf] }
 0x55d   :  { %v3829_v10 = vmax.f32 %v3748_v61, 0.0  ;;  %v10236_v61 = vld [vmem:[#allocation12 + $0x7e4] sm:$0xf0] }
 0x55e   :  { %v3760_v11 = vpop.f32.mrf.mxu3  ;;  %v9261_v13 = vor.u32 %v10236_v61, %v9260_v58  ;;  %v8812_v58 = vld [vmem:[#allocation12 + $0x448] sm:$0xf] }
 0x55f   :  { %v10893_v38 = vpack.c.bf16 %v3829_v10, %v3829_v10  ;;  %v3761_v12 = vadd.f32 %v3760_v11, %v3398_v6  ;;  %v9996_v10 = vld [vmem:[#allocation12 + $0x64] sm:$0xf0] }
 0x560   :  { %v3736_v15 = vpop.f32.mrf.mxu1  ;;  %v3749_v16 = vpop.f32.mrf.mxu2  ;;  %v10124_v61 = vld [vmem:[#allocation12 + $0x464] sm:$0xf0] }
 0x561   :  { %v3774_v17 = vadd.f32 %v3773_v63, %v3761_v12  ;;  %5399 = vmatmul.bf16.vlgmr.msra.gmra.mxu1 %v10893_v38  ;;  %v10004_v63 = vld [vmem:[#allocation12 + $0xa4] sm:$0xf0] }
 0x562   :  { %5495 = vmatpush.bf16.msra.mxu1 %v8493_v60  ;;  %v3825_v21 = vpop.f32.mrf.mxu0  ;;  %v8333_v6 = vor.u32 %v10004_v63, %v8332_v18  ;;  %v8940_v60 = vld [vmem:[#allocation12 + $0x548] sm:$0xf]  ;;  %v8525_v18 = vor.u32 %v10052_v48, %v8524_v46  ;;  %v10024_v63 = vld [vmem:[#allocation12 + $0x14c] sm:$0xf] }
 0x563   :  { %v3830_v24 = vmax.f32 %v3774_v17, 0.0  ;;  %v10156_v12 = vld [vmem:[#allocation12 + $0x564] sm:$0xf0]  ;;  %v8433_v5 = vor.u32 %v10024_v63, %v8430_v19  ;;  %v9230_v63 = vld [vmem:[#allocation12 + $0x7a8] sm:$0xf0] }
 0x564   :  { %v8588_v15 = vld [vmem:[#allocation12 + $0x288] sm:$0xf] }
 0x565   :  { %v10896_v50 = vpack.c.bf16 %v3830_v24, %v3830_v24  ;;  %v10068_v17 = vld [vmem:[#allocation12 + $0x2a4] sm:$0xf0]  ;;  %v8941_v24 = vor.u32 %v10156_v12, %v8940_v60  ;;  %v8813_v12 = vor.u32 %v10124_v61, %v8812_v58  ;;  %v8500_v58 = vld [vmem:[#allocation12 + $0x1d0] sm:$0xf] }
 0x566   :  { %5496 = vmatpush.bf16.msra.mxu1 %v8461_v23  ;;  %v3762_v9 = vpop.f32.mrf.mxu3  ;;  %v8301_v23 = vor.u32 %v9996_v10, %v8300_v8  ;;  %v8589_v20 = vor.u32 %v10068_v17, %v8588_v15  ;;  %v8398_v8 = vld [vmem:[#allocation12 + $0x128] sm:$0xf0]  ;;  %v10196_v60 = vld [vmem:[#allocation12 + $0x6a4] sm:$0xf0]  ;;  %v10045_v61 = vld [vmem:[#allocation12 + $0x1ec] sm:$0xf0] }
 0x567   :  { %5412 = vmatmul.bf16.vlgmr.msrb.gmra.mxu2 %v10896_v50  ;;  %v10040_v9 = vld [vmem:[#allocation12 + $0x1cc] sm:$0xf]  ;;  %v8780_v17 = vld [vmem:[#allocation12 + $0x408] sm:$0xf] }
 0x568   :  { %5508 = vmatpush.bf16.msrb.mxu2 %v8749_v37  ;;  %v3786_v36 = vpop.f32.mrf.mxu1  ;;  %v3799_v40 = vpop.f32.mrf.mxu2  ;;  %v8908_v37 = vld [vmem:[#allocation12 + $0x508] sm:$0xf] }
 0x569   :  { %v3787_v54 = vadd.f32 %v3786_v36, %v3399_v31  ;;  %v10148_v31 = vld [vmem:[#allocation12 + $0x524] sm:$0xf0] }
 0x56a   :  { %5497 = vmatpush.bf16.msra.mxu1 %v8429_v33  ;;  %v3827_v39 = vpop.f32.mrf.mxu0  ;;  %v8494_v33 = vld [vmem:[#allocation12 + $0x1e8] sm:$0xf0]  ;;  %v9196_v36 = vld [vmem:[#allocation12 + $0x748] sm:$0xf] }
 0x56b   :  { %v3800_v44 = vadd.f32 %v3799_v40, %v3787_v54  ;;  %v10220_v40 = vld [vmem:[#allocation12 + $0x764] sm:$0xf0]  ;;  %v8909_v54 = vor.u32 %v10148_v31, %v8908_v37  ;;  %v8497_v29 = vor.u32 %v10040_v9, %v8494_v33  ;;  %v8654_v9 = vld [vmem:[#allocation12 + $0x328] sm:$0xf0] }
 0x56c   :  { %5509 = vmatpush.bf16.msrb.mxu2 %v8717_v52  ;;  %v8269_v52 = vor.u32 %v9988_v28, %v8268_v27  ;;  %v10140_v39 = vld [vmem:[#allocation12 + $0x4e4] sm:$0xf0]  ;;  %v9006_v27 = vld [vmem:[#allocation12 + $0x5e8] sm:$0xf0] }
 0x56d   :  { %v3831_v25 = vmax.f32 %v3800_v44, 0.0  ;;  %v8462_v44 = vld [vmem:[#allocation12 + $0x1a8] sm:$0xf0]  ;;  %v9068_v37 = vld [vmem:[#allocation12 + $0x648] sm:$0xf] }
 0x56e   :  { %5498 = vmatpush.bf16.msra.mxu1 %v8397_v41  ;;  %v3812_v26 = vpop.f32.mrf.mxu3  ;;  %v8557_v41 = vor.u32 %v10060_v35, %v8556_v34  ;;  %v10188_v31 = vld [vmem:[#allocation12 + $0x664] sm:$0xf0]  ;;  %v10000_v35 = vld [vmem:[#allocation12 + $0x8c] sm:$0xf] }
 0x56f   :  { %v10901_v59 = vpack.c.bf16 %v3831_v25, %v3831_v25  ;;  %v3813_v62 = vadd.f32 %v3812_v26, %v3400_v56  ;;  %v9197_v56 = vor.u32 %v10220_v40, %v9196_v36  ;;  %v8877_v25 = vor.u32 %v10140_v39, %v8876_v22  ;;  %v8334_v40 = vld [vmem:[#allocation12 + $0xa8] sm:$0xf0]  ;;  %v9036_v22 = vld [vmem:[#allocation12 + $0x608] sm:$0xf] }
 0x570   :  { %5510 = vmatpush.bf16.msrb.mxu2 %v8685_v43  ;;  %v3788_v0 = vpop.f32.mrf.mxu1  ;;  %v3801_v1 = vpop.f32.mrf.mxu2  ;;  %v10212_v43 = vld [vmem:[#allocation12 + $0x724] sm:$0xf0]  ;;  %v8465_v26 = vor.u32 %v10032_v42, %v8462_v44  ;;  %v9069_v36 = vor.u32 %v10188_v31, %v9068_v37  ;;  %v10232_v42 = vld [vmem:[#allocation12 + $0x7cc] sm:$0xf]  ;;  %v8337_v46 = vor.u32 %v10000_v35, %v8334_v40  ;;  %v8756_v37 = vld [vmem:[#allocation12 + $0x3d0] sm:$0xf] }
 0x571   :  { %v3826_v4 = vadd.f32 %v3825_v21, %v3813_v62  ;;  %5425 = vmatmul.bf16.vlgmr.msra.gmra.mxu3 %v10901_v59  ;;  %5451 = vmatmul.bf16.vlgmr.msrb.gmra.mxu1 %v10893_v38  ;;  %v9165_v62 = vor.u32 %v10212_v43, %v9164_v30  ;;  %v9132_v0 = vld [vmem:[#allocation12 + $0x6c8] sm:$0xf]  ;;  %v9262_v44 = vld [vmem:[#allocation12 + $0x7e8] sm:$0xf0]  ;;  %v10109_v31 = vld [vmem:[#allocation12 + $0x3ec] sm:$0xf0] }
 0x572   :  { %5499 = vmatpush.bf16.msra.mxu1 %v8365_v53  ;;  %5521 = vmatpush.bf16.msra.mxu3 %v9005_v55  ;;  %v8844_v53 = vld [vmem:[#allocation12 + $0x488] sm:$0xf]  ;;  %v9992_v30 = vld [vmem:[#allocation12 + $0x4c] sm:$0xf]  ;;  %v8436_v35 = vld [vmem:[#allocation12 + $0x150] sm:$0xf]  ;;  %v8757_v40 = vor.u32 %v10109_v31, %v8756_v37 }
 0x573   :  { %v3832_v11 = vmax.f32 %v3826_v4, 0.0  ;;  %v10132_v55 = vld [vmem:[#allocation12 + $0x4a4] sm:$0xf0]  ;;  %v8718_v4 = vld [vmem:[#allocation12 + $0x3a8] sm:$0xf0] }
 0x574   :  { %5511 = vmatpush.bf16.msrb.mxu2 %v8653_v3  ;;  %v10204_v1 = vld [vmem:[#allocation12 + $0x6e4] sm:$0xf0]  ;;  %v8845_v3 = vor.u32 %v10132_v55, %v8844_v53  ;;  %v8721_v10 = vor.u32 %v10096_v57, %v8718_v4  ;;  %v9265_v53 = vor.u32 %v10232_v42, %v9262_v44  ;;  %v10064_v55 = vld [vmem:[#allocation12 + $0x28c] sm:$0xf] }
 0x575   :  { %v10905_v16 = vpack.c.bf16 %v3832_v11, %v3832_v11  ;;  %v9100_v11 = vld [vmem:[#allocation12 + $0x688] sm:$0xf]  ;;  %v8910_v57 = vld [vmem:[#allocation12 + $0x528] sm:$0xf0] }
 0x576   :  { %5500 = vmatpush.bf16.msra.mxu1 %v8333_v6  ;;  %5522 = vmatpush.bf16.msra.mxu3 %v8973_v7  ;;  %v3814_v21 = vpop.f32.mrf.mxu3  ;;  %v9133_v6 = vor.u32 %v10204_v1, %v9132_v0  ;;  %v10016_v7 = vld [vmem:[#allocation12 + $0x10c] sm:$0xf]  ;;  %v10180_v39 = vld [vmem:[#allocation12 + $0x624] sm:$0xf0] }
 0x577   :  { %5438 = vmatmul.bf16.vlgmr.msrb.gmra.mxu0 %v10905_v16  ;;  %5464 = vmatmul.bf16.vlgmr.msra.gmra.mxu2 %v10896_v50  ;;  %v8401_v15 = vor.u32 %v10016_v7, %v8398_v8  ;;  %v9101_v21 = vor.u32 %v10196_v60, %v9100_v11  ;;  %v9037_v43 = vor.u32 %v10180_v39, %v9036_v22  ;;  %v9984_v0 = vld [vmem:[#allocation12 + $0xc] sm:$0xf]  ;;  %v8724_v22 = vld [vmem:[#allocation12 + $0x390] sm:$0xf] }
 0x578   :  { %5512 = vmatpush.bf16.msrb.mxu2 %v8621_v2  ;;  %5534 = vmatpush.bf16.msrb.mxu0 %v9261_v13  ;;  %v10088_v2 = vld [vmem:[#allocation12 + $0x34c] sm:$0xf]  ;;  %v10101_v39 = vld [vmem:[#allocation12 + $0x3ac] sm:$0xf0] }
 0x579   :  { %v8686_v13 = vld [vmem:[#allocation12 + $0x368] sm:$0xf0] }
 0x57a   :  { %5501 = vmatpush.bf16.msra.mxu1 %v8301_v23  ;;  %5523 = vmatpush.bf16.msra.mxu3 %v8941_v24  ;;  %v8366_v23 = vld [vmem:[#allocation12 + $0xe8] sm:$0xf0]  ;;  %v8689_v28 = vor.u32 %v10088_v2, %v8686_v13 }
 0x57b   :  { %v10168_v24 = vld [vmem:[#allocation12 + $0x5cc] sm:$0xf]  ;;  %v8369_v33 = vor.u32 %v10008_v14, %v8366_v23  ;;  %v10037_v14 = vld [vmem:[#allocation12 + $0x1ac] sm:$0xf0] }
 0x57c   :  { %5513 = vmatpush.bf16.msrb.mxu2 %v8589_v20  ;;  %5535 = vmatpush.bf16.msrb.mxu0 %v9229_v32  ;;  %v8781_v20 = vor.u32 %v10116_v47, %v8780_v17  ;;  %v10080_v32 = vld [vmem:[#allocation12 + $0x30c] sm:$0xf]  ;;  %v9009_v34 = vor.u32 %v10168_v24, %v9006_v27  ;;  %v8468_v47 = vld [vmem:[#allocation12 + $0x190] sm:$0xf] }
 0x57d   :  { %v8270_v1 = vld [vmem:[#allocation12 + $0x28] sm:$0xf0] }
 0x57e   :  { %5502 = vmatpush.bf16.msra.mxu1 %v8269_v52  ;;  %5524 = vmatpush.bf16.msra.mxu3 %v8909_v54  ;;  %v10160_v52 = vld [vmem:[#allocation12 + $0x58c] sm:$0xf]  ;;  %v8273_v11 = vor.u32 %v9984_v0, %v8270_v1  ;;  %v10173_v0 = vld [vmem:[#allocation12 + $0x5ec] sm:$0xf0] }
 0x57f   :  { %v8974_v54 = vld [vmem:[#allocation12 + $0x5a8] sm:$0xf0] }
 0x580   :  { %5514 = vmatpush.bf16.msrb.mxu2 %v8557_v41  ;;  %5536 = vmatpush.bf16.msrb.mxu0 %v9197_v56  ;;  %v10072_v41 = vld [vmem:[#allocation12 + $0x2cc] sm:$0xf]  ;;  %v8977_v48 = vor.u32 %v10160_v52, %v8974_v54 }
 0x581   :  { %5477 = vmatmul.bf16.vlgmr.msrb.gmra.mxu3 %v10901_v59  ;;  %5503 = vmatmul.bf16.vlgmr.msra.gmra.mxu1 %v10893_v38  ;;  %v8622_v56 = vld [vmem:[#allocation12 + $0x2e8] sm:$0xf0] }
 0x582   :  { %5547 = vmatpush.bf16.msrb.mxu1 %v8497_v29  ;;  %5525 = vmatpush.bf16.msra.mxu3 %v8877_v25  ;;  %v8657_v29 = vor.u32 %v10080_v32, %v8654_v9  ;;  %v8302_v25 = vld [vmem:[#allocation12 + $0x68] sm:$0xf0] }
 0x583   :  { %v8305_v19 = vor.u32 %v9992_v30, %v8302_v25  ;;  %v8558_v7 = vld [vmem:[#allocation12 + $0x268] sm:$0xf0]  ;;  %v8725_v30 = vor.u32 %v10101_v39, %v8724_v22  ;;  %v10149_v22 = vld [vmem:[#allocation12 + $0x52c] sm:$0xf0] }
 0x584   :  { %5515 = vmatpush.bf16.msrb.mxu2 %v8525_v18  ;;  %5537 = vmatpush.bf16.msrb.mxu0 %v9165_v62  ;;  %v8590_v18 = vld [vmem:[#allocation12 + $0x2a8] sm:$0xf0] }
 0x585   :  { %v10224_v62 = vld [vmem:[#allocation12 + $0x78c] sm:$0xf]  ;;  %v8593_v4 = vor.u32 %v10064_v55, %v8590_v18 }
 0x586   :  { %5548 = vmatpush.bf16.msrb.mxu1 %v8465_v26  ;;  %5526 = vmatpush.bf16.msra.mxu3 %v8845_v3  ;;  %v8625_v26 = vor.u32 %v10072_v41, %v8622_v56  ;;  %v10144_v3 = vld [vmem:[#allocation12 + $0x50c] sm:$0xf] }
 0x587   :  { %5490 = vmatmul.bf16.vlgmr.msra.gmra.mxu0 %v10905_v16  ;;  %5516 = vmatmul.bf16.vlgmr.msrb.gmra.mxu2 %v10896_v50  ;;  %v10216_v8 = vld [vmem:[#allocation12 + $0x74c] sm:$0xf]  ;;  %v8913_v60 = vor.u32 %v10144_v3, %v8910_v57 }
 0x588   :  { %5560 = vmatpush.bf16.msra.mxu2 %v8753_v45  ;;  %5538 = vmatpush.bf16.msrb.mxu0 %v9133_v6  ;;  %v8945_v45 = vor.u32 %v10152_v49, %v8942_v51  ;;  %v10056_v6 = vld [vmem:[#allocation12 + $0x24c] sm:$0xf]  ;;  %v8692_v51 = vld [vmem:[#allocation12 + $0x350] sm:$0xf] }
 0x589   :  { %v10136_v2 = vld [vmem:[#allocation12 + $0x4cc] sm:$0xf] }
 0x58a   :  { %5549 = vmatpush.bf16.msrb.mxu1 %v8433_v5  ;;  %5527 = vmatpush.bf16.msra.mxu3 %v8813_v12  ;;  %v9233_v5 = vor.u32 %v10224_v62, %v9230_v63  ;;  %v8501_v12 = vor.u32 %v10045_v61, %v8500_v58  ;;  %v8878_v13 = vld [vmem:[#allocation12 + $0x4e8] sm:$0xf0]  ;;  %v8372_v62 = vld [vmem:[#allocation12 + $0xd0] sm:$0xf] }
 0x58b   :  { %v8526_v23 = vld [vmem:[#allocation12 + $0x228] sm:$0xf0]  ;;  %v10085_v58 = vld [vmem:[#allocation12 + $0x32c] sm:$0xf0] }
 0x58c   :  { %5561 = vmatpush.bf16.msra.mxu2 %v8721_v10  ;;  %5539 = vmatpush.bf16.msrb.mxu0 %v9101_v21  ;;  %v9198_v10 = vld [vmem:[#allocation12 + $0x768] sm:$0xf0] }
 0x58d   :  { %v9201_v17 = vor.u32 %v10216_v8, %v9198_v10  ;;  %v10048_v21 = vld [vmem:[#allocation12 + $0x20c] sm:$0xf]  ;;  %v10005_v10 = vld [vmem:[#allocation12 + $0xac] sm:$0xf0] }
 0x58e   :  { %5550 = vmatpush.bf16.msrb.mxu1 %v8401_v15  ;;  %5528 = vmatpush.bf16.msra.mxu3 %v8781_v20  ;;  %v8561_v15 = vor.u32 %v10056_v6, %v8558_v7  ;;  %v10208_v24 = vld [vmem:[#allocation12 + $0x70c] sm:$0xf]  ;;  %v8469_v20 = vor.u32 %v10037_v14, %v8468_v47  ;;  %v8340_v7 = vld [vmem:[#allocation12 + $0x90] sm:$0xf] }
 0x58f   :  { %v9166_v27 = vld [vmem:[#allocation12 + $0x728] sm:$0xf0]  ;;  %v9268_v47 = vld [vmem:[#allocation12 + $0x7d0] sm:$0xf] }
 0x590   :  { %5562 = vmatpush.bf16.msra.mxu2 %v8689_v28  ;;  %5540 = vmatpush.bf16.msrb.mxu0 %v9069_v36  ;;  %v8881_v28 = vor.u32 %v10136_v2, %v8878_v13  ;;  %v10128_v32 = vld [vmem:[#allocation12 + $0x48c] sm:$0xf]  ;;  %v10029_v36 = vld [vmem:[#allocation12 + $0x16c] sm:$0xf0] }
 0x591   :  { %5529 = vmatmul.bf16.vlgmr.msra.gmra.mxu3 %v10901_v59  ;;  %v8846_v9 = vld [vmem:[#allocation12 + $0x4a8] sm:$0xf0]  ;;  %v8437_v41 = vor.u32 %v10029_v36, %v8436_v35  ;;  %v10237_v14 = vld [vmem:[#allocation12 + $0x7ec] sm:$0xf0] }
 0x592   :  { %5551 = vmatpush.bf16.msrb.mxu1 %v8369_v33  ;;  %5573 = vmatpush.bf16.msrb.mxu3 %v9009_v34  ;;  %v8529_v33 = vor.u32 %v10048_v21, %v8526_v23  ;;  %v9169_v34 = vor.u32 %v10208_v24, %v9166_v27  ;;  %v10200_v52 = vld [vmem:[#allocation12 + $0x6cc] sm:$0xf]  ;;  %v8341_v21 = vor.u32 %v10005_v10, %v8340_v7  ;;  %v8308_v27 = vld [vmem:[#allocation12 + $0x50] sm:$0xf]  ;;  %v10025_v7 = vld [vmem:[#allocation12 + $0x154] sm:$0xf] }
 0x593   :  { %v9134_v54 = vld [vmem:[#allocation12 + $0x6e8] sm:$0xf0]  ;;  %v9269_v31 = vor.u32 %v10237_v14, %v9268_v47  ;;  %v10229_v35 = vld [vmem:[#allocation12 + $0x7ac] sm:$0xf0]  ;;  %v8438_v10 = vld [vmem:[#allocation12 + $0x170] sm:$0xf0] }
 0x594   :  { %5563 = vmatpush.bf16.msra.mxu2 %v8657_v29  ;;  %5541 = vmatpush.bf16.msrb.mxu0 %v9037_v43  ;;  %v8849_v29 = vor.u32 %v10128_v32, %v8846_v9  ;;  %v10120_v56 = vld [vmem:[#allocation12 + $0x44c] sm:$0xf]  ;;  %v9137_v44 = vor.u32 %v10200_v52, %v9134_v54  ;;  %v10157_v32 = vld [vmem:[#allocation12 + $0x56c] sm:$0xf0] }
 0x595   :  { %v8814_v42 = vld [vmem:[#allocation12 + $0x468] sm:$0xf0]  ;;  %v8596_v9 = vld [vmem:[#allocation12 + $0x290] sm:$0xf] }
 0x596   :  { %5552 = vmatpush.bf16.msrb.mxu1 %v8337_v46  ;;  %5574 = vmatpush.bf16.msrb.mxu3 %v8977_v48  ;;  %v8404_v46 = vld [vmem:[#allocation12 + $0x110] sm:$0xf]  ;;  %v10192_v43 = vld [vmem:[#allocation12 + $0x68c] sm:$0xf]  ;;  %v8817_v49 = vor.u32 %v10120_v56, %v8814_v42  ;;  %v10041_v56 = vld [vmem:[#allocation12 + $0x1d4] sm:$0xf] }
 0x597   :  { %5542 = vmatmul.bf16.vlgmr.msrb.gmra.mxu0 %v10905_v16  ;;  %v10021_v48 = vld [vmem:[#allocation12 + $0x12c] sm:$0xf0]  ;;  %v9102_v25 = vld [vmem:[#allocation12 + $0x6a8] sm:$0xf0]  ;;  %v8502_v42 = vld [vmem:[#allocation12 + $0x1f0] sm:$0xf0] }
 0x598   :  { %5564 = vmatpush.bf16.msra.mxu2 %v8625_v26  ;;  %5586 = vmatpush.bf16.msra.mxu0 %v9265_v53  ;;  %v10093_v26 = vld [vmem:[#allocation12 + $0x36c] sm:$0xf0]  ;;  %v8405_v53 = vor.u32 %v10021_v48, %v8404_v46  ;;  %v10112_v55 = vld [vmem:[#allocation12 + $0x40c] sm:$0xf]  ;;  %v9105_v63 = vor.u32 %v10192_v43, %v9102_v25 }
 0x599   :  { %v8782_v18 = vld [vmem:[#allocation12 + $0x428] sm:$0xf0]  ;;  %v8693_v1 = vor.u32 %v10093_v26, %v8692_v51  ;;  %v9989_v54 = vld [vmem:[#allocation12 + $0x2c] sm:$0xf0] }
 0x59a   :  { %5553 = vmatpush.bf16.msrb.mxu1 %v8305_v19  ;;  %5575 = vmatpush.bf16.msrb.mxu3 %v8945_v45  ;;  %v10013_v19 = vld [vmem:[#allocation12 + $0xec] sm:$0xf0]  ;;  %v10184_v3 = vld [vmem:[#allocation12 + $0x64c] sm:$0xf] }
 0x59b   :  { %v9012_v45 = vld [vmem:[#allocation12 + $0x5d0] sm:$0xf]  ;;  %v9070_v57 = vld [vmem:[#allocation12 + $0x668] sm:$0xf0]  ;;  %v8373_v61 = vor.u32 %v10013_v19, %v8372_v62  ;;  %v8470_v62 = vld [vmem:[#allocation12 + $0x1b0] sm:$0xf0] }
 0x59c   :  { %5565 = vmatpush.bf16.msra.mxu2 %v8593_v4  ;;  %5587 = vmatpush.bf16.msra.mxu0 %v9233_v5  ;;  %v8785_v4 = vor.u32 %v10112_v55, %v8782_v18  ;;  %v8660_v5 = vld [vmem:[#allocation12 + $0x310] sm:$0xf]  ;;  %v9013_v6 = vor.u32 %v10173_v0, %v9012_v45  ;;  %v9073_v8 = vor.u32 %v10184_v3, %v9070_v57  ;;  %v10176_v2 = vld [vmem:[#allocation12 + $0x60c] sm:$0xf]  ;;  %v10033_v18 = vld [vmem:[#allocation12 + $0x194] sm:$0xf] }
 0x59d   :  { %v9038_v13 = vld [vmem:[#allocation12 + $0x628] sm:$0xf0]  ;;  %v10061_v46 = vld [vmem:[#allocation12 + $0x26c] sm:$0xf0]  ;;  %v8758_v3 = vld [vmem:[#allocation12 + $0x3f0] sm:$0xf0] }
 0x59e   :  { %5554 = vmatpush.bf16.msrb.mxu1 %v8273_v11  ;;  %5576 = vmatpush.bf16.msrb.mxu3 %v8913_v60  ;;  %v8980_v11 = vld [vmem:[#allocation12 + $0x590] sm:$0xf]  ;;  %v9041_v24 = vor.u32 %v10176_v2, %v9038_v13  ;;  %v8726_v2 = vld [vmem:[#allocation12 + $0x3b0] sm:$0xf0] }
 0x59f   :  { %v10165_v60 = vld [vmem:[#allocation12 + $0x5ac] sm:$0xf0] }
 0x5a0   :  { %5566 = vmatpush.bf16.msra.mxu2 %v8561_v15  ;;  %5588 = vmatpush.bf16.msra.mxu0 %v9201_v17  ;;  %v8628_v15 = vld [vmem:[#allocation12 + $0x2d0] sm:$0xf]  ;;  %v8981_v23 = vor.u32 %v10165_v60, %v8980_v11 }
 0x5a1   :  { %5555 = vmatmul.bf16.vlgmr.msrb.gmra.mxu1 %v10893_v38  ;;  %v10077_v17 = vld [vmem:[#allocation12 + $0x2ec] sm:$0xf0] }
 0x5a2   :  { %5599 = vmatpush.bf16.msra.mxu1 %v8501_v12  ;;  %5577 = vmatpush.bf16.msrb.mxu3 %v8881_v28  ;;  %v8661_v12 = vor.u32 %v10085_v58, %v8660_v5  ;;  %v9997_v28 = vld [vmem:[#allocation12 + $0x6c] sm:$0xf0]  ;;  %v8629_v37 = vor.u32 %v10077_v17, %v8628_v15  ;;  %v8441_v15 = vor.u32 %v10025_v7, %v8438_v10  ;;  %v9238_v7 = vld [vmem:[#allocation12 + $0x7b0] sm:$0xf0] }
 0x5a3   :  { %v8309_v36 = vor.u32 %v9997_v28, %v8308_v27  ;;  %v9204_v48 = vld [vmem:[#allocation12 + $0x750] sm:$0xf]  ;;  %v9985_v10 = vld [vmem:[#allocation12 + $0x14] sm:$0xf] }
 0x5a4   :  { %5567 = vmatpush.bf16.msra.mxu2 %v8529_v33  ;;  %5589 = vmatpush.bf16.msra.mxu0 %v9169_v34  ;;  %v10069_v33 = vld [vmem:[#allocation12 + $0x2ac] sm:$0xf0] }
 0x5a5   :  { %v9236_v34 = vld [vmem:[#allocation12 + $0x790] sm:$0xf]  ;;  %v8597_v39 = vor.u32 %v10069_v33, %v8596_v9 }
 0x5a6   :  { %5600 = vmatpush.bf16.msra.mxu1 %v8469_v20  ;;  %5578 = vmatpush.bf16.msrb.mxu3 %v8849_v29  ;;  %v8948_v20 = vld [vmem:[#allocation12 + $0x550] sm:$0xf] }
 0x5a7   :  { %5568 = vmatmul.bf16.vlgmr.msra.gmra.mxu2 %v10896_v50  ;;  %v8949_v52 = vor.u32 %v10157_v32, %v8948_v20  ;;  %v8916_v29 = vld [vmem:[#allocation12 + $0x510] sm:$0xf] }
 0x5a8   :  { %5612 = vmatpush.bf16.msrb.mxu2 %v8757_v40  ;;  %5590 = vmatpush.bf16.msra.mxu0 %v9137_v44  ;;  %v8276_v40 = vld [vmem:[#allocation12 + $0x10] sm:$0xf]  ;;  %v8917_v25 = vor.u32 %v10149_v22, %v8916_v29 }
 0x5a9   :  { %v8564_v44 = vld [vmem:[#allocation12 + $0x250] sm:$0xf]  ;;  %v8277_v43 = vor.u32 %v9989_v54, %v8276_v40  ;;  %v9014_v54 = vld [vmem:[#allocation12 + $0x5f0] sm:$0xf0] }
 0x5aa   :  { %5601 = vmatpush.bf16.msra.mxu1 %v8437_v41  ;;  %5579 = vmatpush.bf16.msrb.mxu3 %v8817_v49  ;;  %v9237_v41 = vor.u32 %v10229_v35, %v9236_v34  ;;  %v8505_v49 = vor.u32 %v10041_v56, %v8502_v42  ;;  %v8884_v51 = vld [vmem:[#allocation12 + $0x4d0] sm:$0xf]  ;;  %v10009_v35 = vld [vmem:[#allocation12 + $0xd4] sm:$0xf] }
 0x5ab   :  { %v10141_v26 = vld [vmem:[#allocation12 + $0x4ec] sm:$0xf0] }
 0x5ac   :  { %5613 = vmatpush.bf16.msrb.mxu2 %v8725_v30  ;;  %5591 = vmatpush.bf16.msra.mxu0 %v9105_v63  ;;  %v10221_v30 = vld [vmem:[#allocation12 + $0x76c] sm:$0xf0]  ;;  %v8885_v57 = vor.u32 %v10141_v26, %v8884_v51 }
 0x5ad   :  { %v9205_v55 = vor.u32 %v10221_v30, %v9204_v48  ;;  %v8532_v63 = vld [vmem:[#allocation12 + $0x210] sm:$0xf]  ;;  %v8342_v48 = vld [vmem:[#allocation12 + $0xb0] sm:$0xf0] }
 0x5ae   :  { %5602 = vmatpush.bf16.msra.mxu1 %v8405_v53  ;;  %5580 = vmatpush.bf16.msrb.mxu3 %v8785_v4  ;;  %v8565_v53 = vor.u32 %v10061_v46, %v8564_v44  ;;  %v10053_v19 = vld [vmem:[#allocation12 + $0x22c] sm:$0xf0]  ;;  %v8473_v4 = vor.u32 %v10033_v18, %v8470_v62  ;;  %v10001_v46 = vld [vmem:[#allocation12 + $0x94] sm:$0xf] }
 0x5af   :  { %v9172_v45 = vld [vmem:[#allocation12 + $0x710] sm:$0xf]  ;;  %v8533_v5 = vor.u32 %v10053_v19, %v8532_v63  ;;  %v10233_v18 = vld [vmem:[#allocation12 + $0x7d4] sm:$0xf]  ;;  %v8345_v63 = vor.u32 %v10001_v46, %v8342_v48  ;;  %v8444_v46 = vld [vmem:[#allocation12 + $0x158] sm:$0xf] }
 0x5b0   :  { %5614 = vmatpush.bf16.msrb.mxu2 %v8693_v1  ;;  %5592 = vmatpush.bf16.msra.mxu0 %v9073_v8  ;;  %v10213_v0 = vld [vmem:[#allocation12 + $0x72c] sm:$0xf0]  ;;  %v10105_v1 = vld [vmem:[#allocation12 + $0x3d4] sm:$0xf] }
 0x5b1   :  { %5581 = vmatmul.bf16.vlgmr.msrb.gmra.mxu3 %v10901_v59  ;;  %v9173_v58 = vor.u32 %v10213_v0, %v9172_v45  ;;  %v8761_v8 = vor.u32 %v10105_v1, %v8758_v3  ;;  %v9140_v11 = vld [vmem:[#allocation12 + $0x6d0] sm:$0xf]  ;;  %v9270_v62 = vld [vmem:[#allocation12 + $0x7f0] sm:$0xf0] }
 0x5b2   :  { %5603 = vmatpush.bf16.msra.mxu1 %v8373_v61  ;;  %5625 = vmatpush.bf16.msra.mxu3 %v9013_v6  ;;  %v8852_v61 = vld [vmem:[#allocation12 + $0x490] sm:$0xf]  ;;  %v9993_v1 = vld [vmem:[#allocation12 + $0x54] sm:$0xf] }
 0x5b3   :  { %v10133_v6 = vld [vmem:[#allocation12 + $0x4ac] sm:$0xf0]  ;;  %v8310_v3 = vld [vmem:[#allocation12 + $0x70] sm:$0xf0] }
 0x5b4   :  { %5615 = vmatpush.bf16.msrb.mxu2 %v8661_v12  ;;  %5593 = vmatpush.bf16.msra.mxu0 %v9041_v24  ;;  %v10205_v60 = vld [vmem:[#allocation12 + $0x6ec] sm:$0xf0]  ;;  %v10097_v12 = vld [vmem:[#allocation12 + $0x394] sm:$0xf]  ;;  %v8853_v13 = vor.u32 %v10133_v6, %v8852_v61 }
 0x5b5   :  { %v9141_v17 = vor.u32 %v10205_v60, %v9140_v11  ;;  %v8820_v47 = vld [vmem:[#allocation12 + $0x450] sm:$0xf]  ;;  %v8406_v24 = vld [vmem:[#allocation12 + $0x130] sm:$0xf0] }
 0x5b6   :  { %5604 = vmatpush.bf16.msra.mxu1 %v8341_v21  ;;  %5626 = vmatpush.bf16.msra.mxu3 %v8981_v23  ;;  %v10125_v14 = vld [vmem:[#allocation12 + $0x46c] sm:$0xf0]  ;;  %v10017_v21 = vld [vmem:[#allocation12 + $0x114] sm:$0xf]  ;;  %v8729_v23 = vor.u32 %v10097_v12, %v8726_v2 }
 0x5b7   :  { %5594 = vmatmul.bf16.vlgmr.msra.gmra.mxu0 %v10905_v16  ;;  %v9108_v27 = vld [vmem:[#allocation12 + $0x690] sm:$0xf]  ;;  %v8821_v20 = vor.u32 %v10125_v14, %v8820_v47  ;;  %v8409_v9 = vor.u32 %v10017_v21, %v8406_v24  ;;  %v8598_v61 = vld [vmem:[#allocation12 + $0x2b0] sm:$0xf0]  ;;  %v10046_v47 = vld [vmem:[#allocation12 + $0x1f4] sm:$0xf0] }
 0x5b8   :  { %5616 = vmatpush.bf16.msrb.mxu2 %v8629_v37  ;;  %5638 = vmatpush.bf16.msrb.mxu0 %v9269_v31  ;;  %v10197_v28 = vld [vmem:[#allocation12 + $0x6ac] sm:$0xf0]  ;;  %v10089_v37 = vld [vmem:[#allocation12 + $0x354] sm:$0xf] }
 0x5b9   :  { %v8694_v31 = vld [vmem:[#allocation12 + $0x370] sm:$0xf0]  ;;  %v8788_v32 = vld [vmem:[#allocation12 + $0x410] sm:$0xf]  ;;  %v9109_v33 = vor.u32 %v10197_v28, %v9108_v27 }
 0x5ba   :  { %5605 = vmatpush.bf16.msra.mxu1 %v8309_v36  ;;  %5627 = vmatpush.bf16.msra.mxu3 %v8949_v52  ;;  %v10117_v34 = vld [vmem:[#allocation12 + $0x42c] sm:$0xf0]  ;;  %v8374_v36 = vld [vmem:[#allocation12 + $0xf0] sm:$0xf0]  ;;  %v8697_v40 = vor.u32 %v10089_v37, %v8694_v31 }
 0x5bb   :  { %v10169_v52 = vld [vmem:[#allocation12 + $0x5d4] sm:$0xf]  ;;  %v9076_v29 = vld [vmem:[#allocation12 + $0x650] sm:$0xf]  ;;  %v8789_v56 = vor.u32 %v10117_v34, %v8788_v32  ;;  %v8377_v42 = vor.u32 %v10009_v35, %v8374_v36  ;;  %v10038_v34 = vld [vmem:[#allocation12 + $0x1b4] sm:$0xf0] }
 0x5bc   :  { %5617 = vmatpush.bf16.msrb.mxu2 %v8597_v39  ;;  %5639 = vmatpush.bf16.msrb.mxu0 %v9237_v41  ;;  %v10189_v22 = vld [vmem:[#allocation12 + $0x66c] sm:$0xf0]  ;;  %v10081_v39 = vld [vmem:[#allocation12 + $0x314] sm:$0xf]  ;;  %v9017_v44 = vor.u32 %v10169_v52, %v9014_v54  ;;  %v8764_v54 = vld [vmem:[#allocation12 + $0x3d8] sm:$0xf] }
 0x5bd   :  { %v8662_v41 = vld [vmem:[#allocation12 + $0x330] sm:$0xf0]  ;;  %v9077_v30 = vor.u32 %v10189_v22, %v9076_v29  ;;  %v9044_v51 = vld [vmem:[#allocation12 + $0x610] sm:$0xf]  ;;  %v10110_v29 = vld [vmem:[#allocation12 + $0x3f4] sm:$0xf0] }
 0x5be   :  { %5606 = vmatpush.bf16.msra.mxu1 %v8277_v43  ;;  %5628 = vmatpush.bf16.msra.mxu3 %v8917_v25  ;;  %v8665_v43 = vor.u32 %v10081_v39, %v8662_v41  ;;  %v10161_v25 = vld [vmem:[#allocation12 + $0x594] sm:$0xf]  ;;  %v10181_v26 = vld [vmem:[#allocation12 + $0x62c] sm:$0xf0]  ;;  %v8765_v48 = vor.u32 %v10110_v29, %v8764_v54 }
 0x5bf   :  { %v9045_v45 = vor.u32 %v10181_v26, %v9044_v51  ;;  %v10225_v6 = vld [vmem:[#allocation12 + $0x794] sm:$0xf]  ;;  %v10102_v51 = vld [vmem:[#allocation12 + $0x3b4] sm:$0xf0] }
 0x5c0   :  { %5618 = vmatpush.bf16.msrb.mxu2 %v8565_v53  ;;  %5640 = vmatpush.bf16.msrb.mxu0 %v9205_v55  ;;  %v10073_v53 = vld [vmem:[#allocation12 + $0x2d4] sm:$0xf] }
 0x5c1   :  { %5607 = vmatmul.bf16.vlgmr.msra.gmra.mxu1 %v10893_v38  ;;  %v8630_v55 = vld [vmem:[#allocation12 + $0x2f0] sm:$0xf0] }
 0x5c2   :  { %5651 = vmatpush.bf16.msrb.mxu1 %v8505_v49  ;;  %5629 = vmatpush.bf16.msra.mxu3 %v8885_v57  ;;  %v8982_v49 = vld [vmem:[#allocation12 + $0x5b0] sm:$0xf0]  ;;  %v8633_v0 = vor.u32 %v10073_v53, %v8630_v55 }
 0x5c3   :  { %v8985_v19 = vor.u32 %v10161_v25, %v8982_v49  ;;  %v10153_v57 = vld [vmem:[#allocation12 + $0x554] sm:$0xf]  ;;  %v8732_v49 = vld [vmem:[#allocation12 + $0x398] sm:$0xf] }
 0x5c4   :  { %5619 = vmatpush.bf16.msrb.mxu2 %v8533_v5  ;;  %5641 = vmatpush.bf16.msrb.mxu0 %v9173_v58  ;;  %v8950_v5 = vld [vmem:[#allocation12 + $0x570] sm:$0xf0] }
 0x5c5   :  { %v10065_v58 = vld [vmem:[#allocation12 + $0x294] sm:$0xf]  ;;  %v8953_v11 = vor.u32 %v10153_v57, %v8950_v5  ;;  %v8700_v57 = vld [vmem:[#allocation12 + $0x358] sm:$0xf] }
 0x5c6   :  { %5652 = vmatpush.bf16.msrb.mxu1 %v8473_v4  ;;  %5630 = vmatpush.bf16.msra.mxu3 %v8853_v13  ;;  %v9273_v4 = vor.u32 %v10233_v18, %v9270_v62  ;;  %v8601_v60 = vor.u32 %v10065_v58, %v8598_v61  ;;  %v8278_v12 = vld [vmem:[#allocation12 + $0x30] sm:$0xf0] }
 0x5c7   :  { %5620 = vmatmul.bf16.vlgmr.msrb.gmra.mxu2 %v10896_v50  ;;  %v10145_v2 = vld [vmem:[#allocation12 + $0x514] sm:$0xf]  ;;  %v8281_v27 = vor.u32 %v9985_v10, %v8278_v12  ;;  %v10014_v10 = vld [vmem:[#allocation12 + $0xf4] sm:$0xf0] }
 0x5c8   :  { %5664 = vmatpush.bf16.msra.mxu2 %v8761_v8  ;;  %5642 = vmatpush.bf16.msrb.mxu0 %v9141_v17  ;;  %v8313_v8 = vor.u32 %v9993_v1, %v8310_v3  ;;  %v8918_v13 = vld [vmem:[#allocation12 + $0x530] sm:$0xf0]  ;;  %v8508_v17 = vld [vmem:[#allocation12 + $0x1d8] sm:$0xf] }
 0x5c9   :  { %v10057_v14 = vld [vmem:[#allocation12 + $0x254] sm:$0xf]  ;;  %v8921_v28 = vor.u32 %v10145_v2, %v8918_v13  ;;  %v8509_v37 = vor.u32 %v10046_v47, %v8508_v17  ;;  %v10174_v12 = vld [vmem:[#allocation12 + $0x5f4] sm:$0xf0] }
 0x5ca   :  { %5653 = vmatpush.bf16.msrb.mxu1 %v8441_v15  ;;  %5631 = vmatpush.bf16.msra.mxu3 %v8821_v20  ;;  %v9241_v15 = vor.u32 %v10225_v6, %v9238_v7  ;;  %v8566_v21 = vld [vmem:[#allocation12 + $0x270] sm:$0xf0]  ;;  %v10086_v17 = vld [vmem:[#allocation12 + $0x334] sm:$0xf0] }
 0x5cb   :  { %v9206_v24 = vld [vmem:[#allocation12 + $0x770] sm:$0xf0]  ;;  %v8569_v32 = vor.u32 %v10057_v14, %v8566_v21 }
 0x5cc   :  { %5665 = vmatpush.bf16.msra.mxu2 %v8729_v23  ;;  %5643 = vmatpush.bf16.msrb.mxu0 %v9109_v33  ;;  %v10217_v23 = vld [vmem:[#allocation12 + $0x754] sm:$0xf]  ;;  %v8476_v33 = vld [vmem:[#allocation12 + $0x198] sm:$0xf] }
 0x5cd   :  { %v10137_v31 = vld [vmem:[#allocation12 + $0x4d4] sm:$0xf]  ;;  %v8477_v39 = vor.u32 %v10038_v34, %v8476_v33  ;;  %v8636_v33 = vld [vmem:[#allocation12 + $0x2d8] sm:$0xf] }
 0x5ce   :  { %5654 = vmatpush.bf16.msrb.mxu1 %v8409_v9  ;;  %5632 = vmatpush.bf16.msra.mxu3 %v8789_v56  ;;  %v8886_v20 = vld [vmem:[#allocation12 + $0x4f0] sm:$0xf0]  ;;  %v9209_v9 = vor.u32 %v10217_v23, %v9206_v24  ;;  %v8348_v23 = vld [vmem:[#allocation12 + $0x98] sm:$0xf] }
 0x5cf   :  { %v10049_v35 = vld [vmem:[#allocation12 + $0x214] sm:$0xf]  ;;  %v8889_v22 = vor.u32 %v10137_v31, %v8886_v20  ;;  %v10006_v24 = vld [vmem:[#allocation12 + $0xb4] sm:$0xf0] }
 0x5d0   :  { %5666 = vmatpush.bf16.msra.mxu2 %v8697_v40  ;;  %5644 = vmatpush.bf16.msrb.mxu0 %v9077_v30  ;;  %v8534_v36 = vld [vmem:[#allocation12 + $0x230] sm:$0xf0]  ;;  %v10030_v30 = vld [vmem:[#allocation12 + $0x174] sm:$0xf0] }
 0x5d1   :  { %5633 = vmatmul.bf16.vlgmr.msra.gmra.mxu3 %v10901_v59  ;;  %v10209_v40 = vld [vmem:[#allocation12 + $0x714] sm:$0xf]  ;;  %v8537_v41 = vor.u32 %v10049_v35, %v8534_v36  ;;  %v8445_v53 = vor.u32 %v10030_v30, %v8444_v46  ;;  %v10166_v31 = vld [vmem:[#allocation12 + $0x5b4] sm:$0xf0] }
 0x5d2   :  { %5655 = vmatpush.bf16.msrb.mxu1 %v8377_v42  ;;  %5677 = vmatpush.bf16.msrb.mxu3 %v9017_v44  ;;  %v9174_v52 = vld [vmem:[#allocation12 + $0x730] sm:$0xf0]  ;;  %v10078_v34 = vld [vmem:[#allocation12 + $0x2f4] sm:$0xf0] }
 0x5d3   :  { %v9177_v56 = vor.u32 %v10209_v40, %v9174_v52  ;;  %v10129_v42 = vld [vmem:[#allocation12 + $0x494] sm:$0xf]  ;;  %v9276_v35 = vld [vmem:[#allocation12 + $0x7d8] sm:$0xf]  ;;  %v8349_v40 = vor.u32 %v10006_v24, %v8348_v23  ;;  %v8637_v29 = vor.u32 %v10078_v34, %v8636_v33  ;;  %v8766_v23 = vld [vmem:[#allocation12 + $0x3f8] sm:$0xf0] }
 0x5d4   :  { %5667 = vmatpush.bf16.msra.mxu2 %v8665_v43  ;;  %5645 = vmatpush.bf16.msrb.mxu0 %v9045_v45  ;;  %v8854_v44 = vld [vmem:[#allocation12 + $0x4b0] sm:$0xf0]  ;;  %v10022_v45 = vld [vmem:[#allocation12 + $0x134] sm:$0xf0]  ;;  %v8446_v34 = vld [vmem:[#allocation12 + $0x178] sm:$0xf0] }
 0x5d5   :  { %v10201_v43 = vld [vmem:[#allocation12 + $0x6d4] sm:$0xf]  ;;  %v8857_v26 = vor.u32 %v10129_v42, %v8854_v44  ;;  %v10238_v36 = vld [vmem:[#allocation12 + $0x7f4] sm:$0xf0] }
 0x5d6   :  { %5656 = vmatpush.bf16.msrb.mxu1 %v8345_v63  ;;  %5678 = vmatpush.bf16.msrb.mxu3 %v8985_v19  ;;  %v9142_v25 = vld [vmem:[#allocation12 + $0x6f0] sm:$0xf0]  ;;  %v8412_v63 = vld [vmem:[#allocation12 + $0x118] sm:$0xf]  ;;  %v8733_v19 = vor.u32 %v10102_v51, %v8732_v49  ;;  %v9277_v42 = vor.u32 %v10238_v36, %v9276_v35 }
 0x5d7   :  { %5646 = vmatmul.bf16.vlgmr.msrb.gmra.mxu0 %v10905_v16  ;;  %v9145_v55 = vor.u32 %v10201_v43, %v9142_v25  ;;  %v10121_v18 = vld [vmem:[#allocation12 + $0x454] sm:$0xf]  ;;  %v8413_v61 = vor.u32 %v10022_v45, %v8412_v63  ;;  %v10158_v44 = vld [vmem:[#allocation12 + $0x574] sm:$0xf0]  ;;  %v8510_v45 = vld [vmem:[#allocation12 + $0x1f8] sm:$0xf0] }
 0x5d8   :  { %5668 = vmatpush.bf16.msra.mxu2 %v8633_v0  ;;  %5690 = vmatpush.bf16.msra.mxu0 %v9273_v4  ;;  %v8822_v62 = vld [vmem:[#allocation12 + $0x470] sm:$0xf0]  ;;  %v10094_v4 = vld [vmem:[#allocation12 + $0x374] sm:$0xf0] }
 0x5d9   :  { %v10193_v0 = vld [vmem:[#allocation12 + $0x694] sm:$0xf]  ;;  %v8825_v5 = vor.u32 %v10121_v18, %v8822_v62  ;;  %v8604_v46 = vld [vmem:[#allocation12 + $0x298] sm:$0xf] }
 0x5da   :  { %5657 = vmatpush.bf16.msrb.mxu1 %v8313_v8  ;;  %5679 = vmatpush.bf16.msrb.mxu3 %v8953_v11  ;;  %v9110_v1 = vld [vmem:[#allocation12 + $0x6b0] sm:$0xf0]  ;;  %v8380_v8 = vld [vmem:[#allocation12 + $0xd8] sm:$0xf]  ;;  %v8701_v11 = vor.u32 %v10094_v4, %v8700_v57 }
 0x5db   :  { %v10113_v58 = vld [vmem:[#allocation12 + $0x414] sm:$0xf]  ;;  %v9113_v6 = vor.u32 %v10193_v0, %v9110_v1  ;;  %v8381_v14 = vor.u32 %v10014_v10, %v8380_v8  ;;  %v9244_v30 = vld [vmem:[#allocation12 + $0x798] sm:$0xf] }
 0x5dc   :  { %5669 = vmatpush.bf16.msra.mxu2 %v8601_v60  ;;  %5691 = vmatpush.bf16.msra.mxu0 %v9241_v15  ;;  %v8790_v7 = vld [vmem:[#allocation12 + $0x430] sm:$0xf0]  ;;  %v9020_v60 = vld [vmem:[#allocation12 + $0x5d8] sm:$0xf] }
 0x5dd   :  { %v10185_v2 = vld [vmem:[#allocation12 + $0x654] sm:$0xf]  ;;  %v8668_v15 = vld [vmem:[#allocation12 + $0x318] sm:$0xf]  ;;  %v8793_v47 = vor.u32 %v10113_v58, %v8790_v7  ;;  %v9021_v21 = vor.u32 %v10174_v12, %v9020_v60  ;;  %v10034_v60 = vld [vmem:[#allocation12 + $0x19c] sm:$0xf] }
 0x5de   :  { %5658 = vmatpush.bf16.msrb.mxu1 %v8281_v27  ;;  %5680 = vmatpush.bf16.msrb.mxu3 %v8921_v28  ;;  %v10924_v3 = vpop.f32.mrf.mxu1  ;;  %v9078_v13 = vld [vmem:[#allocation12 + $0x670] sm:$0xf0]  ;;  %v8669_v28 = vor.u32 %v10086_v17, %v8668_v15  ;;  %v10230_v43 = vld [vmem:[#allocation12 + $0x7b4] sm:$0xf0]  ;;  %v8478_v12 = vld [vmem:[#allocation12 + $0x1b8] sm:$0xf0] }
 0x5df   :  { %v9081_v27 = vor.u32 %v10185_v2, %v9078_v13  ;;  %v10177_v20 = vld [vmem:[#allocation12 + $0x614] sm:$0xf]  ;;  %v8284_v49 = vld [vmem:[#allocation12 + $0x18] sm:$0xf]  ;;  %v9245_v63 = vor.u32 %v10230_v43, %v9244_v30 }
 0x5e0   :  { %5670 = vmatpush.bf16.msra.mxu2 %v8569_v32  ;;  %5692 = vmatpush.bf16.msra.mxu0 %v9209_v9  ;;  %v9046_v9 = vld [vmem:[#allocation12 + $0x630] sm:$0xf0]  ;;  %v10150_v18 = vld [vmem:[#allocation12 + $0x534] sm:$0xf0] }
 0x5e1   :  { %5659 = vmatmul.bf16.vlgmr.msrb.gmra.mxu1 %v10893_v38  ;;  %v9049_v54 = vor.u32 %v10177_v20, %v9046_v9  ;;  %v8572_v0 = vld [vmem:[#allocation12 + $0x258] sm:$0xf]  ;;  %v10026_v9 = vld [vmem:[#allocation12 + $0x15c] sm:$0xf] }
 0x5e2   :  { %5703 = vmatpush.bf16.msra.mxu1 %v8509_v37  ;;  %5681 = vmatpush.bf16.msrb.mxu3 %v8889_v22  ;;  %v8988_v37 = vld [vmem:[#allocation12 + $0x598] sm:$0xf] }
 0x5e3   :  { %v8989_v52 = vor.u32 %v10166_v31, %v8988_v37  ;;  %v8316_v22 = vld [vmem:[#allocation12 + $0x58] sm:$0xf] }
 0x5e4   :  { %5671 = vmatpush.bf16.msra.mxu2 %v8537_v41  ;;  %5693 = vmatpush.bf16.msra.mxu0 %v9177_v56  ;;  %v8956_v41 = vld [vmem:[#allocation12 + $0x558] sm:$0xf] }
 0x5e5   :  { %v8957_v51 = vor.u32 %v10158_v44, %v8956_v41  ;;  %v10062_v1 = vld [vmem:[#allocation12 + $0x274] sm:$0xf0]  ;;  %v10018_v44 = vld [vmem:[#allocation12 + $0x11c] sm:$0xf] }
 0x5e6   :  { %5704 = vmatpush.bf16.msra.mxu1 %v8477_v39  ;;  %5682 = vmatpush.bf16.msrb.mxu3 %v8857_v26  ;;  %v5402_v32 = vpop.f32.mrf.mxu1  ;;  %v9998_v39 = vld [vmem:[#allocation12 + $0x74] sm:$0xf0]  ;;  %v8573_v10 = vor.u32 %v10062_v1, %v8572_v0  ;;  %v10010_v0 = vld [vmem:[#allocation12 + $0xdc] sm:$0xf] }
 0x5e7   :  { %5672 = vmatmul.bf16.vlgmr.msra.gmra.mxu2 %v10896_v50  ;;  %v8317_v25 = vor.u32 %v9998_v39, %v8316_v22  ;;  %v9212_v57 = vld [vmem:[#allocation12 + $0x758] sm:$0xf]  ;;  %v8449_v22 = vor.u32 %v10026_v9, %v8446_v34  ;;  %v8382_v1 = vld [vmem:[#allocation12 + $0xf8] sm:$0xf0] }
 0x5e8   :  { %5716 = vmatpush.bf16.msrb.mxu2 %v8765_v48  ;;  %5694 = vmatpush.bf16.msra.mxu0 %v9145_v55  ;;  %v10070_v48 = vld [vmem:[#allocation12 + $0x2b4] sm:$0xf0] }
 0x5e9   :  { %v8605_v26 = vor.u32 %v10070_v48, %v8604_v46  ;;  %v8924_v55 = vld [vmem:[#allocation12 + $0x518] sm:$0xf]  ;;  %v8414_v48 = vld [vmem:[#allocation12 + $0x138] sm:$0xf0] }
 0x5ea   :  { %5705 = vmatpush.bf16.msra.mxu1 %v8445_v53  ;;  %5683 = vmatpush.bf16.msrb.mxu3 %v8825_v5  ;;  %v10928_v56 = vpop.f32.mrf.mxu2  ;;  %v9990_v53 = vld [vmem:[#allocation12 + $0x34] sm:$0xf0]  ;;  %v8925_v58 = vor.u32 %v10150_v18, %v8924_v55 }
 0x5eb   :  { %v10222_v4 = vld [vmem:[#allocation12 + $0x774] sm:$0xf0]  ;;  %v8285_v5 = vor.u32 %v9990_v53, %v8284_v49 }
 0x5ec   :  { %5717 = vmatpush.bf16.msrb.mxu2 %v8733_v19  ;;  %5695 = vmatpush.bf16.msra.mxu0 %v9113_v6  ;;  %v10042_v19 = vld [vmem:[#allocation12 + $0x1dc] sm:$0xf]  ;;  %v8892_v6 = vld [vmem:[#allocation12 + $0x4d8] sm:$0xf] }
 0x5ed   :  { %v10142_v7 = vld [vmem:[#allocation12 + $0x4f4] sm:$0xf0] }
 0x5ee   :  { %5706 = vmatpush.bf16.msra.mxu1 %v8413_v61  ;;  %5684 = vmatpush.bf16.msrb.mxu3 %v8793_v47  ;;  %v10930_v62 = vpop.f32.mrf.mxu1  ;;  %v8513_v61 = vor.u32 %v10042_v19, %v8510_v45  ;;  %v8540_v2 = vld [vmem:[#allocation12 + $0x218] sm:$0xf]  ;;  %v8893_v24 = vor.u32 %v10142_v7, %v8892_v6  ;;  %v10082_v6 = vld [vmem:[#allocation12 + $0x31c] sm:$0xf] }
 0x5ef   :  { %v10054_v13 = vld [vmem:[#allocation12 + $0x234] sm:$0xf0]  ;;  %v8670_v7 = vld [vmem:[#allocation12 + $0x338] sm:$0xf0] }
 0x5f0   :  { %5718 = vmatpush.bf16.msrb.mxu2 %v8701_v11  ;;  %5696 = vmatpush.bf16.msra.mxu0 %v9081_v27  ;;  %v9213_v11 = vor.u32 %v10222_v4, %v9212_v57  ;;  %v9180_v15 = vld [vmem:[#allocation12 + $0x718] sm:$0xf]  ;;  %v8481_v27 = vor.u32 %v10034_v60, %v8478_v12  ;;  %v8541_v37 = vor.u32 %v10054_v13, %v8540_v2  ;;  %v10170_v4 = vld [vmem:[#allocation12 + $0x5dc] sm:$0xf] }
 0x5f1   :  { %5685 = vmatmul.bf16.vlgmr.msrb.gmra.mxu3 %v10901_v59  ;;  %v10214_v17 = vld [vmem:[#allocation12 + $0x734] sm:$0xf0]  ;;  %v10002_v12 = vld [vmem:[#allocation12 + $0x9c] sm:$0xf] }
 0x5f2   :  { %5707 = vmatpush.bf16.msra.mxu1 %v8381_v14  ;;  %5729 = vmatpush.bf16.msra.mxu3 %v9021_v21  ;;  %v5415_v8 = vpop.f32.mrf.mxu2  ;;  %v10106_v21 = vld [vmem:[#allocation12 + $0x3dc] sm:$0xf]  ;;  %v9181_v31 = vor.u32 %v10214_v17, %v9180_v15  ;;  %v8860_v20 = vld [vmem:[#allocation12 + $0x498] sm:$0xf]  ;;  %v8673_v15 = vor.u32 %v10082_v6, %v8670_v7 }
 0x5f3   :  { %v10134_v32 = vld [vmem:[#allocation12 + $0x4b4] sm:$0xf0]  ;;  %v8769_v33 = vor.u32 %v10106_v21, %v8766_v23  ;;  %v8350_v2 = vld [vmem:[#allocation12 + $0xb8] sm:$0xf0] }
 0x5f4   :  { %5719 = vmatpush.bf16.msrb.mxu2 %v8669_v28  ;;  %5697 = vmatpush.bf16.msra.mxu0 %v9049_v54  ;;  %v10933_v47 = vpop.f32.mrf.mxu3  ;;  %v10935_v14 = vpop.f32.mrf.mxu0  ;;  %v9148_v35 = vld [vmem:[#allocation12 + $0x6d8] sm:$0xf]  ;;  %v8861_v54 = vor.u32 %v10134_v32, %v8860_v20  ;;  %v10162_v17 = vld [vmem:[#allocation12 + $0x59c] sm:$0xf] }
 0x5f5   :  { %v10206_v36 = vld [vmem:[#allocation12 + $0x6f4] sm:$0xf0]  ;;  %v8990_v21 = vld [vmem:[#allocation12 + $0x5b8] sm:$0xf0] }
 0x5f6   :  { %5708 = vmatpush.bf16.msra.mxu1 %v8349_v40  ;;  %5730 = vmatpush.bf16.msra.mxu3 %v8989_v52  ;;  %v5454_v28 = vpop.f32.mrf.mxu1  ;;  %v10098_v40 = vld [vmem:[#allocation12 + $0x39c] sm:$0xf]  ;;  %v9149_v39 = vor.u32 %v10206_v36, %v9148_v35  ;;  %v8828_v41 = vld [vmem:[#allocation12 + $0x458] sm:$0xf]  ;;  %v8993_v34 = vor.u32 %v10162_v17, %v8990_v21 }
 0x5f7   :  { %5698 = vmatmul.bf16.vlgmr.msra.gmra.mxu0 %v10905_v16  ;;  %v8734_v52 = vld [vmem:[#allocation12 + $0x3b8] sm:$0xf0]  ;;  %v9116_v30 = vld [vmem:[#allocation12 + $0x698] sm:$0xf] }
 0x5f8   :  { %5720 = vmatpush.bf16.msrb.mxu2 %v8637_v29  ;;  %5742 = vmatpush.bf16.msrb.mxu0 %v9277_v42  ;;  %v10126_v42 = vld [vmem:[#allocation12 + $0x474] sm:$0xf0]  ;;  %v8737_v46 = vor.u32 %v10098_v40, %v8734_v52  ;;  %v10234_v20 = vld [vmem:[#allocation12 + $0x7dc] sm:$0xf] }
 0x5f9   :  { %v10198_v43 = vld [vmem:[#allocation12 + $0x6b4] sm:$0xf0]  ;;  %v8829_v53 = vor.u32 %v10126_v42, %v8828_v41  ;;  %v9278_v32 = vld [vmem:[#allocation12 + $0x7f8] sm:$0xf0] }
 0x5fa   :  { %5709 = vmatpush.bf16.msra.mxu1 %v8317_v25  ;;  %5731 = vmatpush.bf16.msra.mxu3 %v8957_v51  ;;  %v10938_v29 = vpop.f32.mrf.mxu2  ;;  %v10090_v51 = vld [vmem:[#allocation12 + $0x35c] sm:$0xf]  ;;  %v8796_v55 = vld [vmem:[#allocation12 + $0x418] sm:$0xf]  ;;  %v9117_v19 = vor.u32 %v10198_v43, %v9116_v30 }
 0x5fb   :  { %v10118_v45 = vld [vmem:[#allocation12 + $0x434] sm:$0xf0]  ;;  %v9994_v40 = vld [vmem:[#allocation12 + $0x5c] sm:$0xf] }
 0x5fc   :  { %5721 = vmatpush.bf16.msrb.mxu2 %v8605_v26  ;;  %5743 = vmatpush.bf16.msrb.mxu0 %v9245_v63  ;;  %v5428_v25 = vpop.f32.mrf.mxu3  ;;  %v5441_v49 = vpop.f32.mrf.mxu0  ;;  %v8702_v26 = vld [vmem:[#allocation12 + $0x378] sm:$0xf0]  ;;  %v8417_v63 = vor.u32 %v10018_v44, %v8414_v48  ;;  %v8797_v8 = vor.u32 %v10118_v45, %v8796_v55  ;;  %v9052_v23 = vld [vmem:[#allocation12 + $0x618] sm:$0xf] }
 0x5fd   :  { %v8705_v57 = vor.u32 %v10090_v51, %v8702_v26  ;;  %v10182_v28 = vld [vmem:[#allocation12 + $0x634] sm:$0xf0]  ;;  %v8318_v52 = vld [vmem:[#allocation12 + $0x78] sm:$0xf0] }
 0x5fe   :  { %5710 = vmatpush.bf16.msra.mxu1 %v8285_v5  ;;  %5732 = vmatpush.bf16.msra.mxu3 %v8925_v58  ;;  %v10941_v18 = vpop.f32.mrf.mxu1  ;;  %v9022_v5 = vld [vmem:[#allocation12 + $0x5f8] sm:$0xf0]  ;;  %v9084_v58 = vld [vmem:[#allocation12 + $0x658] sm:$0xf]  ;;  %v9053_v35 = vor.u32 %v10182_v28, %v9052_v23  ;;  %v8321_v48 = vor.u32 %v9994_v40, %v8318_v52  ;;  %v10253_v52 = vld [vmem:[#allocation13 + $0x70] sm:$0xff] }
 0x5ff   :  { %v9025_v60 = vor.u32 %v10170_v4, %v9022_v5  ;;  %v10066_v41 = vld [vmem:[#allocation12 + $0x29c] sm:$0xf] }
 0x600   :  { %5722 = vmatpush.bf16.msrb.mxu2 %v8573_v10  ;;  %5744 = vmatpush.bf16.msrb.mxu0 %v9213_v11  ;;  %v8385_v11 = vor.u32 %v10010_v0, %v8382_v1  ;;  %v8606_v42 = vld [vmem:[#allocation12 + $0x2b8] sm:$0xf0] }
 0x601   :  { %5711 = vmatmul.bf16.vlgmr.msra.gmra.mxu1 %v10893_v38  ;;  %v10226_v44 = vld [vmem:[#allocation12 + $0x79c] sm:$0xf]  ;;  %v8609_v25 = vor.u32 %v10066_v41, %v8606_v42  ;;  %v10243_v42 = vld [vmem:[#allocation13 + $0x20] sm:$0xff] }
 0x602   :  { %5755 = vmatpush.bf16.msrb.mxu1 %v8513_v61  ;;  %5733 = vmatpush.bf16.msra.mxu3 %v8893_v24  ;;  %v10190_v61 = vld [vmem:[#allocation12 + $0x674] sm:$0xf0]  ;;  %v5467_v10 = vpop.f32.mrf.mxu2  ;;  %v9986_v49 = vld [vmem:[#allocation12 + $0x1c] sm:$0xf] }
 0x603   :  { %v9085_v13 = vor.u32 %v10190_v61, %v9084_v58  ;;  %v8286_v51 = vld [vmem:[#allocation12 + $0x38] sm:$0xf0] }
 0x604   :  { %5723 = vmatpush.bf16.msrb.mxu2 %v8541_v37  ;;  %5745 = vmatpush.bf16.msrb.mxu0 %v9181_v31  ;;  %v10943_v24 = vpop.f32.mrf.mxu3  ;;  %v10074_v37 = vld [vmem:[#allocation12 + $0x2dc] sm:$0xf]  ;;  %v8289_v4 = vor.u32 %v9986_v49, %v8286_v51  ;;  %v10252_v51 = vld [vmem:[#allocation13 + $0x68] sm:$0xff] }
 0x605   :  { %v8638_v31 = vld [vmem:[#allocation12 + $0x2f8] sm:$0xf0] }
 0x606   :  { %5756 = vmatpush.bf16.msrb.mxu1 %v8481_v27  ;;  %5734 = vmatpush.bf16.msra.mxu3 %v8861_v54  ;;  %v10945_v27 = vpop.f32.mrf.mxu0  ;;  %v5506_v9 = vpop.f32.mrf.mxu1  ;;  %v8641_v36 = vor.u32 %v10074_v37, %v8638_v31  ;;  %v10154_v54 = vld [vmem:[#allocation12 + $0x55c] sm:$0xf] }
 0x607   :  { %5724 = vmatmul.bf16.vlgmr.msrb.gmra.mxu2 %v10896_v50  ;;  %v10058_v45 = vld [vmem:[#allocation12 + $0x25c] sm:$0xf] }
 0x608   :  { %5768 = vmatpush.bf16.msra.mxu2 %v8769_v33  ;;  %5746 = vmatpush.bf16.msrb.mxu0 %v9149_v39  ;;  %v8353_v33 = vor.u32 %v10002_v12, %v8350_v2  ;;  %v8958_v39 = vld [vmem:[#allocation12 + $0x578] sm:$0xf0] }
 0x609   :  { %v8961_v43 = vor.u32 %v10154_v54, %v8958_v39  ;;  %v8574_v0 = vld [vmem:[#allocation12 + $0x278] sm:$0xf0] }
 0x60a   :  { %5757 = vmatpush.bf16.msrb.mxu1 %v8449_v22  ;;  %5735 = vmatpush.bf16.msra.mxu3 %v8829_v53  ;;  %v9281_v22 = vor.u32 %v10234_v20, %v9278_v32  ;;  %v10948_v30 = vpop.f32.mrf.mxu2  ;;  %v10218_v1 = vld [vmem:[#allocation12 + $0x75c] sm:$0xf]  ;;  %v8577_v61 = vor.u32 %v10058_v45, %v8574_v0  ;;  %v10251_v0 = vld [vmem:[#allocation13 + $0x60] sm:$0xff] }
 0x60b   :  { %v10246_v58 = vld [vmem:[#allocation13 + $0x38] sm:$0xff] }
 0x60c   :  { %5769 = vmatpush.bf16.msra.mxu2 %v8737_v46  ;;  %5747 = vmatpush.bf16.msrb.mxu0 %v9117_v19  ;;  %v9246_v46 = vld [vmem:[#allocation12 + $0x7b8] sm:$0xf0]  ;;  %v5480_v26 = vpop.f32.mrf.mxu3 }
 0x60d   :  { %v9249_v55 = vor.u32 %v10226_v44, %v9246_v46  ;;  %v8926_v19 = vld [vmem:[#allocation12 + $0x538] sm:$0xf0] }
 0x60e   :  { %5758 = vmatpush.bf16.msrb.mxu1 %v8417_v63  ;;  %5736 = vmatpush.bf16.msra.mxu3 %v8797_v8  ;;  %v5493_v53 = vpop.f32.mrf.mxu0  ;;  %v10146_v63 = vld [vmem:[#allocation12 + $0x51c] sm:$0xf] }
 0x60f   :  { %v8929_v5 = vor.u32 %v10146_v63, %v8926_v19  ;;  %v10138_v7 = vld [vmem:[#allocation12 + $0x4dc] sm:$0xf] }
 0x610   :  { %5770 = vmatpush.bf16.msra.mxu2 %v8705_v57  ;;  %5748 = vmatpush.bf16.msrb.mxu0 %v9085_v13  ;;  %v9214_v57 = vld [vmem:[#allocation12 + $0x778] sm:$0xf0] }
 0x611   :  { %5737 = vmatmul.bf16.vlgmr.msra.gmra.mxu3 %v10901_v59  ;;  %v9217_v6 = vor.u32 %v10218_v1, %v9214_v57  ;;  %v8894_v8 = vld [vmem:[#allocation12 + $0x4f8] sm:$0xf0] }
 0x612   :  { %5759 = vmatpush.bf16.msrb.mxu1 %v8385_v11  ;;  %5781 = vmatpush.bf16.msrb.mxu3 %v9025_v60  ;;  %v10050_v10 = vld [vmem:[#allocation12 + $0x21c] sm:$0xf]  ;;  %v5519_v2 = vpop.f32.mrf.mxu2  ;;  %v8897_v13 = vor.u32 %v10138_v7, %v8894_v8 }
 0x613   :  { %v8542_v11 = vld [vmem:[#allocation12 + $0x238] sm:$0xf0] }
 0x614   :  { %5771 = vmatpush.bf16.msra.mxu2 %v8673_v15  ;;  %5749 = vmatpush.bf16.msrb.mxu0 %v9053_v35  ;;  %v10210_v60 = vld [vmem:[#allocation12 + $0x71c] sm:$0xf]  ;;  %v10245_v15 = vld [vmem:[#allocation13 + $0x30] sm:$0xff]  ;;  %v10951_v17 = vpop.f32.mrf.mxu3  ;;  %v8545_v21 = vor.u32 %v10050_v10, %v8542_v11 }
 0x615   :  { %v9182_v12 = vld [vmem:[#allocation12 + $0x738] sm:$0xf0] }
 0x616   :  { %5760 = vmatpush.bf16.msrb.mxu1 %v8353_v33  ;;  %5782 = vmatpush.bf16.msrb.mxu3 %v8993_v34  ;;  %v9185_v23 = vor.u32 %v10210_v60, %v9182_v12  ;;  %v10130_v28 = vld [vmem:[#allocation12 + $0x49c] sm:$0xf]  ;;  %v10954_v31 = vpop.f32.mrf.mxu0  ;;  %v10244_v34 = vld [vmem:[#allocation13 + $0x28] sm:$0xff] }
 0x617   :  { %5750 = vmatmul.bf16.vlgmr.msrb.gmra.mxu0 %v10905_v16  ;;  %v8862_v37 = vld [vmem:[#allocation12 + $0x4b8] sm:$0xf0]  ;;  %v10240_v12 = vld [vmem:[#allocation13 + $0x8] sm:$0xff] }
 0x618   :  { %5772 = vmatpush.bf16.msra.mxu2 %v8641_v36  ;;  %5794 = vmatpush.bf16.msra.mxu0 %v9281_v22  ;;  %v10254_v20 = vld [vmem:[#allocation13 + $0x78] sm:$0xff]  ;;  %v8865_v33 = vor.u32 %v10130_v28, %v8862_v37  ;;  %v10268_v37 = vld [vmem:[#allocation13 + $0xe8] sm:$0xff] }
 0x619   :  { %v10202_v32 = vld [vmem:[#allocation12 + $0x6dc] sm:$0xf] }
 0x61a   :  { %5761 = vmatpush.bf16.msrb.mxu1 %v8321_v48  ;;  %5783 = vmatpush.bf16.msrb.mxu3 %v8961_v43  ;;  %v9150_v9 = vld [vmem:[#allocation12 + $0x6f8] sm:$0xf0] }
 0x61b   :  { %v9153_v35 = vor.u32 %v10202_v32, %v9150_v9  ;;  %v10122_v36 = vld [vmem:[#allocation12 + $0x45c] sm:$0xf] }
 0x61c   :  { %5773 = vmatpush.bf16.msra.mxu2 %v8609_v25  ;;  %5795 = vmatpush.bf16.msra.mxu0 %v9249_v55  ;;  %v8830_v40 = vld [vmem:[#allocation12 + $0x478] sm:$0xf0]  ;;  %v5532_v44 = vpop.f32.mrf.mxu3 }
 0x61d   :  { %v10194_v54 = vld [vmem:[#allocation12 + $0x69c] sm:$0xf]  ;;  %v8833_v41 = vor.u32 %v10122_v36, %v8830_v40  ;;  %v10267_v40 = vld [vmem:[#allocation13 + $0xe0] sm:$0xff] }
 0x61e   :  { %5762 = vmatpush.bf16.msrb.mxu1 %v8289_v4  ;;  %5784 = vmatpush.bf16.msrb.mxu3 %v8929_v5  ;;  %v9118_v22 = vld [vmem:[#allocation12 + $0x6b8] sm:$0xf0]  ;;  %v10962_v39 = vpop.f32.mrf.mxu1  ;;  %v5545_v49 = vpop.f32.mrf.mxu0 }
 0x61f   :  { %v9121_v46 = vor.u32 %v10194_v54, %v9118_v22  ;;  %v10114_v48 = vld [vmem:[#allocation12 + $0x41c] sm:$0xf]  ;;  %v10257_v22 = vld [vmem:[#allocation13 + $0x90] sm:$0xff]  ;;  %v10256_v49 = vld [vmem:[#allocation13 + $0x88] sm:$0xff] }
 0x620   :  { %5774 = vmatpush.bf16.msra.mxu2 %v8577_v61  ;;  %5796 = vmatpush.bf16.msra.mxu0 %v9217_v6  ;;  %v8798_v43 = vld [vmem:[#allocation12 + $0x438] sm:$0xf0]  ;;  %v10241_v61 = vld [vmem:[#allocation13 + $0x10] sm:$0xff] }
 0x621   :  { %5763 = vmatmul.bf16.vlgmr.msrb.gmra.mxu1 %v10893_v38  ;;  %v10959_v38 = vld [vmem:[%s11034_s22] sm:$0xff]  ;;  %v10186_v26 = vld [vmem:[#allocation12 + $0x65c] sm:$0xf]  ;;  %v8801_v55 = vor.u32 %v10114_v48, %v8798_v43  ;;  %v10261_v6 = vld [vmem:[#allocation13 + $0xb0] sm:$0xff] }
 0x622   :  { %6339 = vmatpush.bf16.msra.mxu1 %v10246_v58  ;;  %5785 = vmatpush.bf16.msrb.mxu3 %v8897_v13  ;;  %v4095_v25 = vperm.slane %v10959_v38, 0  ;;  %v9086_v53 = vld [vmem:[#allocation12 + $0x678] sm:$0xf0]  ;;  %v4096_v1 = vperm.slane %v10959_v38, 1  ;;  %v10249_v13 = vld [vmem:[#allocation13 + $0x50] sm:$0xff]  ;;  %v4097_v28 = vperm.slane %v10959_v38, 2 }
 0x623   :  { %v10262_v63 = vld [vmem:[#allocation13 + $0xb8] sm:$0xff]  ;;  %v9089_v45 = vor.u32 %v10186_v26, %v9086_v53  ;;  %v10285_v26 = vld [vmem:[#allocation13 + $0x170] sm:$0xff] }
 0x624   :  { %5775 = vmatpush.bf16.msra.mxu2 %v8545_v21  ;;  %5797 = vmatpush.bf16.msra.mxu0 %v9185_v23  ;;  %v5401_v19 = vadd.f32 %v10924_v3, %v4095_v25  ;;  %v10178_v57 = vld [vmem:[#allocation12 + $0x61c] sm:$0xf]  ;;  %v5453_v10 = vadd.f32 %v10930_v62, %v4096_v1  ;;  %v10269_v21 = vld [vmem:[#allocation13 + $0xf0] sm:$0xff]  ;;  %v10248_v23 = vld [vmem:[#allocation13 + $0x48] sm:$0xff] }
 0x625   :  { %v9054_v4 = vld [vmem:[#allocation12 + $0x638] sm:$0xf0] }
 0x626   :  { %6340 = vmatpush.bf16.msra.mxu1 %v10245_v15  ;;  %5786 = vmatpush.bf16.msrb.mxu3 %v8865_v33  ;;  %v5414_v5 = vadd.f32 %v10928_v56, %v5401_v19  ;;  %v5558_v58 = vpop.f32.mrf.mxu1  ;;  %v9057_v3 = vor.u32 %v10178_v57, %v9054_v4  ;;  %v10250_v8 = vld [vmem:[#allocation13 + $0x58] sm:$0xff]  ;;  %v5466_v56 = vadd.f32 %v10938_v29, %v5453_v10  ;;  %v10259_v29 = vld [vmem:[#allocation13 + $0xa0] sm:$0xff]  ;;  %v10264_v19 = vld [vmem:[#allocation13 + $0xc8] sm:$0xff]  ;;  %v4099_v10 = vperm.slane %v10959_v38, 4 }
 0x627   :  { %5776 = vmatmul.bf16.vlgmr.msra.gmra.mxu2 %v10896_v50  ;;  %v10242_v50 = vld [vmem:[#allocation13 + $0x18] sm:$0xff] }
 0x628   :  { %6352 = vmatpush.bf16.msrb.mxu2 %v10254_v20  ;;  %5798 = vmatpush.bf16.msra.mxu0 %v9153_v35  ;;  %v5427_v7 = vadd.f32 %v10933_v47, %v5414_v5  ;;  %v10270_v11 = vld [vmem:[#allocation13 + $0xf8] sm:$0xff]  ;;  %v10260_v47 = vld [vmem:[#allocation13 + $0xa8] sm:$0xff]  ;;  %v5479_v15 = vadd.f32 %v10943_v24, %v5466_v56  ;;  %v5505_v35 = vadd.f32 %v10941_v18, %v4097_v28  ;;  %v10273_v5 = vld [vmem:[#allocation13 + $0x110] sm:$0xff] }
 0x629   :  { %v10278_v20 = vld [vmem:[#allocation13 + $0x138] sm:$0xff]  ;;  %v10276_v18 = vld [vmem:[#allocation13 + $0x128] sm:$0xff] }
 0x62a   :  { %6341 = vmatpush.bf16.msra.mxu1 %v10244_v34  ;;  %5787 = vmatpush.bf16.msrb.mxu3 %v8833_v41  ;;  %v5569_v60 = vpop.f32.mrf.mxu2  ;;  %v5440_v2 = vadd.f32 %v10935_v14, %v5427_v7  ;;  %v5492_v14 = vadd.f32 %v10945_v27, %v5479_v15  ;;  %v10247_v34 = vld [vmem:[#allocation13 + $0x40] sm:$0xff]  ;;  %v4098_v27 = vperm.slane %v10959_v38, 3  ;;  %v5518_v54 = vadd.f32 %v10948_v30, %v5505_v35  ;;  %v10266_v44 = vld [vmem:[#allocation13 + $0xd8] sm:$0xff] }
 0x62b   :  { %v10286_v48 = vld [vmem:[#allocation13 + $0x178] sm:$0xff]  ;;  %v4100_v35 = vperm.slane %v10959_v38, 5 }
 0x62c   :  { %6353 = vmatpush.bf16.msrb.mxu2 %v10253_v52  ;;  %5799 = vmatpush.bf16.msra.mxu0 %v9121_v46  ;;  %v5807_v62 = vmax.f32 %v5440_v2, 0.0  ;;  %v5808_v36 = vmax.f32 %v5492_v14, 0.0  ;;  %v10277_v52 = vld [vmem:[#allocation13 + $0x130] sm:$0xff]  ;;  %v5557_v46 = vadd.f32 %v10962_v39, %v4098_v27  ;;  %v10282_v7 = vld [vmem:[#allocation13 + $0x158] sm:$0xff] }
 0x62e   :  { %6342 = vmatpush.bf16.msra.mxu1 %v10243_v42  ;;  %5788 = vmatpush.bf16.msrb.mxu3 %v8801_v55  ;;  %v5944_v24 = vpack.c.bf16 %v5807_v62, %v5807_v62  ;;  %v5945_v41 = vpack.c.bf16 %v5808_v36, %v5808_v36  ;;  %v5531_v42 = vadd.f32 %v10951_v17, %v5518_v54  ;;  %v10265_v17 = vld [vmem:[#allocation13 + $0xd0] sm:$0xff]  ;;  %v10275_v55 = vld [vmem:[#allocation13 + $0x120] sm:$0xff] }
 0x62f   :  { %v5570_v25 = vadd.f32 %v5569_v60, %v5557_v46  ;;  %v10281_v60 = vld [vmem:[#allocation13 + $0x150] sm:$0xff] }
 0x630   :  { %6354 = vmatpush.bf16.msrb.mxu2 %v10252_v51  ;;  %5800 = vmatpush.bf16.msra.mxu0 %v9089_v45  ;;  %v5544_v53 = vadd.f32 %v10954_v31, %v5531_v42  ;;  %v10274_v45 = vld [vmem:[#allocation13 + $0x118] sm:$0xff]  ;;  %v10263_v31 = vld [vmem:[#allocation13 + $0xc0] sm:$0xff]  ;;  %v10289_v36 = vld [vmem:[#allocation13 + $0x190] sm:$0xff] }
 0x631   :  { %5789 = vmatmul.bf16.vlgmr.msrb.gmra.mxu3 %v10901_v59  ;;  %v10239_v59 = vld [vmem:[#allocation13] sm:$0xff] }
 0x632   :  { %6343 = vmatpush.bf16.msra.mxu1 %v10242_v50  ;;  %6365 = vmatpush.bf16.msra.mxu3 %v10262_v63  ;;  %v5571_v32 = vpop.f32.mrf.mxu2  ;;  %v10255_v63 = vld [vmem:[#allocation13 + $0x80] sm:$0xff]  ;;  %v5809_v39 = vmax.f32 %v5544_v53, 0.0 }
 0x633   :  { %v10293_v32 = vld [vmem:[#allocation13 + $0x1b0] sm:$0xff] }
 0x634   :  { %6355 = vmatpush.bf16.msrb.mxu2 %v10251_v0  ;;  %5801 = vmatpush.bf16.msra.mxu0 %v9057_v3  ;;  %v5582_v9 = vpop.f32.mrf.mxu3  ;;  %v5595_v33 = vpop.f32.mrf.mxu0  ;;  %v10284_v0 = vld [vmem:[#allocation13 + $0x168] sm:$0xff]  ;;  %v5946_v4 = vpack.c.bf16 %v5809_v39, %v5809_v39  ;;  %v10297_v39 = vld [vmem:[#allocation13 + $0x1d0] sm:$0xff] }
 0x635   :  { %v5583_v50 = vadd.f32 %v5582_v9, %v5570_v25  ;;  %v10272_v3 = vld [vmem:[#allocation13 + $0x108] sm:$0xff]  ;;  %v10291_v9 = vld [vmem:[#allocation13 + $0x1a0] sm:$0xff] }
 0x636   :  { %6344 = vmatpush.bf16.msra.mxu1 %v10241_v61  ;;  %6366 = vmatpush.bf16.msra.mxu3 %v10261_v6  ;;  %v10283_v61 = vld [vmem:[#allocation13 + $0x160] sm:$0xff] }
 0x637   :  { %5802 = vmatmul.bf16.vlgmr.msra.gmra.mxu0 %v10905_v16  ;;  %v10258_v16 = vld [vmem:[#allocation13 + $0x98] sm:$0xff]  ;;  %v5596_v1 = vadd.f32 %v5595_v33, %v5583_v50 }
 0x638   :  { %6356 = vmatpush.bf16.msrb.mxu2 %v10250_v8  ;;  %6378 = vmatpush.bf16.msrb.mxu0 %v10270_v11  ;;  %v10271_v11 = vld [vmem:[#allocation13 + $0x100] sm:$0xff]  ;;  %v10298_v50 = vld [vmem:[#allocation13 + $0x1d8] sm:$0xff] }
 0x639   :  { %v5810_v58 = vmax.f32 %v5596_v1, 0.0  ;;  %v10296_v1 = vld [vmem:[#allocation13 + $0x1c8] sm:$0xff] }
 0x63a   :  { %6345 = vmatpush.bf16.msra.mxu1 %v10240_v12  ;;  %6367 = vmatpush.bf16.msra.mxu3 %v10260_v47 }
 0x63b   :  { %v5947_v8 = vpack.c.bf16 %v5810_v58, %v5810_v58  ;;  %v10295_v58 = vld [vmem:[#allocation13 + $0x1c0] sm:$0xff] }
 0x63c   :  { %6357 = vmatpush.bf16.msrb.mxu2 %v10249_v13  ;;  %6379 = vmatpush.bf16.msrb.mxu0 %v10269_v21  ;;  %v5584_v51 = vpop.f32.mrf.mxu3  ;;  %v5597_v30 = vpop.f32.mrf.mxu0  ;;  %v10280_v21 = vld [vmem:[#allocation13 + $0x148] sm:$0xff] }
 0x63e   :  { %6346 = vmatpush.bf16.msra.mxu1 %v10239_v59  ;;  %6368 = vmatpush.bf16.msra.mxu3 %v10259_v29  ;;  %v5608_v43 = vpop.f32.mrf.mxu1  ;;  %v10279_v29 = vld [vmem:[#allocation13 + $0x140] sm:$0xff] }
 0x63f   :  { %v5609_v56 = vadd.f32 %v5608_v43, %v4099_v10 }
 0x640   :  { %6358 = vmatpush.bf16.msrb.mxu2 %v10248_v23  ;;  %6380 = vmatpush.bf16.msrb.mxu0 %v10268_v37  ;;  %v10294_v23 = vld [vmem:[#allocation13 + $0x1b8] sm:$0xff] }
 0x641   :  { %6347 = vmatmul.bf16.vlgmr.msra.gmra.mxu1 %v5944_v24  ;;  %v10292_v24 = vld [vmem:[#allocation13 + $0x1a8] sm:$0xff] }
 0x642   :  { %6391 = vmatpush.bf16.msrb.mxu1 %v10278_v20  ;;  %6369 = vmatpush.bf16.msra.mxu3 %v10258_v16 }
 0x644   :  { %6359 = vmatpush.bf16.msrb.mxu2 %v10247_v34  ;;  %6381 = vmatpush.bf16.msrb.mxu0 %v10267_v40  ;;  %v10290_v34 = vld [vmem:[#allocation13 + $0x198] sm:$0xff] }
 0x646   :  { %6392 = vmatpush.bf16.msrb.mxu1 %v10277_v52  ;;  %6370 = vmatpush.bf16.msra.mxu3 %v10257_v22  ;;  %v5610_v57 = vpop.f32.mrf.mxu1 }
 0x647   :  { %6360 = vmatmul.bf16.vlgmr.msrb.gmra.mxu2 %v5945_v41  ;;  %v10288_v41 = vld [vmem:[#allocation13 + $0x188] sm:$0xff] }
 0x648   :  { %6404 = vmatpush.bf16.msra.mxu2 %v10286_v48  ;;  %6382 = vmatpush.bf16.msrb.mxu0 %v10266_v44  ;;  %v10302_v48 = vld [vmem:[#allocation13 + $0x1f8] sm:$0xff] }
 0x64a   :  { %6393 = vmatpush.bf16.msrb.mxu1 %v10276_v18  ;;  %6371 = vmatpush.bf16.msra.mxu3 %v10256_v49  ;;  %v5621_v6 = vpop.f32.mrf.mxu2  ;;  %v10287_v18 = vld [vmem:[#allocation13 + $0x180] sm:$0xff]  ;;  %v10301_v49 = vld [vmem:[#allocation13 + $0x1f0] sm:$0xff] }
 0x64b   :  { %v5622_v2 = vadd.f32 %v5621_v6, %v5609_v56 }
 0x64c   :  { %6405 = vmatpush.bf16.msra.mxu2 %v10285_v26  ;;  %6383 = vmatpush.bf16.msrb.mxu0 %v10265_v17  ;;  %v10300_v26 = vld [vmem:[#allocation13 + $0x1e8] sm:$0xff]  ;;  %v10299_v17 = vld [vmem:[#allocation13 + $0x1e0] sm:$0xff] }
 0x64e   :  { %6394 = vmatpush.bf16.msrb.mxu1 %v10275_v55  ;;  %6372 = vmatpush.bf16.msra.mxu3 %v10255_v63  ;;  %v4101_v63 = vperm.slane %v10959_v38, 6 }
 0x650   :  { %6406 = vmatpush.bf16.msra.mxu2 %v10284_v0  ;;  %6384 = vmatpush.bf16.msrb.mxu0 %v10264_v19 }
 0x651   :  { %6373 = vmatmul.bf16.vlgmr.msra.gmra.mxu3 %v5946_v4 }
 0x652   :  { %6395 = vmatpush.bf16.msrb.mxu1 %v10274_v45  ;;  %v5623_v12 = vpop.f32.mrf.mxu2  ;;  %6417 = vmatpush.bf16.msrb.mxu3 %v10294_v23 }
 0x654   :  { %6407 = vmatpush.bf16.msra.mxu2 %v10283_v61  ;;  %6385 = vmatpush.bf16.msrb.mxu0 %v10263_v31  ;;  %v5634_v47 = vpop.f32.mrf.mxu3  ;;  %v5647_v13 = vpop.f32.mrf.mxu0 }
 0x655   :  { %v5635_v15 = vadd.f32 %v5634_v47, %v5622_v2 }
 0x656   :  { %6396 = vmatpush.bf16.msrb.mxu1 %v10273_v5  ;;  %6418 = vmatpush.bf16.msrb.mxu3 %v10293_v32 }
 0x657   :  { %6386 = vmatmul.bf16.vlgmr.msrb.gmra.mxu0 %v5947_v8  ;;  %v5648_v59 = vadd.f32 %v5647_v13, %v5635_v15 }
 0x658   :  { %6408 = vmatpush.bf16.msra.mxu2 %v10282_v7  ;;  %6430 = vmatpush.bf16.msra.mxu0 %v10302_v48 }
 0x659   :  { %v5811_v62 = vmax.f32 %v5648_v59, 0.0 }
 0x65a   :  { %6397 = vmatpush.bf16.msrb.mxu1 %v10272_v3  ;;  %6419 = vmatpush.bf16.msrb.mxu3 %v10292_v24 }
 0x65b   :  { %v5948_v28 = vpack.c.bf16 %v5811_v62, %v5811_v62 }
 0x65c   :  { %6409 = vmatpush.bf16.msra.mxu2 %v10281_v60  ;;  %v5636_v37 = vpop.f32.mrf.mxu3  ;;  %v5649_v20 = vpop.f32.mrf.mxu0  ;;  %6431 = vmatpush.bf16.msra.mxu0 %v10301_v49  ;;  %v4102_v60 = vperm.slane %v10959_v38, 7 }
 0x65e   :  { %6398 = vmatpush.bf16.msrb.mxu1 %v10271_v11  ;;  %v5660_v14 = vpop.f32.mrf.mxu1  ;;  %6420 = vmatpush.bf16.msrb.mxu3 %v10291_v9 }
 0x65f   :  { %v5661_v40 = vadd.f32 %v5660_v14, %v4100_v35  ;;  %v10322_v14 = vld [vmem:[%s11035_s1] ss:$0 sm:$0xff] }
 0x660   :  { %6410 = vmatpush.bf16.msra.mxu2 %v10280_v21  ;;  %6432 = vmatpush.bf16.msra.mxu0 %v10300_v26 }
 0x661   :  { %6399 = vmatmul.bf16.vlgmr.msrb.gmra.mxu1 %v5948_v28 }
 0x662   :  { %6421 = vmatpush.bf16.msrb.mxu3 %v10290_v34 }
 0x664   :  { %6411 = vmatpush.bf16.msra.mxu2 %v10279_v29  ;;  %6433 = vmatpush.bf16.msra.mxu0 %v10299_v17 }
 0x666   :  { %v5662_v16 = vpop.f32.mrf.mxu1  ;;  %6422 = vmatpush.bf16.msrb.mxu3 %v10289_v36 }
 0x668   :  { %6434 = vmatpush.bf16.msra.mxu0 %v10298_v50 }
 0x66a   :  { %v5673_v33 = vpop.f32.mrf.mxu2  ;;  %6423 = vmatpush.bf16.msrb.mxu3 %v10288_v41 }
 0x66b   :  { %v5674_v27 = vadd.f32 %v5673_v33, %v5661_v40 }
 0x66c   :  { %6435 = vmatpush.bf16.msra.mxu0 %v10297_v39 }
 0x66e   :  { %6424 = vmatpush.bf16.msrb.mxu3 %v10287_v18 }
 0x670   :  { %6436 = vmatpush.bf16.msra.mxu0 %v10296_v1 }
 0x672   :  { %v5675_v52 = vpop.f32.mrf.mxu2 }
 0x674   :  { %v5686_v54 = vpop.f32.mrf.mxu3  ;;  %v5699_v22 = vpop.f32.mrf.mxu0  ;;  %6437 = vmatpush.bf16.msra.mxu0 %v10295_v58 }
 0x675   :  { %v5687_v42 = vadd.f32 %v5686_v54, %v5674_v27 }
 0x677   :  { %v5700_v44 = vadd.f32 %v5699_v22, %v5687_v42 }
 0x679   :  { %v5812_v46 = vmax.f32 %v5700_v44, 0.0 }
 0x67b   :  { %v5949_v43 = vpack.c.bf16 %v5812_v46, %v5812_v46 }
 0x67c   :  { %v5688_v51 = vpop.f32.mrf.mxu3  ;;  %v5701_v30 = vpop.f32.mrf.mxu0 }
 0x67d   :  { %6412 = vmatmul.bf16.vlgmr.msra.gmra.mxu2 %v5949_v43 }
 0x67e   :  { %v5712_v25 = vpop.f32.mrf.mxu1 }
 0x67f   :  { %v5713_v19 = vadd.f32 %v5712_v25, %v4101_v63 }
 0x686   :  { %v5714_v53 = vpop.f32.mrf.mxu1 }
 0x68a   :  { %v5725_v55 = vpop.f32.mrf.mxu2 }
 0x68b   :  { %v5726_v0 = vadd.f32 %v5725_v55, %v5713_v19 }
 0x692   :  { %v5727_v45 = vpop.f32.mrf.mxu2 }
 0x694   :  { %v5738_v57 = vpop.f32.mrf.mxu3  ;;  %v5751_v4 = vpop.f32.mrf.mxu0 }
 0x695   :  { %v5739_v31 = vadd.f32 %v5738_v57, %v5726_v0 }
 0x697   :  { %v5752_v5 = vadd.f32 %v5751_v4, %v5739_v31 }
 0x699   :  { %v5813_v61 = vmax.f32 %v5752_v5, 0.0 }
 0x69b   :  { %v5950_v6 = vpack.c.bf16 %v5813_v61, %v5813_v61 }
 0x69c   :  { %v5740_v3 = vpop.f32.mrf.mxu3  ;;  %v5753_v8 = vpop.f32.mrf.mxu0 }
 0x69d   :  { %6425 = vmatmul.bf16.vlgmr.msrb.gmra.mxu3 %v5950_v6 }
 0x69e   :  { %v5764_v7 = vpop.f32.mrf.mxu1 }
 0x69f   :  { %v5765_v56 = vadd.f32 %v5764_v7, %v4102_v60 }
 0x6a6   :  { %v5766_v10 = vpop.f32.mrf.mxu1 }
 0x6aa   :  { %v5777_v11 = vpop.f32.mrf.mxu2 }
 0x6ab   :  { %v5778_v2 = vadd.f32 %v5777_v11, %v5765_v56 }
 0x6b2   :  { %v5779_v12 = vpop.f32.mrf.mxu2 }
 0x6b4   :  { %v5790_v47 = vpop.f32.mrf.mxu3  ;;  %v5803_v13 = vpop.f32.mrf.mxu0 }
 0x6b5   :  { %v5791_v15 = vadd.f32 %v5790_v47, %v5778_v2 }
 0x6b7   :  { %v5804_v21 = vadd.f32 %v5803_v13, %v5791_v15 }
 0x6b9   :  { %v5814_v59 = vmax.f32 %v5804_v21, 0.0 }
 0x6bb   :  { %v5951_v62 = vpack.c.bf16 %v5814_v59, %v5814_v59 }
 0x6bc   :  { %v5792_v23 = vpop.f32.mrf.mxu3  ;;  %v5805_v28 = vpop.f32.mrf.mxu0 }
 0x6bd   :  { %6438 = vmatmul.bf16.vlgmr.msra.gmra.mxu0 %v5951_v62 }
 0x6be   :  { %v6348_v29 = vpop.f32.mrf.mxu1 }
 0x6bf   :  { %v6349_v20 = vadd.f32 %v10322_v14, %v6348_v29 }
 0x6c6   :  { %v6350_v37 = vpop.f32.mrf.mxu1 }
 0x6ca   :  { %v6361_v38 = vpop.f32.mrf.mxu2 }
 0x6cb   :  { %v6362_v32 = vadd.f32 %v6361_v38, %v6349_v20 }
 0x6d2   :  { %v6363_v24 = vpop.f32.mrf.mxu2 }
 0x6d4   :  { %v6387_v16 = vpop.f32.mrf.mxu0  ;;  %v6374_v9 = vpop.f32.mrf.mxu3 }
 0x6d5   :  { %v6375_v33 = vadd.f32 %v6374_v9, %v6362_v32 }
 0x6d7   :  { %v6388_v34 = vadd.f32 %v6387_v16, %v6375_v33 }
 0x6dc   :  { %v6389_v35 = vpop.f32.mrf.mxu0  ;;  %v6376_v36 = vpop.f32.mrf.mxu3 }
 0x6de   :  { %v6400_v40 = vpop.f32.mrf.mxu1 }
 0x6df   :  { %v6401_v52 = vadd.f32 %v6400_v40, %v6388_v34 }
 0x6e6   :  { %v6402_v27 = vpop.f32.mrf.mxu1 }
 0x700   :  { %v6413_v54 = vpop.f32.mrf.mxu2 }
 0x701   :  { %v6414_v44 = vadd.f32 %v6413_v54, %v6401_v52 }
 0x708   :  { %v6415_v22 = vpop.f32.mrf.mxu2 }
 0x720   :  { %v6426_v41 = vpop.f32.mrf.mxu3 }
 0x721   :  { %v6427_v18 = vadd.f32 %v6426_v41, %v6414_v44 }
 0x728   :  { %v6428_v42 = vpop.f32.mrf.mxu3 }
 0x73a   :  { %v6439_v46 = vpop.f32.mrf.mxu0 }
 0x73b   :  { %v6440_v48 = vadd.f32 %v6439_v46, %v6427_v18 }
 0x73d   :  { %v9538_v43 = vmul.f32 -1.442695, %v6440_v48 }
 0x73f   :  { %10323 = vpow2.f32 %v9538_v43 }
 0x742   :  { %v6441_v25 = vpop.f32.mrf.mxu0 }
 0x745   :  { %v10324_v49 = vpop.eup %10323 }
 0x746   :  { %v6446_v51 = vadd.f32 1.0, %v10324_v49 }
 0x748   :  { %10325 = vrcp.f32 %v6446_v51  ;;  %v6458_v17 = vand.u32 2147483648, %v6446_v51  ;;  %v6456_v50 = vand.u32 2147483647, %v6446_v51  ;;  %vm6452_vm3 = vweird.f32 %v6446_v51 }
 0x74a   :  { %v6459_v39 = vor.u32 1.1754944e-38, %v6458_v17  ;;  %vm6457_vm6 = vcmp.eq.f32.partialorder %v6456_v50, 8.507059e+37 }
 0x74e   :  { %v10326_v30 = vpop.eup %10325 }
 0x74f   :  { %v6448_v26 = vmul.f32 %v10326_v30, %v6446_v51  ;;  %vm6453_vm2 = vweird.f32 %v10326_v30 }
 0x750   :  { %vm6454_vm4 = vmor %vm6452_vm3, %vm6453_vm2 }
 0x751   :  { %v6449_v53 = vsub.f32 1.0, %v6448_v26 }
 0x753   :  { %v6450_v55 = vmul.f32 %v10326_v30, %v6449_v53 }
 0x755   :  { %v6451_v63 = vadd.f32 %v10326_v30, %v6450_v55 }
 0x757   :  { %v6455_v19 = vsel %vm6454_vm4, %v10326_v30, %v6451_v63 }
 0x758   :  { %v6460_v45 = vsel %vm6457_vm6, %v6459_v39, %v6455_v19 }
 0x759   :  { %6463 = vst.msk [vmem:[%s11036_s2] sm:$0xff] %vm6462_vm5, %v6460_v45 }
 0x75a   :  { %6468 = vsyncpa [#allocation3], 1 }
 0x75b   :  { %6469 = vsyncpa [#allocation5], 1 }
 0x75c   :  { %6470 = vsyncpa [#allocation8], 1 }
 0x75d   :  { %6471 = vsyncpa [#allocation11], 1 }
 0x75e   :  { %6472 = vsyncpa [#allocation14], 1 }

</bundles_post_ra>
